<compile_context>
chip_gen: v7x
topology: tpu7x:2x2x1
jax: 0.10.0
libtpu: 0.0.40
codegen_flags: <defaults>
</compile_context>

<pallas_src>
import math
import functools

import jax
import jax.numpy as jnp
from jax.experimental import pallas as pl
from jax.experimental.pallas import tpu as pltpu


# ----------------------------- Pallas kernel --------------------------------

def _encoder_stack_kernel(src_ref, pos_ref,
                          wqk_ref, bqk_ref, wv_ref, bv_ref, wo_ref, bo_ref,
                          ln1_g_ref, ln1_b_ref,
                          w1_ref, b1_ref, w2_ref, b2_ref,
                          ln2_g_ref, ln2_b_ref,
                          out_ref,
                          x_scratch,
                          *, nhead):
    l = pl.program_id(1)
    last = pl.num_programs(1) - 1

    # Seed the VMEM-resident activation from src once per batch element.
    @pl.when(l == 0)
    def _():
        x_scratch[...] = src_ref[0]

    src = x_scratch[...]            # (S, D) f32, resident across layers
    pos = pos_ref[0]                # (S, D) f32
    D = src.shape[-1]
    hd = D // nhead

    # --- multi-head self attention (pos added to q, k only) ---
    # Fused Q/K projection; 1/sqrt(hd) already folded into wq/bq at pack time.
    qk_in = (src + pos).astype(jnp.bfloat16)
    QK = jnp.dot(qk_in, wqk_ref[l],
                 preferred_element_type=jnp.float32) + bqk_ref[l]        # (S, 2D) f32
    V = jnp.dot(src.astype(jnp.bfloat16), wv_ref[l],
                preferred_element_type=jnp.float32) + bv_ref[l]          # (S, D) f32

    Qb = QK[:, :D].astype(jnp.bfloat16)
    Kb = QK[:, D:].astype(jnp.bfloat16)
    Vb = V.astype(jnp.bfloat16)

    # TODO(synk): src_mask (additive attention mask) not wired; the D-FINE hybrid
    # encoder always calls this with src_mask=None.
    # Output projection folded into the head loop: accumulate (p_h @ v_h) @ wo[h]
    # into a full-width f32 (S, D) accumulator -> no narrow (hd-lane) stores and no
    # attention scratch round trip.
    attn = None
    for h in range(nhead):          # static unroll; nhead is small
        qh = Qb[:, h * hd:(h + 1) * hd]
        kh = Kb[:, h * hd:(h + 1) * hd]
        vh = Vb[:, h * hd:(h + 1) * hd]
        # Contract over the head dim of both operands -> no explicit K transpose.
        logits = jax.lax.dot_general(
            qh, kh, dimension_numbers=(((1,), (1,)), ((), ())),
            preferred_element_type=jnp.float32)                          # (S, S) f32
        logits = logits - jnp.max(logits, axis=-1, keepdims=True)
        p = jnp.exp(logits)
        p = p * pl.reciprocal(jnp.sum(p, axis=-1, keepdims=True), approx=True)
        ctx = jnp.dot(p.astype(jnp.bfloat16), vh,
                      preferred_element_type=jnp.float32)                # (S, hd) f32
        head_out = jnp.dot(ctx.astype(jnp.bfloat16), wo_ref[l, h],
                           preferred_element_type=jnp.float32)           # (S, D) f32
        attn = head_out if attn is None else attn + head_out
    attn = attn + bo_ref[l]

    # --- residual + LayerNorm 1 (f32) ---
    x = src + attn
    mu = jnp.mean(x, axis=-1, keepdims=True)
    var = jnp.mean(jnp.square(x - mu), axis=-1, keepdims=True)
    x = (x - mu) * jax.lax.rsqrt(var + 1e-5) * ln1_g_ref[l] + ln1_b_ref[l]

    # --- feed forward (tanh GELU -> EUP; bf16 MXU operands, f32 accum) ---
    h1 = jnp.dot(x.astype(jnp.bfloat16), w1_ref[l],
                 preferred_element_type=jnp.float32) + b1_ref[l]
    h1 = jax.nn.gelu(h1, approximate=True)
    h2 = jnp.dot(h1.astype(jnp.bfloat16), w2_ref[l],
                 preferred_element_type=jnp.float32) + b2_ref[l]

    # --- residual + LayerNorm 2 ---
    y = x + h2
    mu = jnp.mean(y, axis=-1, keepdims=True)
    var = jnp.mean(jnp.square(y - mu), axis=-1, keepdims=True)
    y = (y - mu) * jax.lax.rsqrt(var + 1e-5) * ln2_g_ref[l] + ln2_b_ref[l]

    # Keep the activation resident across layers; on the last layer store only to
    # out_ref (no redundant scratch store).
    @pl.when(l < last)
    def _():
        x_scratch[...] = y

    @pl.when(l == last)
    def _():
        out_ref[0] = y


# ----------------------------- host-side packing -----------------------------

def pack_stack_params(layer_params_list, nhead):
    """Stack per-layer params over a leading L axis, fuse Q/K into one (D, 2D)
    matmul, fold 1/sqrt(head_dim) into wq/bq, reshape wo to (nhead, hd, D) for
    per-head ref loads, and cast matmul weights to bf16 (MXU operands).
    Biases / LayerNorm params stay f32."""
    D = layer_params_list[0]["wq"].shape[0]
    assert D % nhead == 0, "d_model must be divisible by nhead"
    hd = D // nhead
    scale = 1.0 / math.sqrt(hd)

    def stack(fn):
        return jnp.stack([fn(p) for p in layer_params_list], axis=0)

    return {
        "wqk": stack(lambda p: jnp.concatenate(
            [p["wq"] * scale, p["wk"]], axis=1).astype(jnp.bfloat16)),   # (L, D, 2D)
        "bqk": stack(lambda p: jnp.concatenate(
            [p["bq"] * scale, p["bk"]], axis=1)),                        # (L, 1, 2D)
        "wv": stack(lambda p: p["wv"].astype(jnp.bfloat16)),             # (L, D, D)
        "bv": stack(lambda p: p["bv"]),
        "wo": stack(lambda p: p["wo"].reshape(nhead, hd, D)
                    .astype(jnp.bfloat16)),                              # (L, H, hd, D)
        "bo": stack(lambda p: p["bo"]),
        "ln1_g": stack(lambda p: p["ln1_g"]),
        "ln1_b": stack(lambda p: p["ln1_b"]),
        "w1": stack(lambda p: p["w1"].astype(jnp.bfloat16)),             # (L, D, FF)
        "b1": stack(lambda p: p["b1"]),
        "w2": stack(lambda p: p["w2"].astype(jnp.bfloat16)),             # (L, FF, D)
        "b2": stack(lambda p: p["b2"]),
        "ln2_g": stack(lambda p: p["ln2_g"]),
        "ln2_b": stack(lambda p: p["ln2_b"]),
    }


def _spec(block_shape, index_map, single_buffer):
    """BlockSpec helper; requests single-buffering when supported."""
    if single_buffer:
        try:
            return pl.BlockSpec(block_shape, index_map,
                                pipeline_mode=pl.Buffered(1))
        except Exception:  # pipeline_mode not available on this JAX build
            pass
    return pl.BlockSpec(block_shape, index_map)


def transformer_encoder_pallas(src, pos, layer_params_list, nhead):
    """Run the whole encoder stack in one pallas_call. src: (B,S,D), pos: (1,S,D)."""
    B, S, D = src.shape
    L = len(layer_params_list)
    assert D % nhead == 0, "d_model must be divisible by nhead"
    packed = pack_stack_params(layer_params_list, nhead)

    names = ["wqk", "bqk", "wv", "bv", "wo", "bo", "ln1_g", "ln1_b",
             "w1", "b1", "w2", "b2", "ln2_g", "ln2_b"]
    weights = [packed[n] for n in names]
    FF = packed["w1"].shape[-1]

    # VMEM budget derived from footprint: resident all-layer weights + activation
    # blocks + in-kernel transients (QK, V, h1, per-head logits).  Floor 32 MiB
    # (v5e scoped default is only 16 MiB), cap 96 MiB (safe even on v7x only when
    # the footprint genuinely needs it; at D-FINE shapes this stays at 32 MiB).
    w_bytes = sum(int(w.size) * w.dtype.itemsize for w in weights)
    act_bytes = S * D * 4
    tmp_bytes = S * (2 * D + D + FF) * 4 + S * S * 4
    vmem_limit = int(max(32 << 20,
                         min(96 << 20, 4 * (w_bytes + 6 * act_bytes + tmp_bytes))))

    kernel = functools.partial(_encoder_stack_kernel, nhead=nhead)
    out_shape = jax.ShapeDtypeStruct((B, S, D), jnp.float32)

    def build_and_run(single_buffer):
        def wfull(arr):
            zeros = (0,) * arr.ndim

            def imap(b, l):
                # Constant block index: the stacked weights are DMA'd exactly once
                # (never re-streamed per batch element); kernel indexes w_ref[l].
                return zeros

            return _spec(arr.shape, imap, single_buffer)

        in_specs = [
            _spec((1, S, D), lambda b, l: (b, 0, 0), single_buffer),   # src (read at l==0)
            _spec((1, S, D), lambda b, l: (0, 0, 0), single_buffer),   # pos (constant)
        ] + [wfull(w) for w in weights]

        out_spec = pl.BlockSpec((1, S, D), lambda b, l: (b, 0, 0))     # constant over L

        return pl.pallas_call(
            kernel,
            out_shape=out_shape,
            grid_spec=pltpu.PrefetchScalarGridSpec(
                num_scalar_prefetch=0,
                grid=(B, L),                      # layer axis last (sequential carry)
                in_specs=in_specs,
                out_specs=out_spec,
                scratch_shapes=[
                    pltpu.VMEM((S, D), jnp.float32),   # resident activation across layers
                ],
            ),
            compiler_params=pltpu.CompilerParams(
                dimension_semantics=("parallel", "arbitrary"),
                vmem_limit_bytes=vmem_limit),
        )(src, pos, *weights)

    try:
        return build_and_run(True)
    except Exception:
        # Fall back to default (double-buffered) BlockSpecs if single-buffering
        # is rejected by this JAX/Mosaic build.
        return build_and_run(False)


# ----------------------------- pure-JAX reference ---------------------------

def _ref_layer(src, pos, p, nhead, mm_dtype, gelu_approx):
    B, S, D = src.shape
    hd = D // nhead
    scale = 1.0 / math.sqrt(hd)

    def mm(a, w):
        return jnp.dot(a.astype(mm_dtype), w.astype(mm_dtype),
                       preferred_element_type=jnp.float32)

    qk = src + pos
    # scale folded into wq/bq (mathematically identical to scaling the logits)
    Q = mm(qk, p["wq"] * scale) + p["bq"] * scale
    K = mm(qk, p["wk"]) + p["bk"]
    V = mm(src, p["wv"]) + p["bv"]

    def split(x):
        return x.reshape(B, S, nhead, hd).transpose(0, 2, 1, 3).astype(mm_dtype)

    Qh, Kh, Vh = split(Q), split(K), split(V)
    logits = jnp.einsum("bhqd,bhkd->bhqk", Qh, Kh,
                        preferred_element_type=jnp.float32)
    probs = jax.nn.softmax(logits, axis=-1)
    attn = jnp.einsum("bhqk,bhkd->bhqd", probs.astype(mm_dtype), Vh,
                      preferred_element_type=jnp.float32)
    attn = attn.transpose(0, 2, 1, 3).reshape(B, S, D)
    attn = mm(attn, p["wo"]) + p["bo"]

    def ln(x, g, b):
        mu = jnp.mean(x, axis=-1, keepdims=True)
        var = jnp.mean(jnp.square(x - mu), axis=-1, keepdims=True)
        return (x - mu) * jax.lax.rsqrt(var + 1e-5) * g + b

    x = ln(src + attn, p["ln1_g"], p["ln1_b"])
    h = jax.nn.gelu(mm(x, p["w1"]) + p["b1"], approximate=gelu_approx)
    y = x + mm(h, p["w2"]) + p["b2"]
    return ln(y, p["ln2_g"], p["ln2_b"])


def _ref_encoder(src, pos, layer_params_list, nhead,
                 mm_dtype=jnp.float32, gelu_approx=False):
    for p in layer_params_list:
        src = _ref_layer(src, pos, p, nhead, mm_dtype, gelu_approx)
    return src


# ----------------------------- param init -----------------------------------

def init_layer_params(key, d_model, ff_dim):
    ks = jax.random.split(key, 6)
    s_attn = 1.0 / math.sqrt(d_model)
    s_ff = 1.0 / math.sqrt(ff_dim)
    return {
        # (in, out) layout so the kernel does x @ W + b
        "wq": jax.random.normal(ks[0], (d_model, d_model), jnp.float32) * s_attn,
        "bq": jnp.zeros((1, d_model), jnp.float32),
        "wk": jax.random.normal(ks[1], (d_model, d_model), jnp.float32) * s_attn,
        "bk": jnp.zeros((1, d_model), jnp.float32),
        "wv": jax.random.normal(ks[2], (d_model, d_model), jnp.float32) * s_attn,
        "bv": jnp.zeros((1, d_model), jnp.float32),
        "wo": jax.random.normal(ks[3], (d_model, d_model), jnp.float32) * s_attn,
        "bo": jnp.zeros((1, d_model), jnp.float32),
        "ln1_g": jnp.ones((1, d_model), jnp.float32),
        "ln1_b": jnp.zeros((1, d_model), jnp.float32),
        "w1": jax.random.normal(ks[4], (d_model, ff_dim), jnp.float32) * s_attn,
        "b1": jnp.zeros((1, ff_dim), jnp.float32),
        "w2": jax.random.normal(ks[5], (ff_dim, d_model), jnp.float32) * s_ff,
        "b2": jnp.zeros((1, d_model), jnp.float32),
        "ln2_g": jnp.ones((1, d_model), jnp.float32),
        "ln2_b": jnp.zeros((1, d_model), jnp.float32),
    }


def sincos_pos_embed(S, D, temperature=10000.0):
    # 1-D sin/cos positional embedding stand-in for build_2d_sincos_position_embedding
    pos = jnp.arange(S, dtype=jnp.float32)[:, None]
    dim = jnp.arange(D // 2, dtype=jnp.float32)[None, :]
    omega = 1.0 / (temperature ** (dim / (D // 2)))
    out = pos * omega
    return jnp.concatenate([jnp.sin(out), jnp.cos(out)], axis=-1)[None]   # (1, S, D)


# ----------------------------- main ------------------------------------------

if __name__ == "__main__":
    B, S, D = 2, 8, 32
    NHEAD, FF, NUM_LAYERS = 4, 64, 2

    key = jax.random.PRNGKey(0)
    k_src, *k_layers = jax.random.split(key, NUM_LAYERS + 1)

    src = jax.random.normal(k_src, (B, S, D), jnp.float32)
    pos = sincos_pos_embed(S, D)
    layer_params = [init_layer_params(k, D, FF) for k in k_layers]

    out = transformer_encoder_pallas(src, pos, layer_params, NHEAD)
    out = jax.block_until_ready(out)
    assert out.shape == (B, S, D)

    # Tight check against a reference emulating the kernel's numerics
    # (bf16-operand / f32-accumulate matmuls, tanh GELU).
    ref_tight = _ref_encoder(src, pos, layer_params, NHEAD,
                             mm_dtype=jnp.bfloat16, gelu_approx=True)
    assert jnp.allclose(out, ref_tight, atol=2e-2, rtol=2e-2), (
        float(jnp.max(jnp.abs(out - ref_tight))))

    # Loose sanity check against pure-f32 exact-GELU module semantics
    # (tolerance widened for bf16 MXU operands + approx softmax reciprocal).
    ref_f32 = _ref_encoder(src, pos, layer_params, NHEAD,
                           mm_dtype=jnp.float32, gelu_approx=False)
    assert jnp.allclose(out, ref_f32, atol=2e-1, rtol=2e-1), (
        float(jnp.max(jnp.abs(out - ref_f32))))

    print("KERNEL_OK")
</pallas_src>

<mosaic_0001>
module attributes {stable_mosaic.version = 11 : i64} {
  func.func @_encoder_stack_kernel(%arg0: i32, %arg1: i32, %arg2: memref<1x8x32xf32, #tpu.memory_space<vmem>>, %arg3: memref<1x8x32xf32, #tpu.memory_space<vmem>>, %arg4: memref<2x32x64xbf16, #tpu.memory_space<vmem>>, %arg5: memref<2x1x64xf32, #tpu.memory_space<vmem>>, %arg6: memref<2x32x32xbf16, #tpu.memory_space<vmem>>, %arg7: memref<2x1x32xf32, #tpu.memory_space<vmem>>, %arg8: memref<2x4x8x32xbf16, #tpu.memory_space<vmem>>, %arg9: memref<2x1x32xf32, #tpu.memory_space<vmem>>, %arg10: memref<2x1x32xf32, #tpu.memory_space<vmem>>, %arg11: memref<2x1x32xf32, #tpu.memory_space<vmem>>, %arg12: memref<2x32x64xbf16, #tpu.memory_space<vmem>>, %arg13: memref<2x1x64xf32, #tpu.memory_space<vmem>>, %arg14: memref<2x64x32xbf16, #tpu.memory_space<vmem>>, %arg15: memref<2x1x32xf32, #tpu.memory_space<vmem>>, %arg16: memref<2x1x32xf32, #tpu.memory_space<vmem>>, %arg17: memref<2x1x32xf32, #tpu.memory_space<vmem>>, %arg18: memref<1x8x32xf32, #tpu.memory_space<vmem>>, %arg19: memref<8x32xf32, #tpu.memory_space<vmem>>) attributes {dimension_semantics = [#tpu.dimension_semantics<parallel>, #tpu.dimension_semantics<arbitrary>], iteration_bounds = array<i64: 2, 2>, scalar_prefetch = 0 : i64, scratch_operands = 1 : i64, tpu.core_type = #tpu.core_type<tc>, window_params = [{pipeline_mode = #tpu.pipeline_mode<synchronous>, transform_indices = @transform_0, window_bounds = array<i64: 1, 8, 32>}, {pipeline_mode = #tpu.pipeline_mode<synchronous>, transform_indices = @transform_1, window_bounds = array<i64: 1, 8, 32>}, {pipeline_mode = #tpu.pipeline_mode<synchronous>, transform_indices = @transform_2, window_bounds = array<i64: 2, 32, 64>}, {pipeline_mode = #tpu.pipeline_mode<synchronous>, transform_indices = @transform_3, window_bounds = array<i64: 2, 1, 64>}, {pipeline_mode = #tpu.pipeline_mode<synchronous>, transform_indices = @transform_4, window_bounds = array<i64: 2, 32, 32>}, {pipeline_mode = #tpu.pipeline_mode<synchronous>, transform_indices = @transform_5, window_bounds = array<i64: 2, 1, 32>}, {pipeline_mode = #tpu.pipeline_mode<synchronous>, transform_indices = @transform_6, window_bounds = array<i64: 2, 4, 8, 32>}, {pipeline_mode = #tpu.pipeline_mode<synchronous>, transform_indices = @transform_7, window_bounds = array<i64: 2, 1, 32>}, {pipeline_mode = #tpu.pipeline_mode<synchronous>, transform_indices = @transform_8, window_bounds = array<i64: 2, 1, 32>}, {pipeline_mode = #tpu.pipeline_mode<synchronous>, transform_indices = @transform_9, window_bounds = array<i64: 2, 1, 32>}, {pipeline_mode = #tpu.pipeline_mode<synchronous>, transform_indices = @transform_10, window_bounds = array<i64: 2, 32, 64>}, {pipeline_mode = #tpu.pipeline_mode<synchronous>, transform_indices = @transform_11, window_bounds = array<i64: 2, 1, 64>}, {pipeline_mode = #tpu.pipeline_mode<synchronous>, transform_indices = @transform_12, window_bounds = array<i64: 2, 64, 32>}, {pipeline_mode = #tpu.pipeline_mode<synchronous>, transform_indices = @transform_13, window_bounds = array<i64: 2, 1, 32>}, {pipeline_mode = #tpu.pipeline_mode<synchronous>, transform_indices = @transform_14, window_bounds = array<i64: 2, 1, 32>}, {pipeline_mode = #tpu.pipeline_mode<synchronous>, transform_indices = @transform_15, window_bounds = array<i64: 2, 1, 32>}, {transform_indices = @transform_16, window_bounds = array<i64: 1, 8, 32>}]} {
    %c0_i32 = arith.constant 0 : i32
    %0 = arith.cmpi eq, %arg1, %c0_i32 : i32
    %1 = arith.extui %0 : i1 to i32
    %c0_i32_0 = arith.constant 0 : i32
    %2 = arith.cmpi ne, %1, %c0_i32_0 : i32
    scf.if %2 {
      %c0_80 = arith.constant 0 : index
      %c0_81 = arith.constant 0 : index
      %c0_82 = arith.constant 0 : index
      %221 = vector.load %arg2[%c0_80, %c0_81, %c0_82] : memref<1x8x32xf32, #tpu.memory_space<vmem>>, vector<1x8x32xf32>
      %222 = vector.shape_cast %221 : vector<1x8x32xf32> to vector<8x32xf32>
      %c0_83 = arith.constant 0 : index
      %c0_84 = arith.constant 0 : index
      %223 = vector.load %arg19[%c0_83, %c0_84] : memref<8x32xf32, #tpu.memory_space<vmem>>, vector<8x32xf32>
      tpu.vector_store %arg19[%c0_83, %c0_84], %222 {strides = array<i32>} : memref<8x32xf32, #tpu.memory_space<vmem>>, vector<8x32xf32>,
    } else {
    }
    %c0 = arith.constant 0 : index
    %c0_1 = arith.constant 0 : index
    %3 = vector.load %arg19[%c0, %c0_1] : memref<8x32xf32, #tpu.memory_space<vmem>>, vector<8x32xf32>
    %c0_2 = arith.constant 0 : index
    %c0_3 = arith.constant 0 : index
    %c0_4 = arith.constant 0 : index
    %4 = vector.load %arg3[%c0_2, %c0_3, %c0_4] : memref<1x8x32xf32, #tpu.memory_space<vmem>>, vector<1x8x32xf32>
    %5 = vector.shape_cast %4 : vector<1x8x32xf32> to vector<8x32xf32>
    %6 = arith.addf %3, %5 : vector<8x32xf32>
    %7 = arith.truncf %6 : vector<8x32xf32> to vector<8x32xbf16>
    %8 = arith.index_cast %arg1 : i32 to index
    %c0_5 = arith.constant 0 : index
    %c0_6 = arith.constant 0 : index
    %9 = vector.load %arg4[%8, %c0_5, %c0_6] : memref<2x32x64xbf16, #tpu.memory_space<vmem>>, vector<1x32x64xbf16>
    %10 = vector.shape_cast %9 : vector<1x32x64xbf16> to vector<32x64xbf16>
    %cst = arith.constant dense<0.000000e+00> : vector<8x64xf32>
    %11 = tpu.matmul %7, %10, %cst {dimension_numbers = #tpu.dot_dimension_numbers<[1], [0], [0], [1], [0, 0, 1, 1], [], []>} : vector<8x32xbf16>, vector<32x64xbf16>, vector<8x64xf32> -> vector<8x64xf32>
    %12 = arith.index_cast %arg1 : i32 to index
    %c0_7 = arith.constant 0 : index
    %c0_8 = arith.constant 0 : index
    %13 = vector.load %arg5[%12, %c0_7, %c0_8] : memref<2x1x64xf32, #tpu.memory_space<vmem>>, vector<1x1x64xf32>
    %14 = vector.shape_cast %13 : vector<1x1x64xf32> to vector<1x64xf32>
    %15 = vector.broadcast %14 : vector<1x64xf32> to vector<8x64xf32>
    %16 = arith.addf %11, %15 : vector<8x64xf32>
    %17 = arith.truncf %3 : vector<8x32xf32> to vector<8x32xbf16>
    %18 = arith.index_cast %arg1 : i32 to index
    %c0_9 = arith.constant 0 : index
    %c0_10 = arith.constant 0 : index
    %19 = vector.load %arg6[%18, %c0_9, %c0_10] : memref<2x32x32xbf16, #tpu.memory_space<vmem>>, vector<1x32x32xbf16>
    %20 = vector.shape_cast %19 : vector<1x32x32xbf16> to vector<32x32xbf16>
    %cst_11 = arith.constant dense<0.000000e+00> : vector<8x32xf32>
    %21 = tpu.matmul %17, %20, %cst_11 {dimension_numbers = #tpu.dot_dimension_numbers<[1], [0], [0], [1], [0, 0, 1, 1], [], []>} : vector<8x32xbf16>, vector<32x32xbf16>, vector<8x32xf32> -> vector<8x32xf32>
    %22 = arith.index_cast %arg1 : i32 to index
    %c0_12 = arith.constant 0 : index
    %c0_13 = arith.constant 0 : index
    %23 = vector.load %arg7[%22, %c0_12, %c0_13] : memref<2x1x32xf32, #tpu.memory_space<vmem>>, vector<1x1x32xf32>
    %24 = vector.shape_cast %23 : vector<1x1x32xf32> to vector<1x32xf32>
    %25 = vector.broadcast %24 : vector<1x32xf32> to vector<8x32xf32>
    %26 = arith.addf %21, %25 : vector<8x32xf32>
    %27 = vector.extract_strided_slice %16 {offsets = [0, 0], sizes = [8, 32], strides = [1, 1]} : vector<8x64xf32> to vector<8x32xf32>
    %28 = arith.truncf %27 : vector<8x32xf32> to vector<8x32xbf16>
    %29 = vector.extract_strided_slice %16 {offsets = [0, 32], sizes = [8, 32], strides = [1, 1]} : vector<8x64xf32> to vector<8x32xf32>
    %30 = arith.truncf %29 : vector<8x32xf32> to vector<8x32xbf16>
    %31 = arith.truncf %26 : vector<8x32xf32> to vector<8x32xbf16>
    %32 = vector.extract_strided_slice %28 {offsets = [0, 0], sizes = [8, 8], strides = [1, 1]} : vector<8x32xbf16> to vector<8x8xbf16>
    %33 = vector.extract_strided_slice %30 {offsets = [0, 0], sizes = [8, 8], strides = [1, 1]} : vector<8x32xbf16> to vector<8x8xbf16>
    %34 = vector.extract_strided_slice %31 {offsets = [0, 0], sizes = [8, 8], strides = [1, 1]} : vector<8x32xbf16> to vector<8x8xbf16>
    %cst_14 = arith.constant dense<0.000000e+00> : vector<8x8xf32>
    %35 = tpu.matmul %32, %33, %cst_14 {dimension_numbers = #tpu.dot_dimension_numbers<[1], [1], [0], [0], [0, 0, 1, 0], [], []>} : vector<8x8xbf16>, vector<8x8xbf16>, vector<8x8xf32> -> vector<8x8xf32>
    %cst_15 = arith.constant dense<0xFF800000> : vector<8xf32>
    %36 = vector.multi_reduction <maximumf>, %35, %cst_15 [1] : vector<8x8xf32> to vector<8xf32>
    %37 = vector.shape_cast %36 : vector<8xf32> to vector<8x1xf32>
    %38 = vector.broadcast %37 : vector<8x1xf32> to vector<8x8xf32>
    %39 = arith.subf %35, %38 : vector<8x8xf32>
    %40 = math.exp %39 : vector<8x8xf32>
    %cst_16 = arith.constant dense<0.000000e+00> : vector<8xf32>
    %41 = vector.multi_reduction <add>, %40, %cst_16 [1] : vector<8x8xf32> to vector<8xf32>
    %42 = vector.shape_cast %41 : vector<8xf32> to vector<8x1xf32>
    %43 = tpu.reciprocal %42 {approx = true} : vector<8x1xf32> -> vector<8x1xf32>
    %44 = vector.broadcast %43 : vector<8x1xf32> to vector<8x8xf32>
    %45 = arith.mulf %40, %44 : vector<8x8xf32>
    %46 = arith.truncf %45 : vector<8x8xf32> to vector<8x8xbf16>
    %cst_17 = arith.constant dense<0.000000e+00> : vector<8x8xf32>
    %47 = tpu.matmul %46, %34, %cst_17 {dimension_numbers = #tpu.dot_dimension_numbers<[1], [0], [0], [1], [0, 0, 1, 1], [], []>} : vector<8x8xbf16>, vector<8x8xbf16>, vector<8x8xf32> -> vector<8x8xf32>
    %48 = arith.truncf %47 : vector<8x8xf32> to vector<8x8xbf16>
    %49 = arith.index_cast %arg1 : i32 to index
    %c0_18 = arith.constant 0 : index
    %c0_19 = arith.constant 0 : index
    %c0_20 = arith.constant 0 : index
    %50 = vector.load %arg8[%49, %c0_18, %c0_19, %c0_20] : memref<2x4x8x32xbf16, #tpu.memory_space<vmem>>, vector<1x1x8x32xbf16>
    %51 = vector.shape_cast %50 : vector<1x1x8x32xbf16> to vector<8x32xbf16>
    %cst_21 = arith.constant dense<0.000000e+00> : vector<8x32xf32>
    %52 = tpu.matmul %48, %51, %cst_21 {dimension_numbers = #tpu.dot_dimension_numbers<[1], [0], [0], [1], [0, 0, 1, 1], [], []>} : vector<8x8xbf16>, vector<8x32xbf16>, vector<8x32xf32> -> vector<8x32xf32>
    %53 = vector.extract_strided_slice %28 {offsets = [0, 8], sizes = [8, 8], strides = [1, 1]} : vector<8x32xbf16> to vector<8x8xbf16>
    %54 = vector.extract_strided_slice %30 {offsets = [0, 8], sizes = [8, 8], strides = [1, 1]} : vector<8x32xbf16> to vector<8x8xbf16>
    %55 = vector.extract_strided_slice %31 {offsets = [0, 8], sizes = [8, 8], strides = [1, 1]} : vector<8x32xbf16> to vector<8x8xbf16>
    %cst_22 = arith.constant dense<0.000000e+00> : vector<8x8xf32>
    %56 = tpu.matmul %53, %54, %cst_22 {dimension_numbers = #tpu.dot_dimension_numbers<[1], [1], [0], [0], [0, 0, 1, 0], [], []>} : vector<8x8xbf16>, vector<8x8xbf16>, vector<8x8xf32> -> vector<8x8xf32>
    %cst_23 = arith.constant dense<0xFF800000> : vector<8xf32>
    %57 = vector.multi_reduction <maximumf>, %56, %cst_23 [1] : vector<8x8xf32> to vector<8xf32>
    %58 = vector.shape_cast %57 : vector<8xf32> to vector<8x1xf32>
    %59 = vector.broadcast %58 : vector<8x1xf32> to vector<8x8xf32>
    %60 = arith.subf %56, %59 : vector<8x8xf32>
    %61 = math.exp %60 : vector<8x8xf32>
    %cst_24 = arith.constant dense<0.000000e+00> : vector<8xf32>
    %62 = vector.multi_reduction <add>, %61, %cst_24 [1] : vector<8x8xf32> to vector<8xf32>
    %63 = vector.shape_cast %62 : vector<8xf32> to vector<8x1xf32>
    %64 = tpu.reciprocal %63 {approx = true} : vector<8x1xf32> -> vector<8x1xf32>
    %65 = vector.broadcast %64 : vector<8x1xf32> to vector<8x8xf32>
    %66 = arith.mulf %61, %65 : vector<8x8xf32>
    %67 = arith.truncf %66 : vector<8x8xf32> to vector<8x8xbf16>
    %cst_25 = arith.constant dense<0.000000e+00> : vector<8x8xf32>
    %68 = tpu.matmul %67, %55, %cst_25 {dimension_numbers = #tpu.dot_dimension_numbers<[1], [0], [0], [1], [0, 0, 1, 1], [], []>} : vector<8x8xbf16>, vector<8x8xbf16>, vector<8x8xf32> -> vector<8x8xf32>
    %69 = arith.truncf %68 : vector<8x8xf32> to vector<8x8xbf16>
    %70 = arith.index_cast %arg1 : i32 to index
    %c1 = arith.constant 1 : index
    %c0_26 = arith.constant 0 : index
    %c0_27 = arith.constant 0 : index
    %71 = vector.load %arg8[%70, %c1, %c0_26, %c0_27] : memref<2x4x8x32xbf16, #tpu.memory_space<vmem>>, vector<1x1x8x32xbf16>
    %72 = vector.shape_cast %71 : vector<1x1x8x32xbf16> to vector<8x32xbf16>
    %cst_28 = arith.constant dense<0.000000e+00> : vector<8x32xf32>
    %73 = tpu.matmul %69, %72, %cst_28 {dimension_numbers = #tpu.dot_dimension_numbers<[1], [0], [0], [1], [0, 0, 1, 1], [], []>} : vector<8x8xbf16>, vector<8x32xbf16>, vector<8x32xf32> -> vector<8x32xf32>
    %74 = arith.addf %52, %73 : vector<8x32xf32>
    %75 = vector.extract_strided_slice %28 {offsets = [0, 16], sizes = [8, 8], strides = [1, 1]} : vector<8x32xbf16> to vector<8x8xbf16>
    %76 = vector.extract_strided_slice %30 {offsets = [0, 16], sizes = [8, 8], strides = [1, 1]} : vector<8x32xbf16> to vector<8x8xbf16>
    %77 = vector.extract_strided_slice %31 {offsets = [0, 16], sizes = [8, 8], strides = [1, 1]} : vector<8x32xbf16> to vector<8x8xbf16>
    %cst_29 = arith.constant dense<0.000000e+00> : vector<8x8xf32>
    %78 = tpu.matmul %75, %76, %cst_29 {dimension_numbers = #tpu.dot_dimension_numbers<[1], [1], [0], [0], [0, 0, 1, 0], [], []>} : vector<8x8xbf16>, vector<8x8xbf16>, vector<8x8xf32> -> vector<8x8xf32>
    %cst_30 = arith.constant dense<0xFF800000> : vector<8xf32>
    %79 = vector.multi_reduction <maximumf>, %78, %cst_30 [1] : vector<8x8xf32> to vector<8xf32>
    %80 = vector.shape_cast %79 : vector<8xf32> to vector<8x1xf32>
    %81 = vector.broadcast %80 : vector<8x1xf32> to vector<8x8xf32>
    %82 = arith.subf %78, %81 : vector<8x8xf32>
    %83 = math.exp %82 : vector<8x8xf32>
    %cst_31 = arith.constant dense<0.000000e+00> : vector<8xf32>
    %84 = vector.multi_reduction <add>, %83, %cst_31 [1] : vector<8x8xf32> to vector<8xf32>
    %85 = vector.shape_cast %84 : vector<8xf32> to vector<8x1xf32>
    %86 = tpu.reciprocal %85 {approx = true} : vector<8x1xf32> -> vector<8x1xf32>
    %87 = vector.broadcast %86 : vector<8x1xf32> to vector<8x8xf32>
    %88 = arith.mulf %83, %87 : vector<8x8xf32>
    %89 = arith.truncf %88 : vector<8x8xf32> to vector<8x8xbf16>
    %cst_32 = arith.constant dense<0.000000e+00> : vector<8x8xf32>
    %90 = tpu.matmul %89, %77, %cst_32 {dimension_numbers = #tpu.dot_dimension_numbers<[1], [0], [0], [1], [0, 0, 1, 1], [], []>} : vector<8x8xbf16>, vector<8x8xbf16>, vector<8x8xf32> -> vector<8x8xf32>
    %91 = arith.truncf %90 : vector<8x8xf32> to vector<8x8xbf16>
    %92 = arith.index_cast %arg1 : i32 to index
    %c2 = arith.constant 2 : index
    %c0_33 = arith.constant 0 : index
    %c0_34 = arith.constant 0 : index
    %93 = vector.load %arg8[%92, %c2, %c0_33, %c0_34] : memref<2x4x8x32xbf16, #tpu.memory_space<vmem>>, vector<1x1x8x32xbf16>
    %94 = vector.shape_cast %93 : vector<1x1x8x32xbf16> to vector<8x32xbf16>
    %cst_35 = arith.constant dense<0.000000e+00> : vector<8x32xf32>
    %95 = tpu.matmul %91, %94, %cst_35 {dimension_numbers = #tpu.dot_dimension_numbers<[1], [0], [0], [1], [0, 0, 1, 1], [], []>} : vector<8x8xbf16>, vector<8x32xbf16>, vector<8x32xf32> -> vector<8x32xf32>
    %96 = arith.addf %74, %95 : vector<8x32xf32>
    %97 = vector.extract_strided_slice %28 {offsets = [0, 24], sizes = [8, 8], strides = [1, 1]} : vector<8x32xbf16> to vector<8x8xbf16>
    %98 = vector.extract_strided_slice %30 {offsets = [0, 24], sizes = [8, 8], strides = [1, 1]} : vector<8x32xbf16> to vector<8x8xbf16>
    %99 = vector.extract_strided_slice %31 {offsets = [0, 24], sizes = [8, 8], strides = [1, 1]} : vector<8x32xbf16> to vector<8x8xbf16>
    %cst_36 = arith.constant dense<0.000000e+00> : vector<8x8xf32>
    %100 = tpu.matmul %97, %98, %cst_36 {dimension_numbers = #tpu.dot_dimension_numbers<[1], [1], [0], [0], [0, 0, 1, 0], [], []>} : vector<8x8xbf16>, vector<8x8xbf16>, vector<8x8xf32> -> vector<8x8xf32>
    %cst_37 = arith.constant dense<0xFF800000> : vector<8xf32>
    %101 = vector.multi_reduction <maximumf>, %100, %cst_37 [1] : vector<8x8xf32> to vector<8xf32>
    %102 = vector.shape_cast %101 : vector<8xf32> to vector<8x1xf32>
    %103 = vector.broadcast %102 : vector<8x1xf32> to vector<8x8xf32>
    %104 = arith.subf %100, %103 : vector<8x8xf32>
    %105 = math.exp %104 : vector<8x8xf32>
    %cst_38 = arith.constant dense<0.000000e+00> : vector<8xf32>
    %106 = vector.multi_reduction <add>, %105, %cst_38 [1] : vector<8x8xf32> to vector<8xf32>
    %107 = vector.shape_cast %106 : vector<8xf32> to vector<8x1xf32>
    %108 = tpu.reciprocal %107 {approx = true} : vector<8x1xf32> -> vector<8x1xf32>
    %109 = vector.broadcast %108 : vector<8x1xf32> to vector<8x8xf32>
    %110 = arith.mulf %105, %109 : vector<8x8xf32>
    %111 = arith.truncf %110 : vector<8x8xf32> to vector<8x8xbf16>
    %cst_39 = arith.constant dense<0.000000e+00> : vector<8x8xf32>
    %112 = tpu.matmul %111, %99, %cst_39 {dimension_numbers = #tpu.dot_dimension_numbers<[1], [0], [0], [1], [0, 0, 1, 1], [], []>} : vector<8x8xbf16>, vector<8x8xbf16>, vector<8x8xf32> -> vector<8x8xf32>
    %113 = arith.truncf %112 : vector<8x8xf32> to vector<8x8xbf16>
    %114 = arith.index_cast %arg1 : i32 to index
    %c3 = arith.constant 3 : index
    %c0_40 = arith.constant 0 : index
    %c0_41 = arith.constant 0 : index
    %115 = vector.load %arg8[%114, %c3, %c0_40, %c0_41] : memref<2x4x8x32xbf16, #tpu.memory_space<vmem>>, vector<1x1x8x32xbf16>
    %116 = vector.shape_cast %115 : vector<1x1x8x32xbf16> to vector<8x32xbf16>
    %cst_42 = arith.constant dense<0.000000e+00> : vector<8x32xf32>
    %117 = tpu.matmul %113, %116, %cst_42 {dimension_numbers = #tpu.dot_dimension_numbers<[1], [0], [0], [1], [0, 0, 1, 1], [], []>} : vector<8x8xbf16>, vector<8x32xbf16>, vector<8x32xf32> -> vector<8x32xf32>
    %118 = arith.addf %96, %117 : vector<8x32xf32>
    %119 = arith.index_cast %arg1 : i32 to index
    %c0_43 = arith.constant 0 : index
    %c0_44 = arith.constant 0 : index
    %120 = vector.load %arg9[%119, %c0_43, %c0_44] : memref<2x1x32xf32, #tpu.memory_space<vmem>>, vector<1x1x32xf32>
    %121 = vector.shape_cast %120 : vector<1x1x32xf32> to vector<1x32xf32>
    %122 = vector.broadcast %121 : vector<1x32xf32> to vector<8x32xf32>
    %123 = arith.addf %118, %122 : vector<8x32xf32>
    %124 = arith.addf %3, %123 : vector<8x32xf32>
    %cst_45 = arith.constant dense<0.000000e+00> : vector<8xf32>
    %125 = vector.multi_reduction <add>, %124, %cst_45 [1] : vector<8x32xf32> to vector<8xf32>
    %126 = vector.shape_cast %125 : vector<8xf32> to vector<8x1xf32>
    %cst_46 = arith.constant 3.200000e+01 : f32
    %127 = vector.broadcast %cst_46 : f32 to vector<8x1xf32>
    %128 = arith.divf %126, %127 : vector<8x1xf32>
    %129 = vector.broadcast %128 : vector<8x1xf32> to vector<8x32xf32>
    %130 = arith.subf %124, %129 : vector<8x32xf32>
    %131 = arith.mulf %130, %130 : vector<8x32xf32>
    %cst_47 = arith.constant dense<0.000000e+00> : vector<8xf32>
    %132 = vector.multi_reduction <add>, %131, %cst_47 [1] : vector<8x32xf32> to vector<8xf32>
    %133 = vector.shape_cast %132 : vector<8xf32> to vector<8x1xf32>
    %cst_48 = arith.constant 3.200000e+01 : f32
    %134 = vector.broadcast %cst_48 : f32 to vector<8x1xf32>
    %135 = arith.divf %133, %134 : vector<8x1xf32>
    %136 = vector.broadcast %128 : vector<8x1xf32> to vector<8x32xf32>
    %137 = arith.subf %124, %136 : vector<8x32xf32>
    %cst_49 = arith.constant 9.99999974E-6 : f32
    %138 = vector.broadcast %cst_49 : f32 to vector<8x1xf32>
    %139 = arith.addf %135, %138 : vector<8x1xf32>
    %140 = math.rsqrt %139 : vector<8x1xf32>
    %141 = vector.broadcast %140 : vector<8x1xf32> to vector<8x32xf32>
    %142 = arith.mulf %137, %141 : vector<8x32xf32>
    %143 = arith.index_cast %arg1 : i32 to index
    %c0_50 = arith.constant 0 : index
    %c0_51 = arith.constant 0 : index
    %144 = vector.load %arg10[%143, %c0_50, %c0_51] : memref<2x1x32xf32, #tpu.memory_space<vmem>>, vector<1x1x32xf32>
    %145 = vector.shape_cast %144 : vector<1x1x32xf32> to vector<1x32xf32>
    %146 = vector.broadcast %145 : vector<1x32xf32> to vector<8x32xf32>
    %147 = arith.mulf %142, %146 : vector<8x32xf32>
    %148 = arith.index_cast %arg1 : i32 to index
    %c0_52 = arith.constant 0 : index
    %c0_53 = arith.constant 0 : index
    %149 = vector.load %arg11[%148, %c0_52, %c0_53] : memref<2x1x32xf32, #tpu.memory_space<vmem>>, vector<1x1x32xf32>
    %150 = vector.shape_cast %149 : vector<1x1x32xf32> to vector<1x32xf32>
    %151 = vector.broadcast %150 : vector<1x32xf32> to vector<8x32xf32>
    %152 = arith.addf %147, %151 : vector<8x32xf32>
    %153 = arith.truncf %152 : vector<8x32xf32> to vector<8x32xbf16>
    %154 = arith.index_cast %arg1 : i32 to index
    %c0_54 = arith.constant 0 : index
    %c0_55 = arith.constant 0 : index
    %155 = vector.load %arg12[%154, %c0_54, %c0_55] : memref<2x32x64xbf16, #tpu.memory_space<vmem>>, vector<1x32x64xbf16>
    %156 = vector.shape_cast %155 : vector<1x32x64xbf16> to vector<32x64xbf16>
    %cst_56 = arith.constant dense<0.000000e+00> : vector<8x64xf32>
    %157 = tpu.matmul %153, %156, %cst_56 {dimension_numbers = #tpu.dot_dimension_numbers<[1], [0], [0], [1], [0, 0, 1, 1], [], []>} : vector<8x32xbf16>, vector<32x64xbf16>, vector<8x64xf32> -> vector<8x64xf32>
    %158 = arith.index_cast %arg1 : i32 to index
    %c0_57 = arith.constant 0 : index
    %c0_58 = arith.constant 0 : index
    %159 = vector.load %arg13[%158, %c0_57, %c0_58] : memref<2x1x64xf32, #tpu.memory_space<vmem>>, vector<1x1x64xf32>
    %160 = vector.shape_cast %159 : vector<1x1x64xf32> to vector<1x64xf32>
    %161 = vector.broadcast %160 : vector<1x64xf32> to vector<8x64xf32>
    %162 = arith.addf %157, %161 : vector<8x64xf32>
    %163 = arith.mulf %162, %162 : vector<8x64xf32>
    %164 = arith.mulf %162, %163 : vector<8x64xf32>
    %cst_59 = arith.constant 4.471500e-02 : f32
    %165 = vector.broadcast %cst_59 : f32 to vector<8x64xf32>
    %166 = arith.mulf %165, %164 : vector<8x64xf32>
    %167 = arith.addf %162, %166 : vector<8x64xf32>
    %cst_60 = arith.constant 0.797884583 : f32
    %168 = vector.broadcast %cst_60 : f32 to vector<8x64xf32>
    %169 = arith.mulf %168, %167 : vector<8x64xf32>
    %170 = math.tanh %169 : vector<8x64xf32>
    %cst_61 = arith.constant 1.000000e+00 : f32
    %171 = vector.broadcast %cst_61 : f32 to vector<8x64xf32>
    %172 = arith.addf %171, %170 : vector<8x64xf32>
    %cst_62 = arith.constant 5.000000e-01 : f32
    %173 = vector.broadcast %cst_62 : f32 to vector<8x64xf32>
    %174 = arith.mulf %173, %172 : vector<8x64xf32>
    %175 = arith.mulf %162, %174 : vector<8x64xf32>
    %176 = arith.truncf %175 : vector<8x64xf32> to vector<8x64xbf16>
    %177 = arith.index_cast %arg1 : i32 to index
    %c0_63 = arith.constant 0 : index
    %c0_64 = arith.constant 0 : index
    %178 = vector.load %arg14[%177, %c0_63, %c0_64] : memref<2x64x32xbf16, #tpu.memory_space<vmem>>, vector<1x64x32xbf16>
    %179 = vector.shape_cast %178 : vector<1x64x32xbf16> to vector<64x32xbf16>
    %cst_65 = arith.constant dense<0.000000e+00> : vector<8x32xf32>
    %180 = tpu.matmul %176, %179, %cst_65 {dimension_numbers = #tpu.dot_dimension_numbers<[1], [0], [0], [1], [0, 0, 1, 1], [], []>} : vector<8x64xbf16>, vector<64x32xbf16>, vector<8x32xf32> -> vector<8x32xf32>
    %181 = arith.index_cast %arg1 : i32 to index
    %c0_66 = arith.constant 0 : index
    %c0_67 = arith.constant 0 : index
    %182 = vector.load %arg15[%181, %c0_66, %c0_67] : memref<2x1x32xf32, #tpu.memory_space<vmem>>, vector<1x1x32xf32>
    %183 = vector.shape_cast %182 : vector<1x1x32xf32> to vector<1x32xf32>
    %184 = vector.broadcast %183 : vector<1x32xf32> to vector<8x32xf32>
    %185 = arith.addf %180, %184 : vector<8x32xf32>
    %186 = arith.addf %152, %185 : vector<8x32xf32>
    %cst_68 = arith.constant dense<0.000000e+00> : vector<8xf32>
    %187 = vector.multi_reduction <add>, %186, %cst_68 [1] : vector<8x32xf32> to vector<8xf32>
    %188 = vector.shape_cast %187 : vector<8xf32> to vector<8x1xf32>
    %cst_69 = arith.constant 3.200000e+01 : f32
    %189 = vector.broadcast %cst_69 : f32 to vector<8x1xf32>
    %190 = arith.divf %188, %189 : vector<8x1xf32>
    %191 = vector.broadcast %190 : vector<8x1xf32> to vector<8x32xf32>
    %192 = arith.subf %186, %191 : vector<8x32xf32>
    %193 = arith.mulf %192, %192 : vector<8x32xf32>
    %cst_70 = arith.constant dense<0.000000e+00> : vector<8xf32>
    %194 = vector.multi_reduction <add>, %193, %cst_70 [1] : vector<8x32xf32> to vector<8xf32>
    %195 = vector.shape_cast %194 : vector<8xf32> to vector<8x1xf32>
    %cst_71 = arith.constant 3.200000e+01 : f32
    %196 = vector.broadcast %cst_71 : f32 to vector<8x1xf32>
    %197 = arith.divf %195, %196 : vector<8x1xf32>
    %198 = vector.broadcast %190 : vector<8x1xf32> to vector<8x32xf32>
    %199 = arith.subf %186, %198 : vector<8x32xf32>
    %cst_72 = arith.constant 9.99999974E-6 : f32
    %200 = vector.broadcast %cst_72 : f32 to vector<8x1xf32>
    %201 = arith.addf %197, %200 : vector<8x1xf32>
    %202 = math.rsqrt %201 : vector<8x1xf32>
    %203 = vector.broadcast %202 : vector<8x1xf32> to vector<8x32xf32>
    %204 = arith.mulf %199, %203 : vector<8x32xf32>
    %205 = arith.index_cast %arg1 : i32 to index
    %c0_73 = arith.constant 0 : index
    %c0_74 = arith.constant 0 : index
    %206 = vector.load %arg16[%205, %c0_73, %c0_74] : memref<2x1x32xf32, #tpu.memory_space<vmem>>, vector<1x1x32xf32>
    %207 = vector.shape_cast %206 : vector<1x1x32xf32> to vector<1x32xf32>
    %208 = vector.broadcast %207 : vector<1x32xf32> to vector<8x32xf32>
    %209 = arith.mulf %204, %208 : vector<8x32xf32>
    %210 = arith.index_cast %arg1 : i32 to index
    %c0_75 = arith.constant 0 : index
    %c0_76 = arith.constant 0 : index
    %211 = vector.load %arg17[%210, %c0_75, %c0_76] : memref<2x1x32xf32, #tpu.memory_space<vmem>>, vector<1x1x32xf32>
    %212 = vector.shape_cast %211 : vector<1x1x32xf32> to vector<1x32xf32>
    %213 = vector.broadcast %212 : vector<1x32xf32> to vector<8x32xf32>
    %214 = arith.addf %209, %213 : vector<8x32xf32>
    %c1_i32 = arith.constant 1 : i32
    %215 = arith.cmpi slt, %arg1, %c1_i32 : i32
    %216 = arith.extui %215 : i1 to i32
    %c0_i32_77 = arith.constant 0 : i32
    %217 = arith.cmpi ne, %216, %c0_i32_77 : i32
    scf.if %217 {
      %c0_80 = arith.constant 0 : index
      %c0_81 = arith.constant 0 : index
      %221 = vector.load %arg19[%c0_80, %c0_81] : memref<8x32xf32, #tpu.memory_space<vmem>>, vector<8x32xf32>
      tpu.vector_store %arg19[%c0_80, %c0_81], %214 {strides = array<i32>} : memref<8x32xf32, #tpu.memory_space<vmem>>, vector<8x32xf32>,
    } else {
    }
    %c1_i32_78 = arith.constant 1 : i32
    %218 = arith.cmpi eq, %arg1, %c1_i32_78 : i32
    %219 = arith.extui %218 : i1 to i32
    %c0_i32_79 = arith.constant 0 : i32
    %220 = arith.cmpi ne, %219, %c0_i32_79 : i32
    scf.if %220 {
      %c0_80 = arith.constant 0 : index
      %c0_81 = arith.constant 0 : index
      %c0_82 = arith.constant 0 : index
      %221 = vector.load %arg18[%c0_80, %c0_81, %c0_82] : memref<1x8x32xf32, #tpu.memory_space<vmem>>, vector<1x8x32xf32>
      %222 = vector.shape_cast %221 : vector<1x8x32xf32> to vector<8x32xf32>
      %223 = vector.shape_cast %214 : vector<8x32xf32> to vector<1x8x32xf32>
      tpu.vector_store %arg18[%c0_80, %c0_81, %c0_82], %223 {strides = array<i32>} : memref<1x8x32xf32, #tpu.memory_space<vmem>>, vector<1x8x32xf32>,
    } else {
    }
    return
  }
  func.func @transform_0(%arg0: i32, %arg1: i32) -> (i32, i32, i32) {
    %c0_i32 = arith.constant 0 : i32
    %c0_i32_0 = arith.constant 0 : i32
    %c0_i32_1 = arith.constant 0 : i32
    return %arg0, %c0_i32, %c0_i32_0 : i32, i32, i32
  }
  func.func @transform_1(%arg0: i32, %arg1: i32) -> (i32, i32, i32) {
    %c0_i32 = arith.constant 0 : i32
    %c0_i32_0 = arith.constant 0 : i32
    %c0_i32_1 = arith.constant 0 : i32
    %c0_i32_2 = arith.constant 0 : i32
    return %c0_i32, %c0_i32_0, %c0_i32_1 : i32, i32, i32
  }
  func.func @transform_2(%arg0: i32, %arg1: i32) -> (i32, i32, i32) {
    %c0_i32 = arith.constant 0 : i32
    %c0_i32_0 = arith.constant 0 : i32
    %c0_i32_1 = arith.constant 0 : i32
    %c0_i32_2 = arith.constant 0 : i32
    return %c0_i32, %c0_i32_0, %c0_i32_1 : i32, i32, i32
  }
  func.func @transform_3(%arg0: i32, %arg1: i32) -> (i32, i32, i32) {
    %c0_i32 = arith.constant 0 : i32
    %c0_i32_0 = arith.constant 0 : i32
    %c0_i32_1 = arith.constant 0 : i32
    %c0_i32_2 = arith.constant 0 : i32
    return %c0_i32, %c0_i32_0, %c0_i32_1 : i32, i32, i32
  }
  func.func @transform_4(%arg0: i32, %arg1: i32) -> (i32, i32, i32) {
    %c0_i32 = arith.constant 0 : i32
    %c0_i32_0 = arith.constant 0 : i32
    %c0_i32_1 = arith.constant 0 : i32
    %c0_i32_2 = arith.constant 0 : i32
    return %c0_i32, %c0_i32_0, %c0_i32_1 : i32, i32, i32
  }
  func.func @transform_5(%arg0: i32, %arg1: i32) -> (i32, i32, i32) {
    %c0_i32 = arith.constant 0 : i32
    %c0_i32_0 = arith.constant 0 : i32
    %c0_i32_1 = arith.constant 0 : i32
    %c0_i32_2 = arith.constant 0 : i32
    return %c0_i32, %c0_i32_0, %c0_i32_1 : i32, i32, i32
  }
  func.func @transform_6(%arg0: i32, %arg1: i32) -> (i32, i32, i32, i32) {
    %c0_i32 = arith.constant 0 : i32
    %c0_i32_0 = arith.constant 0 : i32
    %c0_i32_1 = arith.constant 0 : i32
    %c0_i32_2 = arith.constant 0 : i32
    %c0_i32_3 = arith.constant 0 : i32
    return %c0_i32, %c0_i32_0, %c0_i32_1, %c0_i32_2 : i32, i32, i32, i32
  }
  func.func @transform_7(%arg0: i32, %arg1: i32) -> (i32, i32, i32) {
    %c0_i32 = arith.constant 0 : i32
    %c0_i32_0 = arith.constant 0 : i32
    %c0_i32_1 = arith.constant 0 : i32
    %c0_i32_2 = arith.constant 0 : i32
    return %c0_i32, %c0_i32_0, %c0_i32_1 : i32, i32, i32
  }
  func.func @transform_8(%arg0: i32, %arg1: i32) -> (i32, i32, i32) {
    %c0_i32 = arith.constant 0 : i32
    %c0_i32_0 = arith.constant 0 : i32
    %c0_i32_1 = arith.constant 0 : i32
    %c0_i32_2 = arith.constant 0 : i32
    return %c0_i32, %c0_i32_0, %c0_i32_1 : i32, i32, i32
  }
  func.func @transform_9(%arg0: i32, %arg1: i32) -> (i32, i32, i32) {
    %c0_i32 = arith.constant 0 : i32
    %c0_i32_0 = arith.constant 0 : i32
    %c0_i32_1 = arith.constant 0 : i32
    %c0_i32_2 = arith.constant 0 : i32
    return %c0_i32, %c0_i32_0, %c0_i32_1 : i32, i32, i32
  }
  func.func @transform_10(%arg0: i32, %arg1: i32) -> (i32, i32, i32) {
    %c0_i32 = arith.constant 0 : i32
    %c0_i32_0 = arith.constant 0 : i32
    %c0_i32_1 = arith.constant 0 : i32
    %c0_i32_2 = arith.constant 0 : i32
    return %c0_i32, %c0_i32_0, %c0_i32_1 : i32, i32, i32
  }
  func.func @transform_11(%arg0: i32, %arg1: i32) -> (i32, i32, i32) {
    %c0_i32 = arith.constant 0 : i32
    %c0_i32_0 = arith.constant 0 : i32
    %c0_i32_1 = arith.constant 0 : i32
    %c0_i32_2 = arith.constant 0 : i32
    return %c0_i32, %c0_i32_0, %c0_i32_1 : i32, i32, i32
  }
  func.func @transform_12(%arg0: i32, %arg1: i32) -> (i32, i32, i32) {
    %c0_i32 = arith.constant 0 : i32
    %c0_i32_0 = arith.constant 0 : i32
    %c0_i32_1 = arith.constant 0 : i32
    %c0_i32_2 = arith.constant 0 : i32
    return %c0_i32, %c0_i32_0, %c0_i32_1 : i32, i32, i32
  }
  func.func @transform_13(%arg0: i32, %arg1: i32) -> (i32, i32, i32) {
    %c0_i32 = arith.constant 0 : i32
    %c0_i32_0 = arith.constant 0 : i32
    %c0_i32_1 = arith.constant 0 : i32
    %c0_i32_2 = arith.constant 0 : i32
    return %c0_i32, %c0_i32_0, %c0_i32_1 : i32, i32, i32
  }
  func.func @transform_14(%arg0: i32, %arg1: i32) -> (i32, i32, i32) {
    %c0_i32 = arith.constant 0 : i32
    %c0_i32_0 = arith.constant 0 : i32
    %c0_i32_1 = arith.constant 0 : i32
    %c0_i32_2 = arith.constant 0 : i32
    return %c0_i32, %c0_i32_0, %c0_i32_1 : i32, i32, i32
  }
  func.func @transform_15(%arg0: i32, %arg1: i32) -> (i32, i32, i32) {
    %c0_i32 = arith.constant 0 : i32
    %c0_i32_0 = arith.constant 0 : i32
    %c0_i32_1 = arith.constant 0 : i32
    %c0_i32_2 = arith.constant 0 : i32
    return %c0_i32, %c0_i32_0, %c0_i32_1 : i32, i32, i32
  }
  func.func @transform_16(%arg0: i32, %arg1: i32) -> (i32, i32, i32) {
    %c0_i32 = arith.constant 0 : i32
    %c0_i32_0 = arith.constant 0 : i32
    %c0_i32_1 = arith.constant 0 : i32
    return %arg0, %c0_i32, %c0_i32_0 : i32, i32, i32
  }
}

module attributes {stable_mosaic.version = 11 : i64} {
  func.func @_encoder_stack_kernel(%arg0: i32, %arg1: i32, %arg2: memref<1x8x32xf32, #tpu.memory_space<vmem>>, %arg3: memref<1x8x32xf32, #tpu.memory_space<vmem>>, %arg4: memref<2x32x64xbf16, #tpu.memory_space<vmem>>, %arg5: memref<2x1x64xf32, #tpu.memory_space<vmem>>, %arg6: memref<2x32x32xbf16, #tpu.memory_space<vmem>>, %arg7: memref<2x1x32xf32, #tpu.memory_space<vmem>>, %arg8: memref<2x4x8x32xbf16, #tpu.memory_space<vmem>>, %arg9: memref<2x1x32xf32, #tpu.memory_space<vmem>>, %arg10: memref<2x1x32xf32, #tpu.memory_space<vmem>>, %arg11: memref<2x1x32xf32, #tpu.memory_space<vmem>>, %arg12: memref<2x32x64xbf16, #tpu.memory_space<vmem>>, %arg13: memref<2x1x64xf32, #tpu.memory_space<vmem>>, %arg14: memref<2x64x32xbf16, #tpu.memory_space<vmem>>, %arg15: memref<2x1x32xf32, #tpu.memory_space<vmem>>, %arg16: memref<2x1x32xf32, #tpu.memory_space<vmem>>, %arg17: memref<2x1x32xf32, #tpu.memory_space<vmem>>, %arg18: memref<1x8x32xf32, #tpu.memory_space<vmem>>, %arg19: memref<8x32xf32, #tpu.memory_space<vmem>>) attributes {dimension_semantics = [#tpu.dimension_semantics<parallel>, #tpu.dimension_semantics<arbitrary>], iteration_bounds = array<i64: 2, 2>, scalar_prefetch = 0 : i64, scratch_operands = 1 : i64, tpu.core_type = #tpu.core_type<tc>, window_params = [{transform_indices = @transform_0, window_bounds = array<i64: 1, 8, 32>}, {pipeline_mode = #tpu.pipeline_mode<synchronous>, transform_indices = @transform_1, window_bounds = array<i64: 1, 8, 32>}, {pipeline_mode = #tpu.pipeline_mode<synchronous>, transform_indices = @transform_2, window_bounds = array<i64: 2, 32, 64>}, {pipeline_mode = #tpu.pipeline_mode<synchronous>, transform_indices = @transform_3, window_bounds = array<i64: 2, 1, 64>}, {pipeline_mode = #tpu.pipeline_mode<synchronous>, transform_indices = @transform_4, window_bounds = array<i64: 2, 32, 32>}, {pipeline_mode = #tpu.pipeline_mode<synchronous>, transform_indices = @transform_5, window_bounds = array<i64: 2, 1, 32>}, {pipeline_mode = #tpu.pipeline_mode<synchronous>, transform_indices = @transform_6, window_bounds = array<i64: 2, 4, 8, 32>}, {pipeline_mode = #tpu.pipeline_mode<synchronous>, transform_indices = @transform_7, window_bounds = array<i64: 2, 1, 32>}, {pipeline_mode = #tpu.pipeline_mode<synchronous>, transform_indices = @transform_8, window_bounds = array<i64: 2, 1, 32>}, {pipeline_mode = #tpu.pipeline_mode<synchronous>, transform_indices = @transform_9, window_bounds = array<i64: 2, 1, 32>}, {pipeline_mode = #tpu.pipeline_mode<synchronous>, transform_indices = @transform_10, window_bounds = array<i64: 2, 32, 64>}, {pipeline_mode = #tpu.pipeline_mode<synchronous>, transform_indices = @transform_11, window_bounds = array<i64: 2, 1, 64>}, {pipeline_mode = #tpu.pipeline_mode<synchronous>, transform_indices = @transform_12, window_bounds = array<i64: 2, 64, 32>}, {pipeline_mode = #tpu.pipeline_mode<synchronous>, transform_indices = @transform_13, window_bounds = array<i64: 2, 1, 32>}, {pipeline_mode = #tpu.pipeline_mode<synchronous>, transform_indices = @transform_14, window_bounds = array<i64: 2, 1, 32>}, {pipeline_mode = #tpu.pipeline_mode<synchronous>, transform_indices = @transform_15, window_bounds = array<i64: 2, 1, 32>}, {transform_indices = @transform_16, window_bounds = array<i64: 1, 8, 32>}]} {
    %c0_i32 = arith.constant 0 : i32
    %0 = arith.cmpi eq, %arg1, %c0_i32 : i32
    %1 = arith.extui %0 : i1 to i32
    %c0_i32_0 = arith.constant 0 : i32
    %2 = arith.cmpi ne, %1, %c0_i32_0 : i32
    scf.if %2 {
      %c0_80 = arith.constant 0 : index
      %c0_81 = arith.constant 0 : index
      %c0_82 = arith.constant 0 : index
      %221 = vector.load %arg2[%c0_80, %c0_81, %c0_82] : memref<1x8x32xf32, #tpu.memory_space<vmem>>, vector<1x8x32xf32>
      %222 = vector.shape_cast %221 : vector<1x8x32xf32> to vector<8x32xf32>
      %c0_83 = arith.constant 0 : index
      %c0_84 = arith.constant 0 : index
      %223 = vector.load %arg19[%c0_83, %c0_84] : memref<8x32xf32, #tpu.memory_space<vmem>>, vector<8x32xf32>
      tpu.vector_store %arg19[%c0_83, %c0_84], %222 {strides = array<i32>} : memref<8x32xf32, #tpu.memory_space<vmem>>, vector<8x32xf32>,
    } else {
    }
    %c0 = arith.constant 0 : index
    %c0_1 = arith.constant 0 : index
    %3 = vector.load %arg19[%c0, %c0_1] : memref<8x32xf32, #tpu.memory_space<vmem>>, vector<8x32xf32>
    %c0_2 = arith.constant 0 : index
    %c0_3 = arith.constant 0 : index
    %c0_4 = arith.constant 0 : index
    %4 = vector.load %arg3[%c0_2, %c0_3, %c0_4] : memref<1x8x32xf32, #tpu.memory_space<vmem>>, vector<1x8x32xf32>
    %5 = vector.shape_cast %4 : vector<1x8x32xf32> to vector<8x32xf32>
    %6 = arith.addf %3, %5 : vector<8x32xf32>
    %7 = arith.truncf %6 : vector<8x32xf32> to vector<8x32xbf16>
    %8 = arith.index_cast %arg1 : i32 to index
    %c0_5 = arith.constant 0 : index
    %c0_6 = arith.constant 0 : index
    %9 = vector.load %arg4[%8, %c0_5, %c0_6] : memref<2x32x64xbf16, #tpu.memory_space<vmem>>, vector<1x32x64xbf16>
    %10 = vector.shape_cast %9 : vector<1x32x64xbf16> to vector<32x64xbf16>
    %cst = arith.constant dense<0.000000e+00> : vector<8x64xf32>
    %11 = tpu.matmul %7, %10, %cst {dimension_numbers = #tpu.dot_dimension_numbers<[1], [0], [0], [1], [0, 0, 1, 1], [], []>} : vector<8x32xbf16>, vector<32x64xbf16>, vector<8x64xf32> -> vector<8x64xf32>
    %12 = arith.index_cast %arg1 : i32 to index
    %c0_7 = arith.constant 0 : index
    %c0_8 = arith.constant 0 : index
    %13 = vector.load %arg5[%12, %c0_7, %c0_8] : memref<2x1x64xf32, #tpu.memory_space<vmem>>, vector<1x1x64xf32>
    %14 = vector.shape_cast %13 : vector<1x1x64xf32> to vector<1x64xf32>
    %15 = vector.broadcast %14 : vector<1x64xf32> to vector<8x64xf32>
    %16 = arith.addf %11, %15 : vector<8x64xf32>
    %17 = arith.truncf %3 : vector<8x32xf32> to vector<8x32xbf16>
    %18 = arith.index_cast %arg1 : i32 to index
    %c0_9 = arith.constant 0 : index
    %c0_10 = arith.constant 0 : index
    %19 = vector.load %arg6[%18, %c0_9, %c0_10] : memref<2x32x32xbf16, #tpu.memory_space<vmem>>, vector<1x32x32xbf16>
    %20 = vector.shape_cast %19 : vector<1x32x32xbf16> to vector<32x32xbf16>
    %cst_11 = arith.constant dense<0.000000e+00> : vector<8x32xf32>
    %21 = tpu.matmul %17, %20, %cst_11 {dimension_numbers = #tpu.dot_dimension_numbers<[1], [0], [0], [1], [0, 0, 1, 1], [], []>} : vector<8x32xbf16>, vector<32x32xbf16>, vector<8x32xf32> -> vector<8x32xf32>
    %22 = arith.index_cast %arg1 : i32 to index
    %c0_12 = arith.constant 0 : index
    %c0_13 = arith.constant 0 : index
    %23 = vector.load %arg7[%22, %c0_12, %c0_13] : memref<2x1x32xf32, #tpu.memory_space<vmem>>, vector<1x1x32xf32>
    %24 = vector.shape_cast %23 : vector<1x1x32xf32> to vector<1x32xf32>
    %25 = vector.broadcast %24 : vector<1x32xf32> to vector<8x32xf32>
    %26 = arith.addf %21, %25 : vector<8x32xf32>
    %27 = vector.extract_strided_slice %16 {offsets = [0, 0], sizes = [8, 32], strides = [1, 1]} : vector<8x64xf32> to vector<8x32xf32>
    %28 = arith.truncf %27 : vector<8x32xf32> to vector<8x32xbf16>
    %29 = vector.extract_strided_slice %16 {offsets = [0, 32], sizes = [8, 32], strides = [1, 1]} : vector<8x64xf32> to vector<8x32xf32>
    %30 = arith.truncf %29 : vector<8x32xf32> to vector<8x32xbf16>
    %31 = arith.truncf %26 : vector<8x32xf32> to vector<8x32xbf16>
    %32 = vector.extract_strided_slice %28 {offsets = [0, 0], sizes = [8, 8], strides = [1, 1]} : vector<8x32xbf16> to vector<8x8xbf16>
    %33 = vector.extract_strided_slice %30 {offsets = [0, 0], sizes = [8, 8], strides = [1, 1]} : vector<8x32xbf16> to vector<8x8xbf16>
    %34 = vector.extract_strided_slice %31 {offsets = [0, 0], sizes = [8, 8], strides = [1, 1]} : vector<8x32xbf16> to vector<8x8xbf16>
    %cst_14 = arith.constant dense<0.000000e+00> : vector<8x8xf32>
    %35 = tpu.matmul %32, %33, %cst_14 {dimension_numbers = #tpu.dot_dimension_numbers<[1], [1], [0], [0], [0, 0, 1, 0], [], []>} : vector<8x8xbf16>, vector<8x8xbf16>, vector<8x8xf32> -> vector<8x8xf32>
    %cst_15 = arith.constant dense<0xFF800000> : vector<8xf32>
    %36 = vector.multi_reduction <maximumf>, %35, %cst_15 [1] : vector<8x8xf32> to vector<8xf32>
    %37 = vector.shape_cast %36 : vector<8xf32> to vector<8x1xf32>
    %38 = vector.broadcast %37 : vector<8x1xf32> to vector<8x8xf32>
    %39 = arith.subf %35, %38 : vector<8x8xf32>
    %40 = math.exp %39 : vector<8x8xf32>
    %cst_16 = arith.constant dense<0.000000e+00> : vector<8xf32>
    %41 = vector.multi_reduction <add>, %40, %cst_16 [1] : vector<8x8xf32> to vector<8xf32>
    %42 = vector.shape_cast %41 : vector<8xf32> to vector<8x1xf32>
    %43 = tpu.reciprocal %42 {approx = true} : vector<8x1xf32> -> vector<8x1xf32>
    %44 = vector.broadcast %43 : vector<8x1xf32> to vector<8x8xf32>
    %45 = arith.mulf %40, %44 : vector<8x8xf32>
    %46 = arith.truncf %45 : vector<8x8xf32> to vector<8x8xbf16>
    %cst_17 = arith.constant dense<0.000000e+00> : vector<8x8xf32>
    %47 = tpu.matmul %46, %34, %cst_17 {dimension_numbers = #tpu.dot_dimension_numbers<[1], [0], [0], [1], [0, 0, 1, 1], [], []>} : vector<8x8xbf16>, vector<8x8xbf16>, vector<8x8xf32> -> vector<8x8xf32>
    %48 = arith.truncf %47 : vector<8x8xf32> to vector<8x8xbf16>
    %49 = arith.index_cast %arg1 : i32 to index
    %c0_18 = arith.constant 0 : index
    %c0_19 = arith.constant 0 : index
    %c0_20 = arith.constant 0 : index
    %50 = vector.load %arg8[%49, %c0_18, %c0_19, %c0_20] : memref<2x4x8x32xbf16, #tpu.memory_space<vmem>>, vector<1x1x8x32xbf16>
    %51 = vector.shape_cast %50 : vector<1x1x8x32xbf16> to vector<8x32xbf16>
    %cst_21 = arith.constant dense<0.000000e+00> : vector<8x32xf32>
    %52 = tpu.matmul %48, %51, %cst_21 {dimension_numbers = #tpu.dot_dimension_numbers<[1], [0], [0], [1], [0, 0, 1, 1], [], []>} : vector<8x8xbf16>, vector<8x32xbf16>, vector<8x32xf32> -> vector<8x32xf32>
    %53 = vector.extract_strided_slice %28 {offsets = [0, 8], sizes = [8, 8], strides = [1, 1]} : vector<8x32xbf16> to vector<8x8xbf16>
    %54 = vector.extract_strided_slice %30 {offsets = [0, 8], sizes = [8, 8], strides = [1, 1]} : vector<8x32xbf16> to vector<8x8xbf16>
    %55 = vector.extract_strided_slice %31 {offsets = [0, 8], sizes = [8, 8], strides = [1, 1]} : vector<8x32xbf16> to vector<8x8xbf16>
    %cst_22 = arith.constant dense<0.000000e+00> : vector<8x8xf32>
    %56 = tpu.matmul %53, %54, %cst_22 {dimension_numbers = #tpu.dot_dimension_numbers<[1], [1], [0], [0], [0, 0, 1, 0], [], []>} : vector<8x8xbf16>, vector<8x8xbf16>, vector<8x8xf32> -> vector<8x8xf32>
    %cst_23 = arith.constant dense<0xFF800000> : vector<8xf32>
    %57 = vector.multi_reduction <maximumf>, %56, %cst_23 [1] : vector<8x8xf32> to vector<8xf32>
    %58 = vector.shape_cast %57 : vector<8xf32> to vector<8x1xf32>
    %59 = vector.broadcast %58 : vector<8x1xf32> to vector<8x8xf32>
    %60 = arith.subf %56, %59 : vector<8x8xf32>
    %61 = math.exp %60 : vector<8x8xf32>
    %cst_24 = arith.constant dense<0.000000e+00> : vector<8xf32>
    %62 = vector.multi_reduction <add>, %61, %cst_24 [1] : vector<8x8xf32> to vector<8xf32>
    %63 = vector.shape_cast %62 : vector<8xf32> to vector<8x1xf32>
    %64 = tpu.reciprocal %63 {approx = true} : vector<8x1xf32> -> vector<8x1xf32>
    %65 = vector.broadcast %64 : vector<8x1xf32> to vector<8x8xf32>
    %66 = arith.mulf %61, %65 : vector<8x8xf32>
    %67 = arith.truncf %66 : vector<8x8xf32> to vector<8x8xbf16>
    %cst_25 = arith.constant dense<0.000000e+00> : vector<8x8xf32>
    %68 = tpu.matmul %67, %55, %cst_25 {dimension_numbers = #tpu.dot_dimension_numbers<[1], [0], [0], [1], [0, 0, 1, 1], [], []>} : vector<8x8xbf16>, vector<8x8xbf16>, vector<8x8xf32> -> vector<8x8xf32>
    %69 = arith.truncf %68 : vector<8x8xf32> to vector<8x8xbf16>
    %70 = arith.index_cast %arg1 : i32 to index
    %c1 = arith.constant 1 : index
    %c0_26 = arith.constant 0 : index
    %c0_27 = arith.constant 0 : index
    %71 = vector.load %arg8[%70, %c1, %c0_26, %c0_27] : memref<2x4x8x32xbf16, #tpu.memory_space<vmem>>, vector<1x1x8x32xbf16>
    %72 = vector.shape_cast %71 : vector<1x1x8x32xbf16> to vector<8x32xbf16>
    %cst_28 = arith.constant dense<0.000000e+00> : vector<8x32xf32>
    %73 = tpu.matmul %69, %72, %cst_28 {dimension_numbers = #tpu.dot_dimension_numbers<[1], [0], [0], [1], [0, 0, 1, 1], [], []>} : vector<8x8xbf16>, vector<8x32xbf16>, vector<8x32xf32> -> vector<8x32xf32>
    %74 = arith.addf %52, %73 : vector<8x32xf32>
    %75 = vector.extract_strided_slice %28 {offsets = [0, 16], sizes = [8, 8], strides = [1, 1]} : vector<8x32xbf16> to vector<8x8xbf16>
    %76 = vector.extract_strided_slice %30 {offsets = [0, 16], sizes = [8, 8], strides = [1, 1]} : vector<8x32xbf16> to vector<8x8xbf16>
    %77 = vector.extract_strided_slice %31 {offsets = [0, 16], sizes = [8, 8], strides = [1, 1]} : vector<8x32xbf16> to vector<8x8xbf16>
    %cst_29 = arith.constant dense<0.000000e+00> : vector<8x8xf32>
    %78 = tpu.matmul %75, %76, %cst_29 {dimension_numbers = #tpu.dot_dimension_numbers<[1], [1], [0], [0], [0, 0, 1, 0], [], []>} : vector<8x8xbf16>, vector<8x8xbf16>, vector<8x8xf32> -> vector<8x8xf32>
    %cst_30 = arith.constant dense<0xFF800000> : vector<8xf32>
    %79 = vector.multi_reduction <maximumf>, %78, %cst_30 [1] : vector<8x8xf32> to vector<8xf32>
    %80 = vector.shape_cast %79 : vector<8xf32> to vector<8x1xf32>
    %81 = vector.broadcast %80 : vector<8x1xf32> to vector<8x8xf32>
    %82 = arith.subf %78, %81 : vector<8x8xf32>
    %83 = math.exp %82 : vector<8x8xf32>
    %cst_31 = arith.constant dense<0.000000e+00> : vector<8xf32>
    %84 = vector.multi_reduction <add>, %83, %cst_31 [1] : vector<8x8xf32> to vector<8xf32>
    %85 = vector.shape_cast %84 : vector<8xf32> to vector<8x1xf32>
    %86 = tpu.reciprocal %85 {approx = true} : vector<8x1xf32> -> vector<8x1xf32>
    %87 = vector.broadcast %86 : vector<8x1xf32> to vector<8x8xf32>
    %88 = arith.mulf %83, %87 : vector<8x8xf32>
    %89 = arith.truncf %88 : vector<8x8xf32> to vector<8x8xbf16>
    %cst_32 = arith.constant dense<0.000000e+00> : vector<8x8xf32>
    %90 = tpu.matmul %89, %77, %cst_32 {dimension_numbers = #tpu.dot_dimension_numbers<[1], [0], [0], [1], [0, 0, 1, 1], [], []>} : vector<8x8xbf16>, vector<8x8xbf16>, vector<8x8xf32> -> vector<8x8xf32>
    %91 = arith.truncf %90 : vector<8x8xf32> to vector<8x8xbf16>
    %92 = arith.index_cast %arg1 : i32 to index
    %c2 = arith.constant 2 : index
    %c0_33 = arith.constant 0 : index
    %c0_34 = arith.constant 0 : index
    %93 = vector.load %arg8[%92, %c2, %c0_33, %c0_34] : memref<2x4x8x32xbf16, #tpu.memory_space<vmem>>, vector<1x1x8x32xbf16>
    %94 = vector.shape_cast %93 : vector<1x1x8x32xbf16> to vector<8x32xbf16>
    %cst_35 = arith.constant dense<0.000000e+00> : vector<8x32xf32>
    %95 = tpu.matmul %91, %94, %cst_35 {dimension_numbers = #tpu.dot_dimension_numbers<[1], [0], [0], [1], [0, 0, 1, 1], [], []>} : vector<8x8xbf16>, vector<8x32xbf16>, vector<8x32xf32> -> vector<8x32xf32>
    %96 = arith.addf %74, %95 : vector<8x32xf32>
    %97 = vector.extract_strided_slice %28 {offsets = [0, 24], sizes = [8, 8], strides = [1, 1]} : vector<8x32xbf16> to vector<8x8xbf16>
    %98 = vector.extract_strided_slice %30 {offsets = [0, 24], sizes = [8, 8], strides = [1, 1]} : vector<8x32xbf16> to vector<8x8xbf16>
    %99 = vector.extract_strided_slice %31 {offsets = [0, 24], sizes = [8, 8], strides = [1, 1]} : vector<8x32xbf16> to vector<8x8xbf16>
    %cst_36 = arith.constant dense<0.000000e+00> : vector<8x8xf32>
    %100 = tpu.matmul %97, %98, %cst_36 {dimension_numbers = #tpu.dot_dimension_numbers<[1], [1], [0], [0], [0, 0, 1, 0], [], []>} : vector<8x8xbf16>, vector<8x8xbf16>, vector<8x8xf32> -> vector<8x8xf32>
    %cst_37 = arith.constant dense<0xFF800000> : vector<8xf32>
    %101 = vector.multi_reduction <maximumf>, %100, %cst_37 [1] : vector<8x8xf32> to vector<8xf32>
    %102 = vector.shape_cast %101 : vector<8xf32> to vector<8x1xf32>
    %103 = vector.broadcast %102 : vector<8x1xf32> to vector<8x8xf32>
    %104 = arith.subf %100, %103 : vector<8x8xf32>
    %105 = math.exp %104 : vector<8x8xf32>
    %cst_38 = arith.constant dense<0.000000e+00> : vector<8xf32>
    %106 = vector.multi_reduction <add>, %105, %cst_38 [1] : vector<8x8xf32> to vector<8xf32>
    %107 = vector.shape_cast %106 : vector<8xf32> to vector<8x1xf32>
    %108 = tpu.reciprocal %107 {approx = true} : vector<8x1xf32> -> vector<8x1xf32>
    %109 = vector.broadcast %108 : vector<8x1xf32> to vector<8x8xf32>
    %110 = arith.mulf %105, %109 : vector<8x8xf32>
    %111 = arith.truncf %110 : vector<8x8xf32> to vector<8x8xbf16>
    %cst_39 = arith.constant dense<0.000000e+00> : vector<8x8xf32>
    %112 = tpu.matmul %111, %99, %cst_39 {dimension_numbers = #tpu.dot_dimension_numbers<[1], [0], [0], [1], [0, 0, 1, 1], [], []>} : vector<8x8xbf16>, vector<8x8xbf16>, vector<8x8xf32> -> vector<8x8xf32>
    %113 = arith.truncf %112 : vector<8x8xf32> to vector<8x8xbf16>
    %114 = arith.index_cast %arg1 : i32 to index
    %c3 = arith.constant 3 : index
    %c0_40 = arith.constant 0 : index
    %c0_41 = arith.constant 0 : index
    %115 = vector.load %arg8[%114, %c3, %c0_40, %c0_41] : memref<2x4x8x32xbf16, #tpu.memory_space<vmem>>, vector<1x1x8x32xbf16>
    %116 = vector.shape_cast %115 : vector<1x1x8x32xbf16> to vector<8x32xbf16>
    %cst_42 = arith.constant dense<0.000000e+00> : vector<8x32xf32>
    %117 = tpu.matmul %113, %116, %cst_42 {dimension_numbers = #tpu.dot_dimension_numbers<[1], [0], [0], [1], [0, 0, 1, 1], [], []>} : vector<8x8xbf16>, vector<8x32xbf16>, vector<8x32xf32> -> vector<8x32xf32>
    %118 = arith.addf %96, %117 : vector<8x32xf32>
    %119 = arith.index_cast %arg1 : i32 to index
    %c0_43 = arith.constant 0 : index
    %c0_44 = arith.constant 0 : index
    %120 = vector.load %arg9[%119, %c0_43, %c0_44] : memref<2x1x32xf32, #tpu.memory_space<vmem>>, vector<1x1x32xf32>
    %121 = vector.shape_cast %120 : vector<1x1x32xf32> to vector<1x32xf32>
    %122 = vector.broadcast %121 : vector<1x32xf32> to vector<8x32xf32>
    %123 = arith.addf %118, %122 : vector<8x32xf32>
    %124 = arith.addf %3, %123 : vector<8x32xf32>
    %cst_45 = arith.constant dense<0.000000e+00> : vector<8xf32>
    %125 = vector.multi_reduction <add>, %124, %cst_45 [1] : vector<8x32xf32> to vector<8xf32>
    %126 = vector.shape_cast %125 : vector<8xf32> to vector<8x1xf32>
    %cst_46 = arith.constant 3.200000e+01 : f32
    %127 = vector.broadcast %cst_46 : f32 to vector<8x1xf32>
    %128 = arith.divf %126, %127 : vector<8x1xf32>
    %129 = vector.broadcast %128 : vector<8x1xf32> to vector<8x32xf32>
    %130 = arith.subf %124, %129 : vector<8x32xf32>
    %131 = arith.mulf %130, %130 : vector<8x32xf32>
    %cst_47 = arith.constant dense<0.000000e+00> : vector<8xf32>
    %132 = vector.multi_reduction <add>, %131, %cst_47 [1] : vector<8x32xf32> to vector<8xf32>
    %133 = vector.shape_cast %132 : vector<8xf32> to vector<8x1xf32>
    %cst_48 = arith.constant 3.200000e+01 : f32
    %134 = vector.broadcast %cst_48 : f32 to vector<8x1xf32>
    %135 = arith.divf %133, %134 : vector<8x1xf32>
    %136 = vector.broadcast %128 : vector<8x1xf32> to vector<8x32xf32>
    %137 = arith.subf %124, %136 : vector<8x32xf32>
    %cst_49 = arith.constant 9.99999974E-6 : f32
    %138 = vector.broadcast %cst_49 : f32 to vector<8x1xf32>
    %139 = arith.addf %135, %138 : vector<8x1xf32>
    %140 = math.rsqrt %139 : vector<8x1xf32>
    %141 = vector.broadcast %140 : vector<8x1xf32> to vector<8x32xf32>
    %142 = arith.mulf %137, %141 : vector<8x32xf32>
    %143 = arith.index_cast %arg1 : i32 to index
    %c0_50 = arith.constant 0 : index
    %c0_51 = arith.constant 0 : index
    %144 = vector.load %arg10[%143, %c0_50, %c0_51] : memref<2x1x32xf32, #tpu.memory_space<vmem>>, vector<1x1x32xf32>
    %145 = vector.shape_cast %144 : vector<1x1x32xf32> to vector<1x32xf32>
    %146 = vector.broadcast %145 : vector<1x32xf32> to vector<8x32xf32>
    %147 = arith.mulf %142, %146 : vector<8x32xf32>
    %148 = arith.index_cast %arg1 : i32 to index
    %c0_52 = arith.constant 0 : index
    %c0_53 = arith.constant 0 : index
    %149 = vector.load %arg11[%148, %c0_52, %c0_53] : memref<2x1x32xf32, #tpu.memory_space<vmem>>, vector<1x1x32xf32>
    %150 = vector.shape_cast %149 : vector<1x1x32xf32> to vector<1x32xf32>
    %151 = vector.broadcast %150 : vector<1x32xf32> to vector<8x32xf32>
    %152 = arith.addf %147, %151 : vector<8x32xf32>
    %153 = arith.truncf %152 : vector<8x32xf32> to vector<8x32xbf16>
    %154 = arith.index_cast %arg1 : i32 to index
    %c0_54 = arith.constant 0 : index
    %c0_55 = arith.constant 0 : index
    %155 = vector.load %arg12[%154, %c0_54, %c0_55] : memref<2x32x64xbf16, #tpu.memory_space<vmem>>, vector<1x32x64xbf16>
    %156 = vector.shape_cast %155 : vector<1x32x64xbf16> to vector<32x64xbf16>
    %cst_56 = arith.constant dense<0.000000e+00> : vector<8x64xf32>
    %157 = tpu.matmul %153, %156, %cst_56 {dimension_numbers = #tpu.dot_dimension_numbers<[1], [0], [0], [1], [0, 0, 1, 1], [], []>} : vector<8x32xbf16>, vector<32x64xbf16>, vector<8x64xf32> -> vector<8x64xf32>
    %158 = arith.index_cast %arg1 : i32 to index
    %c0_57 = arith.constant 0 : index
    %c0_58 = arith.constant 0 : index
    %159 = vector.load %arg13[%158, %c0_57, %c0_58] : memref<2x1x64xf32, #tpu.memory_space<vmem>>, vector<1x1x64xf32>
    %160 = vector.shape_cast %159 : vector<1x1x64xf32> to vector<1x64xf32>
    %161 = vector.broadcast %160 : vector<1x64xf32> to vector<8x64xf32>
    %162 = arith.addf %157, %161 : vector<8x64xf32>
    %163 = arith.mulf %162, %162 : vector<8x64xf32>
    %164 = arith.mulf %162, %163 : vector<8x64xf32>
    %cst_59 = arith.constant 4.471500e-02 : f32
    %165 = vector.broadcast %cst_59 : f32 to vector<8x64xf32>
    %166 = arith.mulf %165, %164 : vector<8x64xf32>
    %167 = arith.addf %162, %166 : vector<8x64xf32>
    %cst_60 = arith.constant 0.797884583 : f32
    %168 = vector.broadcast %cst_60 : f32 to vector<8x64xf32>
    %169 = arith.mulf %168, %167 : vector<8x64xf32>
    %170 = math.tanh %169 : vector<8x64xf32>
    %cst_61 = arith.constant 1.000000e+00 : f32
    %171 = vector.broadcast %cst_61 : f32 to vector<8x64xf32>
    %172 = arith.addf %171, %170 : vector<8x64xf32>
    %cst_62 = arith.constant 5.000000e-01 : f32
    %173 = vector.broadcast %cst_62 : f32 to vector<8x64xf32>
    %174 = arith.mulf %173, %172 : vector<8x64xf32>
    %175 = arith.mulf %162, %174 : vector<8x64xf32>
    %176 = arith.truncf %175 : vector<8x64xf32> to vector<8x64xbf16>
    %177 = arith.index_cast %arg1 : i32 to index
    %c0_63 = arith.constant 0 : index
    %c0_64 = arith.constant 0 : index
    %178 = vector.load %arg14[%177, %c0_63, %c0_64] : memref<2x64x32xbf16, #tpu.memory_space<vmem>>, vector<1x64x32xbf16>
    %179 = vector.shape_cast %178 : vector<1x64x32xbf16> to vector<64x32xbf16>
    %cst_65 = arith.constant dense<0.000000e+00> : vector<8x32xf32>
    %180 = tpu.matmul %176, %179, %cst_65 {dimension_numbers = #tpu.dot_dimension_numbers<[1], [0], [0], [1], [0, 0, 1, 1], [], []>} : vector<8x64xbf16>, vector<64x32xbf16>, vector<8x32xf32> -> vector<8x32xf32>
    %181 = arith.index_cast %arg1 : i32 to index
    %c0_66 = arith.constant 0 : index
    %c0_67 = arith.constant 0 : index
    %182 = vector.load %arg15[%181, %c0_66, %c0_67] : memref<2x1x32xf32, #tpu.memory_space<vmem>>, vector<1x1x32xf32>
    %183 = vector.shape_cast %182 : vector<1x1x32xf32> to vector<1x32xf32>
    %184 = vector.broadcast %183 : vector<1x32xf32> to vector<8x32xf32>
    %185 = arith.addf %180, %184 : vector<8x32xf32>
    %186 = arith.addf %152, %185 : vector<8x32xf32>
    %cst_68 = arith.constant dense<0.000000e+00> : vector<8xf32>
    %187 = vector.multi_reduction <add>, %186, %cst_68 [1] : vector<8x32xf32> to vector<8xf32>
    %188 = vector.shape_cast %187 : vector<8xf32> to vector<8x1xf32>
    %cst_69 = arith.constant 3.200000e+01 : f32
    %189 = vector.broadcast %cst_69 : f32 to vector<8x1xf32>
    %190 = arith.divf %188, %189 : vector<8x1xf32>
    %191 = vector.broadcast %190 : vector<8x1xf32> to vector<8x32xf32>
    %192 = arith.subf %186, %191 : vector<8x32xf32>
    %193 = arith.mulf %192, %192 : vector<8x32xf32>
    %cst_70 = arith.constant dense<0.000000e+00> : vector<8xf32>
    %194 = vector.multi_reduction <add>, %193, %cst_70 [1] : vector<8x32xf32> to vector<8xf32>
    %195 = vector.shape_cast %194 : vector<8xf32> to vector<8x1xf32>
    %cst_71 = arith.constant 3.200000e+01 : f32
    %196 = vector.broadcast %cst_71 : f32 to vector<8x1xf32>
    %197 = arith.divf %195, %196 : vector<8x1xf32>
    %198 = vector.broadcast %190 : vector<8x1xf32> to vector<8x32xf32>
    %199 = arith.subf %186, %198 : vector<8x32xf32>
    %cst_72 = arith.constant 9.99999974E-6 : f32
    %200 = vector.broadcast %cst_72 : f32 to vector<8x1xf32>
    %201 = arith.addf %197, %200 : vector<8x1xf32>
    %202 = math.rsqrt %201 : vector<8x1xf32>
    %203 = vector.broadcast %202 : vector<8x1xf32> to vector<8x32xf32>
    %204 = arith.mulf %199, %203 : vector<8x32xf32>
    %205 = arith.index_cast %arg1 : i32 to index
    %c0_73 = arith.constant 0 : index
    %c0_74 = arith.constant 0 : index
    %206 = vector.load %arg16[%205, %c0_73, %c0_74] : memref<2x1x32xf32, #tpu.memory_space<vmem>>, vector<1x1x32xf32>
    %207 = vector.shape_cast %206 : vector<1x1x32xf32> to vector<1x32xf32>
    %208 = vector.broadcast %207 : vector<1x32xf32> to vector<8x32xf32>
    %209 = arith.mulf %204, %208 : vector<8x32xf32>
    %210 = arith.index_cast %arg1 : i32 to index
    %c0_75 = arith.constant 0 : index
    %c0_76 = arith.constant 0 : index
    %211 = vector.load %arg17[%210, %c0_75, %c0_76] : memref<2x1x32xf32, #tpu.memory_space<vmem>>, vector<1x1x32xf32>
    %212 = vector.shape_cast %211 : vector<1x1x32xf32> to vector<1x32xf32>
    %213 = vector.broadcast %212 : vector<1x32xf32> to vector<8x32xf32>
    %214 = arith.addf %209, %213 : vector<8x32xf32>
    %c1_i32 = arith.constant 1 : i32
    %215 = arith.cmpi slt, %arg1, %c1_i32 : i32
    %216 = arith.extui %215 : i1 to i32
    %c0_i32_77 = arith.constant 0 : i32
    %217 = arith.cmpi ne, %216, %c0_i32_77 : i32
    scf.if %217 {
      %c0_80 = arith.constant 0 : index
      %c0_81 = arith.constant 0 : index
      %221 = vector.load %arg19[%c0_80, %c0_81] : memref<8x32xf32, #tpu.memory_space<vmem>>, vector<8x32xf32>
      tpu.vector_store %arg19[%c0_80, %c0_81], %214 {strides = array<i32>} : memref<8x32xf32, #tpu.memory_space<vmem>>, vector<8x32xf32>,
    } else {
    }
    %c1_i32_78 = arith.constant 1 : i32
    %218 = arith.cmpi eq, %arg1, %c1_i32_78 : i32
    %219 = arith.extui %218 : i1 to i32
    %c0_i32_79 = arith.constant 0 : i32
    %220 = arith.cmpi ne, %219, %c0_i32_79 : i32
    scf.if %220 {
      %c0_80 = arith.constant 0 : index
      %c0_81 = arith.constant 0 : index
      %c0_82 = arith.constant 0 : index
      %221 = vector.load %arg18[%c0_80, %c0_81, %c0_82] : memref<1x8x32xf32, #tpu.memory_space<vmem>>, vector<1x8x32xf32>
      %222 = vector.shape_cast %221 : vector<1x8x32xf32> to vector<8x32xf32>
      %223 = vector.shape_cast %214 : vector<8x32xf32> to vector<1x8x32xf32>
      tpu.vector_store %arg18[%c0_80, %c0_81, %c0_82], %223 {strides = array<i32>} : memref<1x8x32xf32, #tpu.memory_space<vmem>>, vector<1x8x32xf32>,
    } else {
    }
    return
  }
  func.func @transform_0(%arg0: i32, %arg1: i32) -> (i32, i32, i32) {
    %c0_i32 = arith.constant 0 : i32
    %c0_i32_0 = arith.constant 0 : i32
    %c0_i32_1 = arith.constant 0 : i32
    return %arg0, %c0_i32, %c0_i32_0 : i32, i32, i32
  }
  func.func @transform_1(%arg0: i32, %arg1: i32) -> (i32, i32, i32) {
    %c0_i32 = arith.constant 0 : i32
    %c0_i32_0 = arith.constant 0 : i32
    %c0_i32_1 = arith.constant 0 : i32
    %c0_i32_2 = arith.constant 0 : i32
    return %c0_i32, %c0_i32_0, %c0_i32_1 : i32, i32, i32
  }
  func.func @transform_2(%arg0: i32, %arg1: i32) -> (i32, i32, i32) {
    %c0_i32 = arith.constant 0 : i32
    %c0_i32_0 = arith.constant 0 : i32
    %c0_i32_1 = arith.constant 0 : i32
    %c0_i32_2 = arith.constant 0 : i32
    return %c0_i32, %c0_i32_0, %c0_i32_1 : i32, i32, i32
  }
  func.func @transform_3(%arg0: i32, %arg1: i32) -> (i32, i32, i32) {
    %c0_i32 = arith.constant 0 : i32
    %c0_i32_0 = arith.constant 0 : i32
    %c0_i32_1 = arith.constant 0 : i32
    %c0_i32_2 = arith.constant 0 : i32
    return %c0_i32, %c0_i32_0, %c0_i32_1 : i32, i32, i32
  }
  func.func @transform_4(%arg0: i32, %arg1: i32) -> (i32, i32, i32) {
    %c0_i32 = arith.constant 0 : i32
    %c0_i32_0 = arith.constant 0 : i32
    %c0_i32_1 = arith.constant 0 : i32
    %c0_i32_2 = arith.constant 0 : i32
    return %c0_i32, %c0_i32_0, %c0_i32_1 : i32, i32, i32
  }
  func.func @transform_5(%arg0: i32, %arg1: i32) -> (i32, i32, i32) {
    %c0_i32 = arith.constant 0 : i32
    %c0_i32_0 = arith.constant 0 : i32
    %c0_i32_1 = arith.constant 0 : i32
    %c0_i32_2 = arith.constant 0 : i32
    return %c0_i32, %c0_i32_0, %c0_i32_1 : i32, i32, i32
  }
  func.func @transform_6(%arg0: i32, %arg1: i32) -> (i32, i32, i32, i32) {
    %c0_i32 = arith.constant 0 : i32
    %c0_i32_0 = arith.constant 0 : i32
    %c0_i32_1 = arith.constant 0 : i32
    %c0_i32_2 = arith.constant 0 : i32
    %c0_i32_3 = arith.constant 0 : i32
    return %c0_i32, %c0_i32_0, %c0_i32_1, %c0_i32_2 : i32, i32, i32, i32
  }
  func.func @transform_7(%arg0: i32, %arg1: i32) -> (i32, i32, i32) {
    %c0_i32 = arith.constant 0 : i32
    %c0_i32_0 = arith.constant 0 : i32
    %c0_i32_1 = arith.constant 0 : i32
    %c0_i32_2 = arith.constant 0 : i32
    return %c0_i32, %c0_i32_0, %c0_i32_1 : i32, i32, i32
  }
  func.func @transform_8(%arg0: i32, %arg1: i32) -> (i32, i32, i32) {
    %c0_i32 = arith.constant 0 : i32
    %c0_i32_0 = arith.constant 0 : i32
    %c0_i32_1 = arith.constant 0 : i32
    %c0_i32_2 = arith.constant 0 : i32
    return %c0_i32, %c0_i32_0, %c0_i32_1 : i32, i32, i32
  }
  func.func @transform_9(%arg0: i32, %arg1: i32) -> (i32, i32, i32) {
    %c0_i32 = arith.constant 0 : i32
    %c0_i32_0 = arith.constant 0 : i32
    %c0_i32_1 = arith.constant 0 : i32
    %c0_i32_2 = arith.constant 0 : i32
    return %c0_i32, %c0_i32_0, %c0_i32_1 : i32, i32, i32
  }
  func.func @transform_10(%arg0: i32, %arg1: i32) -> (i32, i32, i32) {
    %c0_i32 = arith.constant 0 : i32
    %c0_i32_0 = arith.constant 0 : i32
    %c0_i32_1 = arith.constant 0 : i32
    %c0_i32_2 = arith.constant 0 : i32
    return %c0_i32, %c0_i32_0, %c0_i32_1 : i32, i32, i32
  }
  func.func @transform_11(%arg0: i32, %arg1: i32) -> (i32, i32, i32) {
    %c0_i32 = arith.constant 0 : i32
    %c0_i32_0 = arith.constant 0 : i32
    %c0_i32_1 = arith.constant 0 : i32
    %c0_i32_2 = arith.constant 0 : i32
    return %c0_i32, %c0_i32_0, %c0_i32_1 : i32, i32, i32
  }
  func.func @transform_12(%arg0: i32, %arg1: i32) -> (i32, i32, i32) {
    %c0_i32 = arith.constant 0 : i32
    %c0_i32_0 = arith.constant 0 : i32
    %c0_i32_1 = arith.constant 0 : i32
    %c0_i32_2 = arith.constant 0 : i32
    return %c0_i32, %c0_i32_0, %c0_i32_1 : i32, i32, i32
  }
  func.func @transform_13(%arg0: i32, %arg1: i32) -> (i32, i32, i32) {
    %c0_i32 = arith.constant 0 : i32
    %c0_i32_0 = arith.constant 0 : i32
    %c0_i32_1 = arith.constant 0 : i32
    %c0_i32_2 = arith.constant 0 : i32
    return %c0_i32, %c0_i32_0, %c0_i32_1 : i32, i32, i32
  }
  func.func @transform_14(%arg0: i32, %arg1: i32) -> (i32, i32, i32) {
    %c0_i32 = arith.constant 0 : i32
    %c0_i32_0 = arith.constant 0 : i32
    %c0_i32_1 = arith.constant 0 : i32
    %c0_i32_2 = arith.constant 0 : i32
    return %c0_i32, %c0_i32_0, %c0_i32_1 : i32, i32, i32
  }
  func.func @transform_15(%arg0: i32, %arg1: i32) -> (i32, i32, i32) {
    %c0_i32 = arith.constant 0 : i32
    %c0_i32_0 = arith.constant 0 : i32
    %c0_i32_1 = arith.constant 0 : i32
    %c0_i32_2 = arith.constant 0 : i32
    return %c0_i32, %c0_i32_0, %c0_i32_1 : i32, i32, i32
  }
  func.func @transform_16(%arg0: i32, %arg1: i32) -> (i32, i32, i32) {
    %c0_i32 = arith.constant 0 : i32
    %c0_i32_0 = arith.constant 0 : i32
    %c0_i32_1 = arith.constant 0 : i32
    return %arg0, %c0_i32, %c0_i32_0 : i32, i32, i32
  }
}

</mosaic_0001>

<bundles_post_ra>
// kernel: tpu_custom_call.1
= control target key start
LH: loop header
LB: loop body
LE: loop exit
PB: predicated region body
PF: predicated region fallthrough
CT: control target
= control target key end

     0   :  { %s2844_s0 = inlined_call_operand.hbm [shape: f32[2,8,32], index: 0, kind: input, shape index: {}]   ;;  %s2845_s1 = inlined_call_operand.hbm [shape: f32[1,8,32], index: 1, kind: input, shape index: {}]   ;;  %s2846_s2 = inlined_call_operand.vmem [shape: bf16[2,32,64], index: 2, kind: input, shape index: {}]   ;;  %s2847_s3 = inlined_call_operand.vmem [shape: f32[2,1,64], index: 3, kind: input, shape index: {}]   ;;  %s2848_s4 = inlined_call_operand.vmem [shape: bf16[2,32,32], index: 4, kind: input, shape index: {}]   ;;  %s2849_s5 = inlined_call_operand.vmem [shape: f32[2,1,32], index: 5, kind: input, shape index: {}]   ;;  %s2850_s6 = inlined_call_operand.vmem [shape: bf16[2,4,8,32], index: 6, kind: input, shape index: {}]   ;;  %s2851_s7 = inlined_call_operand.vmem [shape: f32[2,1,32], index: 7, kind: input, shape index: {}]   ;;  %s2852_s8 = inlined_call_operand.vmem [shape: f32[2,1,32], index: 8, kind: input, shape index: {}]   ;;  %s2853_s9 = inlined_call_operand.vmem [shape: f32[2,1,32], index: 9, kind: input, shape index: {}]   ;;  %s2854_s10 = inlined_call_operand.hbm [shape: bf16[2,32,64], index: 10, kind: input, shape index: {}]   ;;  %s2855_s11 = inlined_call_operand.vmem [shape: f32[2,1,64], index: 11, kind: input, shape index: {}]   ;;  %s2856_s12 = inlined_call_operand.vmem [shape: bf16[2,64,32], index: 12, kind: input, shape index: {}]   ;;  %s2857_s13 = inlined_call_operand.vmem [shape: f32[2,1,32], index: 13, kind: input, shape index: {}]   ;;  %s2858_s14 = inlined_call_operand.vmem [shape: f32[2,1,32], index: 14, kind: input, shape index: {}]   ;;  %s2859_s15 = inlined_call_operand.vmem [shape: f32[2,1,32], index: 15, kind: input, shape index: {}]   ;;  %s2860_s16 = inlined_call_operand.hbm [shape: f32[2,8,32], index: 16, kind: output, shape index: {}]  }
   0x1   :  { %2884 = sst [smem:[#allocation21_spill]] %s2844_s0 }
   0x2   :  { %2885 = sst [smem:[#allocation22_spill]] %s2845_s1 }
   0x3   :  { %2886 = sst [smem:[#allocation23_spill]] %s2855_s11 }
   0x4   :  { %2887 = sst [smem:[#allocation24_spill]] %s2856_s12 }
   0x5   :  { %2888 = sst [smem:[#allocation25_spill]] %s2857_s13 }
   0x6   :  { %2889 = sst [smem:[#allocation26_spill]] %s2858_s14 }
   0x7   :  { %2890 = sst [smem:[#allocation27_spill]] %s2859_s15 }
   0x8   :  { %2891 = sst [smem:[#allocation28_spill]] %s2860_s16 }
   0x9   :  { %21 = vsyncpa [#allocation4], 0 }
   0xa   :  { %22 = vsyncpa [#allocation7], 0 }
   0xb   :  { %23 = vsyncpa [#allocation5], 0 }
   0xc   :  { %25 = vsyncpa [#allocation5 + $0x1], 0  ;;  %s2399_s21 = smov 0   ;;  %s2401_s22 = smov 0  }
   0xd   :  { %s2403_s23 = smov 0   ;;  %s2405_s24 = smov 0  }
   0xe   :  { %s2407_s25 = smov 0   ;;  %s2409_s26 = smov 0  }
   0xf   :  { %s2411_s27 = smov 0   ;;  %s2413_s28 = smov 0  }
  0x10 LB: > { %2892 = sst [smem:[#allocation13_spill]] %s2269_s21  ;;  %s2299_s29 = smov [#allocation6]   ;;  %s2297_s28 = sphi %s2413_s28, %s31_s28   ;;  %s2293_s27 = sphi %s2411_s27, %s2938_s27   ;;  %s2289_s26 = sphi %s2409_s26, %s2937_s26   ;;  %s2285_s25 = sphi %s2407_s25, %s2936_s25   ;;  %s2281_s24 = sphi %s2405_s24, %s2935_s24   ;;  %s2277_s23 = sphi %s2403_s23, %s2941_s23   ;;  %s2273_s22 = sphi %s2401_s22, %s2940_s22   ;;  %s2269_s21 = sphi %s2399_s21, %s2939_s21  }
  0x11   : > { %2893 = sst [smem:[#allocation14_spill]] %s2289_s26  ;;  %s441_s30 = sshll.u32 %s2299_s29, 4  ;;  %s442_s30 = int_to_ptr.vmem [resolvable:$true] %s441_s30 }
  0x12   : > { %2894 = sst [smem:[#allocation15_spill]] %s2293_s27  ;;  %s1746_s0 = sadd.s32 4294967295, %s2297_s28  }
  0x13   : > { %2895 = sst [smem:[#allocation16_spill]] %s2297_s28  ;;  %p1748_p0 = scmp.ge.s32.totalorder %s2297_s28, 1 }
  0x14   : > { %p2441_p1 = scmp.eq.s32.totalorder %s1746_s0, 0  ;;  %p2445_p2 = scmp.eq.s32.totalorder %s1746_s0, 3 }
  0x15   : > { %p415_p3 = scmp.lt.s32.totalorder %s2297_s28, 5  ;;  %s2900_s1 = sld [smem:[#allocation22_spill]] }
  0x16   : > { %s2896_s17 = scalar_select %p2441_p1, 1, 0 }
  0x17   : > { %s2897_s18 = scalar_select %p2445_p2, 1, 0 }
  0x18   : > { %p2450_p4 = pnand %p1748_p0, %p415_p3 }
  0x1a   : > { %s2898_s19 = scalar_select %p2450_p4, 1, 0 }
  0x1b   : > { %p2863_p5 = pneg %p2450_p4  ;;  %s2109_s16 = scalar_lea.hbm %s2900_s1, 128 }
  0x1c   : > { %p2110_p7 = scmp.ne.s32.totalorder %s2900_s1, %s2109_s16  ;;  %p2116_p11 = scmp.lt.u32.totalorder %s2109_s16, %s2900_s1 }
  0x1d   : > { %p2461_p6 = pnand %p2863_p5, %p2441_p1 }
  0x1f   : > { %s2899_s20 = scalar_select %p2461_p6, 1, 0 }
  0x20   : > { %p2878_p8 = pneg %p2461_p6 }
  0x22   : > { %p2112_p9 = pnand %p2878_p8, %p2110_p7 }
  0x24   : > { %p2113_p10 = pneg %p2112_p9 }
  0x26   : > { %p2118_p12 = pnand %p2116_p11, %p2113_p10 }
  0x28   : > { %2121 = shalt.err (!%p2118_p12)
}
  0x29   : > { %s2122_s29 = scalar_lea.vmem %s442_s30, 128  ;;  %p2130_p5 = scmp.lt.s32.totalorder %s442_s30, %s442_s30 }
  0x2a   : > { %p2123_p13 = scmp.ne.s32.totalorder %s442_s30, %s2122_s29  ;;  %p2131_p4 = scmp.lt.s32.totalorder %s2122_s29, %s2122_s29 }
  0x2c   : > { %p2125_p0 = pnand %p2123_p13, %p2878_p8  ;;  %p2132_p2 = por %p2131_p4, %p2130_p5 }
  0x2e   : > { %p2126_p3 = pneg %p2125_p0 }
  0x30   : > { %p2133_p1 = pnand %p2132_p2, %p2126_p3 }
  0x32   : > { %2136 = shalt.err (!%p2133_p1)
}
  0x33   : > { %1986 = dma.hbm_to_vmem [thread:$0]  (!%p2461_p6), %s2900_s1, 128, %s442_s30, [#allocation7]  }
  0x34   : > { %s1747_s11 = sadd.s32 4294967294, %s2297_s28   ;;  %s40_s13 = sadd.s32 1, %s2289_s26 }
  0x35   : > { %s43_s16 = sadd.s32 1, %s2293_s27  ;;  %p41_p1 = scmp.ge.s32.totalorder %s40_s13, 2 }
  0x36   : > { %s50_s0 = sadd.s32 1, %s2277_s23  ;;  %p63_p2 = scmp.ne.s32.totalorder %s2273_s22, %s2269_s21 }
  0x37   : > { %p401_p4 = scmp.ne.s32.totalorder %s2277_s23, %s2273_s22  ;;  %s2943_s13 = smov (%p41_p1, %s40_s13), 0 }
  0x38   : > { %2901 = sst [smem:[#allocation17_spill]] %s2943_s13  ;;  %s2945_s16 = smov (!%p41_p1, %s43_s16), %s2293_s27 }
  0x39   : > { %p2902_p5 = scmp.ne.s32.totalorder %s2896_s17, 0  ;;  %p2904_p9 = scmp.ne.s32.totalorder %s2897_s18, 0 }
  0x3a   : > { %p45_p11 = scmp.ge.s32.totalorder %s2945_s16, 2  ;;  %p408_p12 = scmp.eq.s32.totalorder %s1747_s11, 3 }
  0x3b   : > { %p2500_p7 = por %p2902_p5, %p63_p2  ;;  %p2506_p10 = por %p2904_p9, %p401_p4 }
  0x3c   : > { %s2873_s14 = sshll.u32 %s2285_s25, 7  ;;  %s2947_s16 = smov (%p45_p11, %s2945_s16), 0 }
  0x3d   : > { %s2903_s29 = scalar_select %p2500_p7, 1, 0 }
  0x3e   : > { %s2905_s30 = scalar_select %p2506_p10, 1, 0 }
  0x3f   : > { %2907 = sst [smem:[#allocation19_spill]] %s2947_s16  ;;  %p2513_p13 = por %p408_p12, %p63_p2 }
  0x40   : > { %2906 = sst [smem:[#allocation18_spill]] %s2905_s30  ;;  %s2910_s26 = sld [smem:[#allocation21_spill]] }
  0x41   : > { %s2908_s15 = scalar_select %p2513_p13, 1, 0 }
  0x42   : > { %s47_s21 = ssub.s32 %s2293_s27, %s2947_s16  ;;  %s2300_s28 = smov [#allocation3]  }
  0x43   : > { %2909 = sst [smem:[#allocation20_spill]] %s2908_s15  ;;  %s430_s11 = sshll.u32 %s2300_s28, 4  ;;  %s431_s11 = int_to_ptr.vmem [resolvable:$true] %s430_s11 }
  0x44   : > { %p48_p0 = scmp.eq.s32.totalorder %s47_s21, 0  ;;  %p2912_p3 = scmp.ne.s32.totalorder %s2898_s19, 0 }
  0x46   : > { %s2911_s12 = smov %s2910_s26  ;;  %s2522_s18 = scalar_lea.hbm %s2910_s26, %s2873_s14 }
  0x47   : > { %p2913_p1 = pneg %p2912_p3  ;;  %s2301_s26 = smov [#allocation8]  }
  0x48   : > { %s2536_s1 = scalar_select %p48_p0, %s2277_s23, %s50_s0  }
  0x49   : > { %p2531_p2 = pnand %p2913_p1, %p2500_p7  ;;  %s475_s13 = sshll.u32 %s2301_s26, 4  ;;  %s476_s13 = int_to_ptr.vmem [resolvable:$true] %s475_s13 }
  0x4a   : > { %s2137_s14 = scalar_lea.hbm %s2522_s18, 128  ;;  %s2142_s16 = scalar_lea.hbm %s2911_s12, 256 }
  0x4b   : > { %p2138_p4 = scmp.ne.s32.totalorder %s2522_s18, %s2137_s14  ;;  %p2139_p5 = pneg %p2531_p2 }
  0x4c   : > { %p2143_p12 = scmp.lt.u32.totalorder %s2522_s18, %s2911_s12  ;;  %p2144_p0 = scmp.lt.u32.totalorder %s2142_s16, %s2137_s14 }
  0x4d   : > { %p2140_p9 = pnand %p2139_p5, %p2138_p4  ;;  %p2146_p8 = scmp.lt.u32.totalorder %s2137_s14, %s2522_s18 }
  0x4e   : > { %p2145_p1 = por %p2144_p0, %p2143_p12 }
  0x4f   : > { %p2141_p11 = pneg %p2140_p9 }
  0x50   : > { %p2147_p13 = por %p2146_p8, %p2145_p1 }
  0x52   : > { %p2148_p10 = pnand %p2147_p13, %p2141_p11 }
  0x54   : > { %2151 = shalt.err (!%p2148_p10)
}
  0x55   : > { %s2152_s0 = scalar_lea.vmem %s431_s11, 128  ;;  %p2160_p3 = scmp.lt.s32.totalorder %s431_s11, %s431_s11 }
  0x56   : > { %p2153_p7 = scmp.ne.s32.totalorder %s431_s11, %s2152_s0  ;;  %p2161_p6 = scmp.lt.s32.totalorder %s2152_s0, %s2152_s0 }
  0x58   : > { %p2155_p4 = pnand %p2153_p7, %p2139_p5  ;;  %p2162_p0 = por %p2161_p6, %p2160_p3 }
  0x5a   : > { %p2156_p9 = pneg %p2155_p4 }
  0x5c   : > { %p2163_p12 = pnand %p2162_p0, %p2156_p9 }
  0x5e   : > { %2166 = shalt.err (!%p2163_p12)
}
  0x5f   : > { %1983 = dma.hbm_to_vmem [thread:$0]  (!%p2531_p2), %s2522_s18, 128, %s431_s11, [#allocation4]  }
  0x60   : > { %s2167_s30 = scalar_lea.hbm %s2854_s10, 512  ;;  %p2915_p7 = scmp.ne.s32.totalorder %s2899_s20, 0 }
  0x61   : > { %p2168_p8 = scmp.ne.s32.totalorder %s2854_s10, %s2167_s30  ;;  %p2174_p3 = scmp.lt.u32.totalorder %s2167_s30, %s2854_s10 }
  0x62   : > { %p2916_p10 = pneg %p2915_p7 }
  0x64   : > { %p2170_p13 = pnand %p2168_p8, %p2916_p10 }
  0x66   : > { %p2171_p6 = pneg %p2170_p13 }
  0x68   : > { %p2176_p5 = pnand %p2174_p3, %p2171_p6 }
  0x6a   : > { %2179 = shalt.err (!%p2176_p5)
}
  0x6b   : > { %s2180_s15 = scalar_lea.vmem %s476_s13, 512  ;;  %p2917_p11 = pmov %p2916_p10 }
  0x6c   : > { %p2181_p2 = scmp.ne.s32.totalorder %s476_s13, %s2180_s15  ;;  %p2188_p9 = scmp.lt.s32.totalorder %s476_s13, %s476_s13 }
  0x6d   : > { %p2189_p0 = scmp.lt.s32.totalorder %s2180_s15, %s2180_s15 }
  0x6e   : > { %p2183_p1 = pnand %p2181_p2, %p2917_p11 }
  0x6f   : > { %p2190_p12 = por %p2189_p0, %p2188_p9 }
  0x70   : > { %p2184_p4 = pneg %p2183_p1 }
  0x72   : > { %p2191_p8 = pnand %p2190_p12, %p2184_p4 }
  0x74   : > { %2194 = shalt.err (!%p2191_p8)
}
  0x75   : > { %s2302_s18 = smov 64   ;;  %s2303_s11 = smov 4  }
  0x76   : > { %1989 = dma.hbm_to_vmem [thread:$0]  (!%p2915_p7), %s2854_s10, 512, %s476_s13, [#allocation7], %s2302_s18, %s2302_s18, %s2303_s11  }
  0x77   : > { %p2918_p10 = scmp.ne.s32.totalorder %s2898_s19, 0 }
  0x78   : > { %p2919_p13 = scmp.ne.s32.totalorder (!%p2918_p10), %s2903_s29, 0 }
  0x79   : > { %506 = sbr.rel (%p2918_p10) target bundleno = 3869 (0xf1d), region = 84 }
  0x80   : > { %2256 = dma.done.wait (%p2919_p13), [#allocation4], 128  }
  0x81   : > { %2258 = vsyncadd (%p2919_p13), [#allocation4], 4294967168  ;;  %p2920_p6 = scmp.ne.s32.totalorder %s2896_s17, 0 }
  0x83   : > { %2260 = dma.done.wait (%p2920_p6), [#allocation7], 640  }
  0x84   : > { %2262 = vsyncadd (%p2920_p6), [#allocation7], 4294966656  ;;  %s556_s20 = sand.u32 1, %s2273_s22   ;;  %p1756_p7 = scmp.ne.s32.totalorder %s2281_s24, 0 }
  0x85   : > { %s2592_s13 = sshll.u32 %s556_s20, 3  ;;  %v564_v0 = vld [vmem:[#allocation3] sm:$0xff] (!%p1756_p7)  ;;  %vm565_vm0 = vcmask (!%p1756_p7), 261120  }
  0x86   : > { %s558_s19 = scalar_lea.vmem [#allocation9], %s2592_s13  ;;  %563 = sbr.rel (%p1756_p7) target bundleno = 141 (0x8d), region = 100  ;;  %566 = vst.msk [vmem:[#allocation2] sm:$0xff] (!%p1756_p7), %vm565_vm0, %v564_v0 }
  0x8d PF: > { %s2597_s29 = sshll.u32 %s2281_s24, 4  ;;  %v2599_v1 = vld [vmem:[#allocation2] sm:$0xff]  ;;  %v568_v2 = vld [vmem:[#allocation6] sm:$0xff]  ;;  %v2304_v3 = vmov 0.0   ;;  %vm2305_vm1 = vmmov 0   ;;  %vm598_vm2 = vcmask 261120   ;;  %s578_s21 = scalar_lea.vmem %s2847_s3, %s2281_s24 }
  0x8e   : > { %1860 = vmatprep.subr.bf16.mxu0 %v2304_v3  ;;  %s573_s30 = scalar_lea.vmem %s2846_s2, %s2597_s29  ;;  %1864 = vmatprep.mubr.msk.bf16.mxu0 %vm2305_vm1, %v2304_v3  ;;  %v569_v5 = vadd.f32 %v568_v2, %v2599_v1  ;;  %v1759_v8 = vld [vmem:[%s578_s21] ss:$0 sm:$0xff]  ;;  %s2306_s28 = smov 120   ;;  %v642_v17 = vpack.c.bf16 %v2599_v1, %v2599_v1  ;;  %vm717_vm3 = vcmask 64512   ;;  %vm779_vm4 = vcmask 1043456  }
  0x8f   : > { %v2077_v4 = vld [vmem:[%s573_s30] sm:$0xff]   ;;  %1868 = vmatprep.subr.bf16.mxu1 %v2304_v3  ;;  %1872 = vmatprep.mubr.msk.bf16.mxu1 %vm2305_vm1, %v2304_v3  ;;  %v2078_v6 = vld [vmem:[%s573_s30 + $0x8] sm:$0xff]   ;;  %s2307_s15 = smov 96   ;;  %s644_s0 = scalar_lea.vmem %s2848_s4, %s2597_s29  ;;  %vm1524_vm5 = vcmask 523264  }
  0x90   : > { %1861 = vmatpush3.bf16.msra.mxu0 %v2077_v4  ;;  %v570_v7 = vpack.c.bf16 %v569_v5, %v569_v5  ;;  %s2308_s27 = smov 88   ;;  %v2079_v15 = vld [vmem:[%s644_s0] sm:$0xff]   ;;  %v2080_v16 = vld [vmem:[%s644_s0 + $0x8] sm:$0xff]   ;;  %s649_s30 = scalar_lea.vmem %s2849_s5, %s2281_s24 }
  0x91   : > { %1862 = vmatprep.subr.bf16.mxu0 %v2304_v3  ;;  %1869 = vmatpush3.bf16.msra.mxu1 %v2079_v15  ;;  %v1764_v34 = vld [vmem:[%s649_s30] ss:$0 sm:$0xff]  ;;  %s2309_s14 = smov 80   ;;  %s2310_s26 = smov 112  }
  0x92   : > { %1870 = vmatprep.subr.bf16.mxu1 %v2304_v3  ;;  %s2311_s18 = smov 104   ;;  %s2312_s11 = smov 72  }
  0x93   : > { %s1359_s17 = scalar_lea.vmem %s2851_s7, %s2281_s24  ;;  %s1403_s16 = scalar_lea.vmem [#allocation8], %s2597_s29 }
  0x94   : > { %1863 = vmatpush3.bf16.msra.mxu0 %v2078_v6  ;;  %s2921_s0 = sld [smem:[#allocation24_spill]]  ;;  %s2922_s30 = sld [smem:[#allocation23_spill]] }
  0x95   : > { %1876 = vmatprep.subr.bf16.mxu0 %v2304_v3  ;;  %1871 = vmatpush3.bf16.msra.mxu1 %v2080_v16  ;;  %p1808_p3 = scmp.ge.s32.totalorder %s2281_s24, 1 }
  0x96   : > { %1882 = vmatprep.subr.bf16.mxu1 %v2304_v3 }
  0x97   : > { %1865 = vmatmul.mubr.msk.bf16.vlgmr.msra.gmra.mrb[0].mxu0 %vm598_vm2, %v570_v7 }
  0x98   : > { %1878 = vmatprep.mubr.msk.bf16.mxu0 %vm2305_vm1, %v2304_v3  ;;  %1873 = vmatmul.mubr.msk.bf16.vlgmr.msra.gmra.mrb[0].mxu1 %vm598_vm2, %v642_v17 }
  0x99   : > { %1884 = vmatprep.mubr.msk.bf16.mxu1 %vm2305_vm1, %v2304_v3 }
 0x16a   : > { %v636_v9 = vpop.f32.mrb[0].mxu0 }
 0x16b   : > { %v637_v10 = vadd.f32 %v1759_v8, %v636_v9  ;;  %v1866_v11 = vpop.f32.mrb[1].mxu0  ;;  %v706_v33 = vpop.f32.mrb[0].mxu1 }
 0x16c   : > { %v639_v12 = vpop.f32.mrb[2].mxu0  ;;  %v1874_v35 = vpop.f32.mrb[1].mxu1  ;;  %v707_v36 = vadd.f32 %v1764_v34, %v706_v33 }
 0x16d   : > { %v2621_v13 = vpack.c.bf16 %v637_v10, %v637_v10  ;;  %v1867_v14 = vpop.f32.mrb[3].mxu0  ;;  %v709_v37 = vpop.f32.mrb[2].mxu1 }
 0x16e   : > { %v1875_v38 = vpop.f32.mrb[3].mxu1  ;;  %v2655_v39 = vpack.c.bf16 %v707_v36, %v707_v36 }
 0x16f   : > { %827 = vrot.lane.b32.xlu1 %v2621_v13, %s2306_s28  ;;  %715 = vrot.lane.b32.xlu0 %v2621_v13, %s2307_s15  ;;  %s2679_s15 = scalar_lea.vmem %s2850_s6, %s2597_s29  ;;  %s1821_s29 = sshll.u32 %s2281_s24, 5 }
 0x170   : > { %v781_v40 = vsel %vm779_vm4, %v2655_v39, 0  ;;  %v826_v61 = vld [vmem:[%s2679_s15] sm:$0xf]  ;;  %v1775_v63 = vld [vmem:[%s2679_s15 + $0x4] sm:$0xf] }
 0x171   : > { %1883 = vmatpush3.bf16.msra.mxu1 %v781_v40  ;;  %v993_v62 = vsel %vm779_vm4, %v826_v61, 0  ;;  %v947_v0 = vsel %vm779_vm4, %v1775_v63, 0 }
 0x172   : > { %1894 = vmatprep.subr.bf16.mxu1 %v2304_v3 }
 0x173   : > { %829 = vrot.lane.b32.xlu0 %v2621_v13, %s2308_s27  ;;  %s1483_s27 = scalar_lea.vmem %s2921_s0, %s1821_s29 }
 0x1e1   : > { %v716_v18 = vpop.permute.xlu0 %715  ;;  %v828_v22 = vpop.permute.xlu1 %827 }
 0x1e2   : > { %v722_v19 = vsel %vm717_vm3, %v716_v18, 0 }
 0x1e3   : > { %1877 = vmatpush3.bf16.xpose.msra.mxu0 %v722_v19 }
 0x1e4   : > { %1888 = vmatprep.subr.bf16.mxu0 %v2304_v3 }
 0x1e5   : > { %v830_v20 = vpop.permute.xlu0 %829 }
 0x1e6   : > { %v835_v21 = vsel %vm717_vm3, %v830_v20, 0 }
 0x1ea   : > { %1879 = vmatmul.mubr.msk.bf16.vlgmr.msra.gmra.mrb[4].mxu0 %vm717_vm3, %v2621_v13 }
 0x1eb   : > { %1889 = vmatpush3.bf16.xpose.msra.mxu0 %v835_v21  ;;  %1890 = vmatprep.mubr.msk.bf16.mxu0 %vm2305_vm1, %v2304_v3 }
 0x1ec   : > { %1900 = vmatprep.subr.bf16.mxu0 %v2304_v3 }
 0x1f2   : > { %1891 = vmatmul.mubr.msk.bf16.vlgmr.msra.gmra.mrb[8].mxu0 %vm717_vm3, %v828_v22 }
 0x1f3   : > { %1902 = vmatprep.mubr.msk.bf16.mxu0 %vm2305_vm1, %v2304_v3  ;;  %1901 = vmatpush3.bf16.msra.mxu0 %v947_v0 }
 0x1f4   : > { %1912 = vmatprep.subr.bf16.mxu0 %v2304_v3 }
 0x2bd   : > { %v758_v23 = vpop.f32.mrb[4].mxu0 }
 0x2be   : > { %v1880_v24 = vpop.f32.mrb[5].mxu0  ;;  %v764_v25 = vsel %vm717_vm3, %v758_v23, -inf }
 0x2bf   : > { %765 = vmax.xlane.f32.xlu1 %v764_v25  ;;  %v761_v26 = vpop.f32.mrb[6].mxu0 }
 0x2c0   : > { %v1881_v27 = vpop.f32.mrb[7].mxu0 }
 0x2c5   : > { %v871_v28 = vpop.f32.mrb[8].mxu0 }
 0x2c6   : > { %v1892_v29 = vpop.f32.mrb[9].mxu0  ;;  %v877_v30 = vsel %vm717_vm3, %v871_v28, -inf }
 0x2c7   : > { %878 = vmax.xlane.f32.xlu0 %v877_v30  ;;  %v874_v31 = vpop.f32.mrb[10].mxu0 }
 0x2c8   : > { %v1893_v32 = vpop.f32.mrb[11].mxu0 }
 0x34c   : > { %v766_v41 = vpop.xlane.xlu1 %765 }
 0x34d   : > { %v767_v42 = vsub.f32 %v758_v23, %v766_v41 }
 0x34f   : > { %v768_v43 = vmul.f32 1.442695, %v767_v42 }
 0x351   : > { %2087 = vpow2.f32 %v768_v43 }
 0x354   : > { %v879_v44 = vpop.xlane.xlu0 %878 }
 0x355   : > { %v880_v45 = vsub.f32 %v871_v28, %v879_v44 }
 0x357   : > { %v881_v46 = vmul.f32 1.442695, %v880_v45 }
 0x359   : > { %2089 = vpow2.f32 %v881_v46 }
 0x35b   : > { %v2088_v47 = vpop.eup %2087 }
 0x35c   : > { %v770_v48 = vsel %vm717_vm3, %v2088_v47, 0.0 }
 0x35d   : > { %771 = vadd.xlane.f32.xlu0 %v770_v48 }
 0x363   : > { %v2090_v49 = vpop.eup %2089 }
 0x364   : > { %v883_v50 = vsel %vm717_vm3, %v2090_v49, 0.0 }
 0x365   : > { %884 = vadd.xlane.f32.xlu1 %v883_v50 }
 0x373   : > { %890 = vrot.lane.b32.xlu0 %v2655_v39, %s2306_s28  ;;  %s2923_s28 = sld [smem:[#allocation25_spill]] }
 0x376   : > { %1037 = vrot.lane.b32.xlu1 %v2621_v13, %s2309_s14  ;;  %s1408_s14 = scalar_lea.vmem %s2922_s30, %s2281_s24 }
 0x37a   : > { %1035 = vrot.lane.b32.xlu1 %v2621_v13, %s2310_s26 }
 0x3ea   : > { %v772_v51 = vpop.xlane.xlu0 %771 }
 0x3eb   : > { %2091 = vrcp.f32 %v772_v51 }
 0x3ee   : > { %v891_v54 = vpop.permute.xlu0 %890 }
 0x3ef   : > { %v896_v56 = vsel %vm779_vm4, %v891_v54, 0 }
 0x3f2   : > { %v885_v52 = vpop.xlane.xlu1 %884 }
 0x3f3   : > { %2093 = vrcp.f32 %v885_v52 }
 0x3f5   : > { %v2092_v53 = vpop.eup %2091 }
 0x3f6   : > { %v774_v55 = vmul.f32 %v2092_v53, %v2088_v47  ;;  %v1038_v8 = vpop.permute.xlu1 %1037 }
 0x3f7   : > { %v1043_v14 = vsel %vm717_vm3, %v1038_v8, 0 }
 0x3f8   : > { %v775_v57 = vpack.c.bf16 %v774_v55, %v774_v55 }
 0x3fa   : > { %1885 = vmatmul.mubr.msk.bf16.vlgmr.msra.gmra.mrb[4].mxu1 %vm717_vm3, %v775_v57  ;;  %v1036_v16 = vpop.permute.xlu1 %1035 }
 0x3fb   : > { %1895 = vmatpush3.bf16.msra.mxu1 %v896_v56  ;;  %1896 = vmatprep.mubr.msk.bf16.mxu1 %vm2305_vm1, %v2304_v3 }
 0x3fc   : > { %1906 = vmatprep.subr.bf16.mxu1 %v2304_v3 }
 0x3fd   : > { %v2094_v58 = vpop.eup %2093 }
 0x3fe   : > { %v887_v59 = vmul.f32 %v2094_v58, %v2090_v49 }
 0x400   : > { %v888_v60 = vpack.c.bf16 %v887_v59, %v887_v59 }
 0x402   : > { %1897 = vmatmul.mubr.msk.bf16.vlgmr.msra.gmra.mrb[8].mxu1 %vm717_vm3, %v888_v60 }
 0x403   : > { %1908 = vmatprep.mubr.msk.bf16.mxu1 %vm2305_vm1, %v2304_v3  ;;  %1907 = vmatpush3.bf16.msra.mxu1 %v993_v62  ;;  %v1788_v62 = vld [vmem:[%s2679_s15 + $0xc] sm:$0xf] }
 0x404   : > { %1918 = vmatprep.subr.bf16.mxu1 %v2304_v3  ;;  %v1316_v63 = vsel %vm779_vm4, %v1788_v62, 0 }
 0x4cd   : > { %v817_v2 = vpop.f32.mrb[4].mxu1 }
 0x4ce   : > { %v823_v4 = vpack.c.bf16 %v817_v2, %v817_v2  ;;  %v1886_v5 = vpop.f32.mrb[5].mxu1 }
 0x4cf   : > { %v820_v6 = vpop.f32.mrb[6].mxu1 }
 0x4d0   : > { %v1887_v7 = vpop.f32.mrb[7].mxu1  ;;  %1909 = vmatmul.mubr.msk.bf16.vlgmr.msra.gmra.mrb[12].mxu1 %vm717_vm3, %v823_v4 }
 0x4d1   : > { %1920 = vmatprep.mubr.msk.bf16.mxu1 %vm2305_vm1, %v2304_v3 }
 0x4d5   : > { %v932_v9 = vpop.f32.mrb[8].mxu1 }
 0x4d6   : > { %v938_v10 = vpack.c.bf16 %v932_v9, %v932_v9  ;;  %v1898_v11 = vpop.f32.mrb[9].mxu1 }
 0x4d7   : > { %v935_v12 = vpop.f32.mrb[10].mxu1 }
 0x4d8   : > { %v1899_v15 = vpop.f32.mrb[11].mxu1  ;;  %1903 = vmatmul.mubr.msk.bf16.vlgmr.msra.gmra.mrb[12].mxu0 %vm717_vm3, %v938_v10 }
 0x4d9   : > { %1913 = vmatpush3.bf16.xpose.msra.mxu0 %v1043_v14  ;;  %1914 = vmatprep.mubr.msk.bf16.mxu0 %vm2305_vm1, %v2304_v3 }
 0x4da   : > { %1924 = vmatprep.subr.bf16.mxu0 %v2304_v3 }
 0x4e0   : > { %1915 = vmatmul.mubr.msk.bf16.vlgmr.msra.gmra.mrb[16].mxu0 %vm717_vm3, %v1036_v16 }
 0x4e1   : > { %1926 = vmatprep.mubr.msk.bf16.mxu0 %vm2305_vm1, %v2304_v3 }
 0x5a3   : > { %v1029_v17 = vpop.f32.mrb[12].mxu1 }
 0x5a4   : > { %v1910_v18 = vpop.f32.mrb[13].mxu1 }
 0x5a5   : > { %v1032_v19 = vpop.f32.mrb[14].mxu1 }
 0x5a6   : > { %v1911_v20 = vpop.f32.mrb[15].mxu1  ;;  %v1790_v19 = vld [vmem:[%s1359_s17] ss:$0 sm:$0xff] }
 0x5ab   : > { %v983_v21 = vpop.f32.mrb[12].mxu0 }
 0x5ac   : > { %v2698_v22 = vadd.f32 %v1029_v17, %v983_v21  ;;  %v1904_v23 = vpop.f32.mrb[13].mxu0 }
 0x5ad   : > { %v986_v24 = vpop.f32.mrb[14].mxu0 }
 0x5ae   : > { %v1905_v25 = vpop.f32.mrb[15].mxu0 }
 0x5b3   : > { %v1079_v26 = vpop.f32.mrb[16].mxu0 }
 0x5b4   : > { %v1916_v27 = vpop.f32.mrb[17].mxu0  ;;  %v1085_v28 = vsel %vm717_vm3, %v1079_v26, -inf }
 0x5b5   : > { %1086 = vmax.xlane.f32.xlu0 %v1085_v28  ;;  %v1082_v29 = vpop.f32.mrb[18].mxu0 }
 0x5b6   : > { %v1917_v30 = vpop.f32.mrb[19].mxu0 }
 0x5cb   : > { %1097 = vrot.lane.b32.xlu0 %v2655_v39, %s2310_s26  ;;  %s1383_s26 = scalar_lea.vmem %s2852_s8, %s2281_s24 }
 0x5cf   : > { %1197 = vrot.lane.b32.xlu0 %v2621_v13, %s2311_s18 }
 0x642   : > { %v1087_v31 = vpop.xlane.xlu0 %1086 }
 0x643   : > { %v1088_v32 = vsub.f32 %v1079_v26, %v1087_v31 }
 0x645   : > { %v1089_v33 = vmul.f32 1.442695, %v1088_v32  ;;  %v2081_v32 = vld [vmem:[%s1403_s16] sm:$0xff]  }
 0x646   : > { %v1098_v34 = vpop.permute.xlu0 %1097 }
 0x647   : > { %2095 = vpow2.f32 %v1089_v33  ;;  %v1103_v35 = vsel %vm779_vm4, %v1098_v34, 0  ;;  %v2082_v33 = vld [vmem:[%s1403_s16 + $0x8] sm:$0xff]   ;;  %s2925_s16 = sld [smem:[#allocation27_spill]] }
 0x648   : > { %1919 = vmatpush3.bf16.msra.mxu1 %v1103_v35 }
 0x649   : > { %1930 = vmatprep.subr.bf16.mxu1 %v2304_v3 }
 0x64a   : > { %v1198_v45 = vpop.permute.xlu0 %1197 }
 0x64d   : > { %s1591_s30 = scalar_lea.vmem %s2925_s16, %s2281_s24 }
 0x651   : > { %v2096_v36 = vpop.eup %2095 }
 0x652   : > { %v1091_v37 = vsel %vm717_vm3, %v2096_v36, 0.0 }
 0x653   : > { %1092 = vadd.xlane.f32.xlu1 %v1091_v37  ;;  %v1791_v37 = vld [vmem:[%s1383_s26] ss:$0 sm:$0xff] }
 0x664   : > { %1199 = vrot.lane.b32.xlu1 %v2621_v13, %s2312_s11  ;;  %v1782_v13 = vld [vmem:[%s2679_s15 + $0x8] sm:$0xf]  ;;  %s1392_s15 = scalar_lea.vmem %s2853_s9, %s2281_s24  ;;  %s2924_s11 = sld [smem:[#allocation26_spill]] }
 0x665   : > { %v1154_v46 = vsel %vm779_vm4, %v1782_v13, 0  ;;  %v2085_v13 = vld [vmem:[%s1483_s27 + $0x10] sm:$0xff]  }
 0x666   : > { %1925 = vmatpush3.bf16.msra.mxu0 %v1154_v46  ;;  %v2086_v46 = vld [vmem:[%s1483_s27 + $0x18] sm:$0xff]  }
 0x667   : > { %1936 = vmatprep.subr.bf16.mxu0 %v2304_v3 }
 0x66a   : > { %s1582_s0 = scalar_lea.vmem %s2924_s11, %s2281_s24 }
 0x6e0   : > { %v1093_v38 = vpop.xlane.xlu1 %1092 }
 0x6e1   : > { %2097 = vrcp.f32 %v1093_v38 }
 0x6e4   : > { %v1200_v42 = vpop.permute.xlu1 %1199 }
 0x6e5   : > { %v1205_v44 = vsel %vm717_vm3, %v1200_v42, 0 }
 0x6eb   : > { %v2098_v40 = vpop.eup %2097 }
 0x6ec   : > { %v1095_v41 = vmul.f32 %v2098_v40, %v2096_v36  ;;  %v1792_v40 = vld [vmem:[%s1392_s15] ss:$0 sm:$0xff]  ;;  %s1492_s15 = scalar_lea.vmem %s2923_s28, %s2281_s24 }
 0x6ed   : > { %v1800_v62 = vld [vmem:[%s1492_s15] ss:$0 sm:$0xff] }
 0x6ee   : > { %v1096_v43 = vpack.c.bf16 %v1095_v41, %v1095_v41 }
 0x6f0   : > { %1921 = vmatmul.mubr.msk.bf16.vlgmr.msra.gmra.mrb[16].mxu1 %vm717_vm3, %v1096_v43 }
 0x6f1   : > { %1931 = vmatpush3.bf16.xpose.msra.mxu1 %v1205_v44  ;;  %1932 = vmatprep.mubr.msk.bf16.mxu1 %vm2305_vm1, %v2304_v3  ;;  %v2083_v44 = vld [vmem:[%s1483_s27] sm:$0xff]  }
 0x6f2   : > { %1942 = vmatprep.subr.bf16.mxu1 %v2304_v3 }
 0x6f8   : > { %1933 = vmatmul.mubr.msk.bf16.vlgmr.msra.gmra.mrb[20].mxu1 %vm717_vm3, %v1198_v45  ;;  %v2084_v45 = vld [vmem:[%s1483_s27 + $0x8] sm:$0xff]  }
 0x6f9   : > { %1944 = vmatprep.mubr.msk.bf16.mxu1 %vm2305_vm1, %v2304_v3  ;;  %1943 = vmatpush3.bf16.msra.mxu1 %v1316_v63 }
 0x6fa   : > { %1956 = vmatprep.subr.bf16.mxu1 %v2304_v3 }
 0x7c3   : > { %v1139_v47 = vpop.f32.mrb[16].mxu1 }
 0x7c4   : > { %v1145_v48 = vpack.c.bf16 %v1139_v47, %v1139_v47  ;;  %v1922_v49 = vpop.f32.mrb[17].mxu1  ;;  %v1794_v47 = vld [vmem:[%s1408_s14] ss:$0 sm:$0xff] }
 0x7c5   : > { %v1142_v50 = vpop.f32.mrb[18].mxu1 }
 0x7c6   : > { %v1923_v51 = vpop.f32.mrb[19].mxu1  ;;  %1927 = vmatmul.mubr.msk.bf16.vlgmr.msra.gmra.mrb[20].mxu0 %vm717_vm3, %v1145_v48 }
 0x7c7   : > { %1938 = vmatprep.mubr.msk.bf16.mxu0 %vm2305_vm1, %v2304_v3 }
 0x7cb   : > { %v1241_v52 = vpop.f32.mrb[20].mxu1 }
 0x7cc   : > { %v1934_v53 = vpop.f32.mrb[21].mxu1  ;;  %v1247_v54 = vsel %vm717_vm3, %v1241_v52, -inf }
 0x7cd   : > { %1248 = vmax.xlane.f32.xlu1 %v1247_v54  ;;  %v1244_v55 = vpop.f32.mrb[22].mxu1 }
 0x7ce   : > { %v1935_v56 = vpop.f32.mrb[23].mxu1 }
 0x85a   : > { %v1249_v57 = vpop.xlane.xlu1 %1248 }
 0x85b   : > { %v1250_v58 = vsub.f32 %v1241_v52, %v1249_v57 }
 0x85d   : > { %v1251_v59 = vmul.f32 1.442695, %v1250_v58 }
 0x85f   : > { %2099 = vpow2.f32 %v1251_v59 }
 0x869   : > { %v2100_v60 = vpop.eup %2099 }
 0x86a   : > { %v1253_v61 = vsel %vm717_vm3, %v2100_v60, 0.0 }
 0x86b   : > { %1254 = vadd.xlane.f32.xlu0 %v1253_v61 }
 0x881   : > { %1259 = vrot.lane.b32.xlu0 %v2655_v39, %s2311_s18 }
 0x899   : > { %v1190_v0 = vpop.f32.mrb[20].mxu0 }
 0x89a   : > { %v1196_v2 = vadd.f32 %v1190_v0, %v2698_v22  ;;  %v1928_v4 = vpop.f32.mrb[21].mxu0 }
 0x89b   : > { %v1193_v5 = vpop.f32.mrb[22].mxu0 }
 0x89c   : > { %v1929_v6 = vpop.f32.mrb[23].mxu0 }
 0x8f8   : > { %v1255_v7 = vpop.xlane.xlu0 %1254 }
 0x8f9   : > { %2101 = vrcp.f32 %v1255_v7 }
 0x8fc   : > { %v1260_v8 = vpop.permute.xlu0 %1259 }
 0x8fd   : > { %v1265_v9 = vsel %vm779_vm4, %v1260_v8, 0 }
 0x8fe   : > { %1937 = vmatpush3.bf16.msra.mxu0 %v1265_v9 }
 0x8ff   : > { %1948 = vmatprep.subr.bf16.mxu0 %v2304_v3 }
 0x903   : > { %v2102_v39 = vpop.eup %2101 }
 0x904   : > { %v1257_v10 = vmul.f32 %v2102_v39, %v2100_v60 }
 0x906   : > { %v1258_v11 = vpack.c.bf16 %v1257_v10, %v1257_v10 }
 0x908   : > { %1939 = vmatmul.mubr.msk.bf16.vlgmr.msra.gmra.mrb[24].mxu0 %vm717_vm3, %v1258_v11 }
 0x909   : > { %1952 = vmatprep.mubr.msk.bf16.mxu0 %vm2305_vm1, %v2304_v3  ;;  %1949 = vmatpush3.bf16.msra.mxu0 %v2081_v32 }
 0x90a   : > { %1950 = vmatprep.subr.bf16.mxu0 %v2304_v3 }
 0x90d   : > { %1951 = vmatpush3.bf16.msra.mxu0 %v2082_v33 }
 0x9db   : > { %v1301_v12 = vpop.f32.mrb[24].mxu0 }
 0x9dc   : > { %v1307_v14 = vpack.c.bf16 %v1301_v12, %v1301_v12  ;;  %v1940_v15 = vpop.f32.mrb[25].mxu0 }
 0x9dd   : > { %v1304_v16 = vpop.f32.mrb[26].mxu0 }
 0x9de   : > { %v1941_v17 = vpop.f32.mrb[27].mxu0  ;;  %1945 = vmatmul.mubr.msk.bf16.vlgmr.msra.gmra.mrb[24].mxu1 %vm717_vm3, %v1307_v14 }
 0x9df   : > { %1964 = vmatprep.mubr.msk.bf16.mxu1 %vm2305_vm1, %v2304_v3  ;;  %1957 = vmatpush3.bf16.msra.mxu1 %v2083_v44  ;;  %v1806_v17 = vld [vmem:[%s1582_s0] ss:$0 sm:$0xff] }
 0x9e0   : > { %1958 = vmatprep.subr.bf16.mxu1 %v2304_v3 }
 0x9e3   : > { %1959 = vmatpush3.bf16.msra.mxu1 %v2084_v45 }
 0x9e4   : > { %1960 = vmatprep.subr.bf16.mxu1 %v2304_v3 }
 0x9e7   : > { %1961 = vmatpush3.bf16.msra.mxu1 %v2085_v13 }
 0x9e8   : > { %1962 = vmatprep.subr.bf16.mxu1 %v2304_v3 }
 0x9eb   : > { %1963 = vmatpush3.bf16.msra.mxu1 %v2086_v46 }
 0xab1   : > { %v1352_v18 = vpop.f32.mrb[24].mxu1 }
 0xab2   : > { %v1358_v20 = vadd.f32 %v1352_v18, %v1196_v2  ;;  %v1946_v21 = vpop.f32.mrb[25].mxu1 }
 0xab3   : > { %v1355_v22 = vpop.f32.mrb[26].mxu1 }
 0xab4   : > { %v1367_v23 = vadd.f32 %v1790_v19, %v1358_v20  ;;  %v1947_v24 = vpop.f32.mrb[27].mxu1  ;;  %v1807_v19 = vld [vmem:[%s1591_s30] ss:$0 sm:$0xff] }
 0xab6   : > { %v1368_v25 = vadd.f32 %v1367_v23, %v2599_v1 }
 0xab8   : > { %v1369_v26 = vsel %vm598_vm2, %v1368_v25, 0.0 }
 0xab9   : > { %1370 = vadd.xlane.f32.xlu1 %v1369_v26 }
 0xb46   : > { %v1371_v27 = vpop.xlane.xlu1 %1370 }
 0xb47   : > { %v1373_v28 = vmul.f32 0.03125, %v1371_v27 }
 0xb49   : > { %v1374_v29 = vsub.f32 %v1368_v25, %v1373_v28 }
 0xb4b   : > { %v1375_v30 = vmul.f32 %v1374_v29, %v1374_v29 }
 0xb4d   : > { %v1376_v31 = vsel %vm598_vm2, %v1375_v30, 0.0 }
 0xb4e   : > { %1377 = vadd.xlane.f32.xlu1 %v1376_v31 }
 0xbdb   : > { %v1378_v1 = vpop.xlane.xlu1 %1377 }
 0xbdc   : > { %v1379_v34 = vmul.f32 0.03125, %v1378_v1 }
 0xbde   : > { %v1380_v35 = vadd.f32 1e-05, %v1379_v34 }
 0xbe0   : > { %2103 = vrsqrt.f32 %v1380_v35 }
 0xbea   : > { %v2104_v36 = vpop.eup %2103 }
 0xbeb   : > { %v1382_v38 = vmul.f32 %v2104_v36, %v1374_v29 }
 0xbed   : > { %v1391_v41 = vmul.f32 %v1791_v37, %v1382_v38 }
 0xbef   : > { %v1400_v42 = vadd.f32 %v1792_v40, %v1391_v41 }
 0xbf1   : > { %v1401_v43 = vpack.c.bf16 %v1400_v42, %v1400_v42 }
 0xbf3   : > { %1953 = vmatmul.mubr.msk.bf16.vlgmr.msra.gmra.mrb[28].mxu0 %vm598_vm2, %v1401_v43 }
 0xcc6   : > { %v1465_v48 = vpop.f32.mrb[28].mxu0 }
 0xcc7   : > { %v1466_v49 = vadd.f32 %v1794_v47, %v1465_v48  ;;  %v1954_v50 = vpop.f32.mrb[29].mxu0 }
 0xcc8   : > { %v1468_v51 = vpop.f32.mrb[30].mxu0 }
 0xcc9   : > { %v1471_v52 = vmul.f32 %v1466_v49, %v1466_v49  ;;  %v1955_v53 = vpop.f32.mrb[31].mxu0 }
 0xccb   : > { %v1472_v54 = vmul.f32 %v1471_v52, %v1466_v49 }
 0xccd   : > { %v1473_v55 = vmul.f32 0.044715, %v1472_v54 }
 0xccf   : > { %v1474_v56 = vadd.f32 %v1473_v55, %v1466_v49 }
 0xcd1   : > { %v1475_v57 = vmul.f32 0.7978846, %v1474_v56 }
 0xcd3   : > { %2105 = vtanh.f32 %v1475_v57 }
 0xcdd   : > { %v2106_v3 = vpop.eup %2105 }
 0xcde   : > { %v1477_v58 = vadd.f32 1.0, %v2106_v3 }
 0xce0   : > { %v1478_v59 = vmul.f32 0.5, %v1477_v58 }
 0xce2   : > { %v1479_v60 = vmul.f32 %v1478_v59, %v1466_v49 }
 0xce4   : > { %v1480_v61 = vpack.c.bf16 %v1479_v60, %v1479_v60 }
 0xce6   : > { %1965 = vmatmul.mubr.msk.bf16.vlgmr.msra.gmra.mrb[28].mxu1 %vm1524_vm5, %v1480_v61 }
 0xdb9   : > { %v1562_v63 = vpop.f32.mrb[28].mxu1 }
 0xdba   : > { %v1563_v0 = vadd.f32 %v1800_v62, %v1562_v63  ;;  %v1966_v2 = vpop.f32.mrb[29].mxu1 }
 0xdbb   : > { %v1565_v4 = vpop.f32.mrb[30].mxu1 }
 0xdbc   : > { %v1967_v5 = vpop.f32.mrb[31].mxu1  ;;  %v1568_v6 = vadd.f32 %v1563_v0, %v1400_v42 }
 0xdbe   : > { %v1569_v7 = vsel %vm598_vm2, %v1568_v6, 0.0 }
 0xdbf   : > { %1570 = vadd.xlane.f32.xlu1 %v1569_v7 }
 0xe4c   : > { %v1571_v8 = vpop.xlane.xlu1 %1570 }
 0xe4d   : > { %v1572_v9 = vmul.f32 0.03125, %v1571_v8 }
 0xe4f   : > { %v1573_v39 = vsub.f32 %v1568_v6, %v1572_v9 }
 0xe51   : > { %v1574_v10 = vmul.f32 %v1573_v39, %v1573_v39 }
 0xe53   : > { %v1575_v11 = vsel %vm598_vm2, %v1574_v10, 0.0 }
 0xe54   : > { %1576 = vadd.xlane.f32.xlu1 %v1575_v11 }
 0xee1   : > { %v1577_v12 = vpop.xlane.xlu1 %1576 }
 0xee2   : > { %v1578_v14 = vmul.f32 0.03125, %v1577_v12 }
 0xee4   : > { %v1579_v15 = vadd.f32 1e-05, %v1578_v14 }
 0xee6   : > { %2107 = vrsqrt.f32 %v1579_v15 }
 0xeef   : > { %1603 = sbr.rel (%p1808_p3) target bundleno = 3832 (0xef8), region = 104 }
 0xef0   : > { %v2108_v16 = vpop.eup %2107 }
 0xef1   : > { %v1581_v18 = vmul.f32 %v2108_v16, %v1573_v39 }
 0xef3   : > { %v1590_v20 = vmul.f32 %v1806_v17, %v1581_v18 }
 0xef5   : > { %v1599_v21 = vadd.f32 %v1807_v19, %v1590_v20 }
 0xef7   : > { %1604 = vst.msk [vmem:[#allocation2] sm:$0xff] %vm598_vm2, %v1599_v21 }
 0xef8 PF: > { %p1809_p5 = scmp.ne.s32.totalorder %s2281_s24, 1 }
 0xef9   : > { %1609 = vst.msk [vmem:[%s558_s19] sm:$0xff] (!%p1809_p5), %vm598_vm2, %v1599_v21 }
 0xefa   : > { %1608 = sbr.rel (%p1809_p5) target bundleno = 3841 (0xf01), region = 108 }
 0xf01 PF: > { %s2926_s14 = sshll.u32 %s2285_s25, 7  ;;  %s2927_s28 = sld [smem:[#allocation28_spill]] }
 0xf02   : > { %s2929_s29 = sld [smem:[#allocation18_spill]]  ;;  %s1624_s11 = sshll.u32 %s558_s19, 4  ;;  %s1625_s11 = int_to_ptr.vmem [resolvable:$true] %s1624_s11 }
 0xf03   : > { %s1611_s24 = scalar_lea.sflag [#allocation5], %s556_s20  ;;  %s2195_s0 = scalar_lea.vmem %s1625_s11, 128 }
 0xf04   : > { %p2196_p2 = scmp.ne.s32.totalorder %s1625_s11, %s2195_s0  ;;  %s2313_s27 = smov [#allocation9]  }
 0xf05   : > { %s2199_s25 = sshll.u32 %s2313_s27, 4  ;;  %s2200_s25 = int_to_ptr.vmem [resolvable:$false] %s2199_s25 }
 0xf06   : > { %s2201_s17 = scalar_lea.vmem %s2200_s25, 256  ;;  %p2202_p9 = scmp.lt.s32.totalorder %s1625_s11, %s2200_s25 }
 0xf07   : > { %s2928_s15 = smov %s2927_s28  ;;  %s2793_s18 = scalar_lea.hbm %s2927_s28, %s2926_s14 }
 0xf08   : > { %p2930_p11 = scmp.ne.s32.totalorder %s2929_s29, 0  ;;  %p2203_p0 = scmp.lt.s32.totalorder %s2201_s17, %s2195_s0 }
 0xf0a   : > { %p2197_p1 = pnand %p2196_p2, %p2930_p11  ;;  %p2204_p12 = por %p2203_p0, %p2202_p9 }
 0xf0c   : > { %p2198_p4 = pneg %p2197_p1 }
 0xf0e   : > { %p2205_p8 = pnand %p2204_p12, %p2198_p4 }
 0xf10   : > { %2208 = shalt.err (!%p2205_p8)
}
 0xf11   : > { %s2209_s20 = scalar_lea.hbm %s2793_s18, 128  ;;  %s2213_s16 = scalar_lea.hbm %s2928_s15, 256 }
 0xf12   : > { %p2210_p10 = scmp.ne.s32.totalorder %s2793_s18, %s2209_s20  ;;  %p2214_p7 = scmp.lt.u32.totalorder %s2793_s18, %s2928_s15 }
 0xf13   : > { %p2215_p3 = scmp.lt.u32.totalorder %s2213_s16, %s2209_s20  ;;  %p2217_p2 = scmp.lt.u32.totalorder %s2209_s20, %s2793_s18 }
 0xf14   : > { %p2211_p13 = pnand %p2210_p10, %p2930_p11 }
 0xf15   : > { %p2216_p5 = por %p2215_p3, %p2214_p7 }
 0xf16   : > { %p2212_p6 = pneg %p2211_p13 }
 0xf17   : > { %p2218_p1 = por %p2217_p2, %p2216_p5 }
 0xf19   : > { %p2219_p4 = pnand %p2218_p1, %p2212_p6 }
 0xf1b   : > { %2222 = shalt.err (!%p2219_p4)
}
 0xf1c   : > { %1978 = dma.vmem_to_hbm [thread:$0]  (%p2930_p11), %s1625_s11, 128, %s2793_s18, %s1611_s24  }
 0xf1d PF: > { %s2931_s26 = sld [smem:[#allocation16_spill]]  ;;  %s2932_s21 = sld [smem:[#allocation13_spill]] }
 0xf1e   : > { %s2933_s28 = sld [smem:[#allocation20_spill]] }
 0xf23   : > { %p1998_p9 = scmp.ge.s32.totalorder %s2931_s26, 2  ;;  %s1636_s0 = sand.u32 1, %s2932_s21  }
 0xf24   : > { %p2934_p0 = scmp.ne.s32.totalorder %s2933_s28, 0  ;;  %s1637_s27 = scalar_lea.sflag [#allocation5], %s1636_s0 }
 0xf26   : > { %p1991_p12 = pnand %p1998_p9, %p2934_p0 }
 0xf28   : > { %2264 = dma.done.wait (!%p1991_p12), %s1637_s27, 128  }
 0xf29   : > { %2266 = vsyncadd (!%p1991_p12), %s1637_s27, 4294967168  ;;  %s31_s28 = sadd.s32 1, %s2931_s26   ;;  %s2935_s24 = sld [smem:[#allocation14_spill]] }
 0xf2a   : > { %p28_p8 = scmp.ge.s32.totalorder %s31_s28, 6   ;;  %s2936_s25 = sld [smem:[#allocation15_spill]] }
 0xf2b   : > { %s2937_s26 = sld [smem:[#allocation17_spill]]  ;;  %s2938_s27 = sld [smem:[#allocation19_spill]] }
 0xf2c   : > { %s2939_s21 = smov %s2273_s22  ;;  %s2940_s22 = smov %s2277_s23 }
 0xf2d   : > { %s2941_s23 = smov %s2536_s1  ;;  %30 = sbr.rel (!%p28_p8) target bundleno = 16 (0x10), region = 159 }
 0xf34   :  { %1642 = vsyncpa [#allocation4], 1 }
 0xf35   :  { %1644 = vsyncpa [#allocation4 + $0x1], 1 }
 0xf36   :  { %1645 = vsyncpa [#allocation7], 1 }
 0xf37   :  { %1646 = vsyncpa [#allocation5], 1 }
 0xf38   :  { %1648 = vsyncpa [#allocation5 + $0x1], 1 }

// kernel: tpu_custom_call.1
= control target key start
LH: loop header
LB: loop body
LE: loop exit
PB: predicated region body
PF: predicated region fallthrough
CT: control target
= control target key end

     0   :  { %s2883_s0 = inlined_call_operand.hbm [shape: f32[2,8,32], index: 0, kind: input, shape index: {}]   ;;  %s2884_s1 = inlined_call_operand.hbm [shape: f32[1,8,32], index: 1, kind: input, shape index: {}]   ;;  %s2885_s2 = inlined_call_operand.vmem [shape: bf16[2,32,64], index: 2, kind: input, shape index: {}]   ;;  %s2886_s3 = inlined_call_operand.vmem [shape: f32[2,1,64], index: 3, kind: input, shape index: {}]   ;;  %s2887_s4 = inlined_call_operand.vmem [shape: bf16[2,32,32], index: 4, kind: input, shape index: {}]   ;;  %s2888_s5 = inlined_call_operand.vmem [shape: f32[2,1,32], index: 5, kind: input, shape index: {}]   ;;  %s2889_s6 = inlined_call_operand.vmem [shape: bf16[2,4,8,32], index: 6, kind: input, shape index: {}]   ;;  %s2890_s7 = inlined_call_operand.vmem [shape: f32[2,1,32], index: 7, kind: input, shape index: {}]   ;;  %s2891_s8 = inlined_call_operand.vmem [shape: f32[2,1,32], index: 8, kind: input, shape index: {}]   ;;  %s2892_s9 = inlined_call_operand.vmem [shape: f32[2,1,32], index: 9, kind: input, shape index: {}]   ;;  %s2893_s10 = inlined_call_operand.hbm [shape: bf16[2,32,64], index: 10, kind: input, shape index: {}]   ;;  %s2894_s11 = inlined_call_operand.vmem [shape: f32[2,1,64], index: 11, kind: input, shape index: {}]   ;;  %s2895_s12 = inlined_call_operand.vmem [shape: bf16[2,64,32], index: 12, kind: input, shape index: {}]   ;;  %s2896_s13 = inlined_call_operand.vmem [shape: f32[2,1,32], index: 13, kind: input, shape index: {}]   ;;  %s2897_s14 = inlined_call_operand.vmem [shape: f32[2,1,32], index: 14, kind: input, shape index: {}]   ;;  %s2898_s15 = inlined_call_operand.vmem [shape: f32[2,1,32], index: 15, kind: input, shape index: {}]   ;;  %s2899_s16 = inlined_call_operand.hbm [shape: f32[2,8,32], index: 16, kind: output, shape index: {}]  }
   0x1   :  { %2909 = sst [smem:[#allocation18_spill]] %s2883_s0 }
   0x2   :  { %2910 = sst [smem:[#allocation19_spill]] %s2884_s1 }
   0x3   :  { %2911 = sst [smem:[#allocation20_spill]] %s2892_s9 }
   0x4   :  { %2912 = sst [smem:[#allocation21_spill]] %s2893_s10 }
   0x5   :  { %2913 = sst [smem:[#allocation22_spill]] %s2894_s11 }
   0x6   :  { %2914 = sst [smem:[#allocation23_spill]] %s2895_s12 }
   0x7   :  { %2915 = sst [smem:[#allocation24_spill]] %s2896_s13 }
   0x8   :  { %2916 = sst [smem:[#allocation25_spill]] %s2897_s14 }
   0x9   :  { %2917 = sst [smem:[#allocation26_spill]] %s2898_s15 }
   0xa   :  { %2918 = sst [smem:[#allocation27_spill]] %s2899_s16 }
   0xb   :  { %21 = vsyncpa [#allocation4], 0 }
   0xc   :  { %23 = vsyncpa [#allocation4 + $0x1], 0 }
   0xd   :  { %24 = vsyncpa [#allocation7], 0 }
   0xe   :  { %25 = vsyncpa [#allocation5], 0 }
   0xf   :  { %27 = vsyncpa [#allocation5 + $0x1], 0  ;;  %s2429_s21 = smov 0   ;;  %s2431_s22 = smov 0  }
  0x10   :  { %s2433_s23 = smov 0   ;;  %s2435_s24 = smov 0  }
  0x11   :  { %s2437_s25 = smov 0   ;;  %s2439_s26 = smov 0  }
  0x12   :  { %s2441_s27 = smov 0   ;;  %s2443_s28 = smov 0  }
  0x13 LB: > { %2919 = sst [smem:[#allocation13_spill]] %s2299_s21  ;;  %s1772_s29 = sadd.s32 4294967295, %s2327_s28   ;;  %s2327_s28 = sphi %s2443_s28, %s33_s28   ;;  %s2323_s27 = sphi %s2441_s27, %s2960_s27   ;;  %s2319_s26 = sphi %s2439_s26, %s2959_s26   ;;  %s2315_s25 = sphi %s2437_s25, %s2958_s25   ;;  %s2311_s24 = sphi %s2435_s24, %s2957_s24   ;;  %s2307_s23 = sphi %s2433_s23, %s2956_s23   ;;  %s2303_s22 = sphi %s2431_s22, %s2955_s22   ;;  %s2299_s21 = sphi %s2429_s21, %s2954_s21  }
  0x14   : > { %2920 = sst [smem:[#allocation14_spill]] %s2315_s25  ;;  %s1773_s30 = sadd.s32 4294967294, %s2327_s28  }
  0x15   : > { %p65_p0 = scmp.ne.s32.totalorder %s2303_s22, %s2299_s21  ;;  %p2473_p1 = scmp.eq.s32.totalorder %s1772_s29, 0 }
  0x16   : > { %p2477_p2 = scmp.eq.s32.totalorder %s1772_s29, 3  ;;  %p410_p3 = scmp.eq.s32.totalorder %s1773_s30, 3 }
  0x17   : > { %s2921_s0 = scalar_select %p2473_p1, 1, 0 }
  0x18   : > { %s2922_s17 = scalar_select %p2477_p2, 1, 0 }
  0x19   : > { %p2483_p4 = por %p2473_p1, %p65_p0  ;;  %p1774_p5 = scmp.ge.s32.totalorder %s2327_s28, 1 }
  0x1a   : > { %p2488_p6 = por %p410_p3, %p65_p0  ;;  %p417_p7 = scmp.lt.s32.totalorder %s2327_s28, 5 }
  0x1b   : > { %s2923_s18 = scalar_select %p2483_p4, 1, 0 }
  0x1c   : > { %s2924_s19 = scalar_select %p2488_p6, 1, 0 }
  0x1d   : > { %p2493_p8 = pnand %p1774_p5, %p417_p7  ;;  %s2329_s29 = smov [#allocation6]  }
  0x1e   : > { %2925 = sst [smem:[#allocation15_spill]] %s2924_s19  ;;  %s430_s21 = sshll.u32 %s2329_s29, 4  ;;  %s431_s21 = int_to_ptr.vmem [resolvable:$true] %s430_s21 }
  0x1f   : > { %s2926_s20 = scalar_select %p2493_p8, 1, 0 }
  0x20   : > { %p2009_p9 = pneg %p2493_p8  ;;  %s2330_s30 = smov [#allocation8]  }
  0x21   : > { %s464_s16 = sshll.u32 %s2330_s30, 4  ;;  %s2928_s1 = sld [smem:[#allocation19_spill]]  ;;  %s2505_s16 = int_to_ptr.vmem [resolvable:$true] %s464_s16 }
  0x22   : > { %p2501_p10 = pnand %p2009_p9, %p2473_p1 }
  0x24   : > { %p2141_p12 = pneg %p2501_p10 }
  0x27   : > { %s2139_s14 = scalar_lea.hbm %s2928_s1, 128 }
  0x28   : > { %p2140_p11 = scmp.ne.s32.totalorder %s2928_s1, %s2139_s14  ;;  %p2146_p3 = scmp.lt.u32.totalorder %s2139_s14, %s2928_s1 }
  0x2a   : > { %p2142_p13 = pnand %p2141_p12, %p2140_p11 }
  0x2c   : > { %p2143_p0 = pneg %p2142_p13 }
  0x2e   : > { %p2148_p5 = pnand %p2146_p3, %p2143_p0 }
  0x30   : > { %2151 = shalt.err (!%p2148_p5)
}
  0x31   : > { %s2152_s12 = scalar_lea.vmem %s431_s21, 128  ;;  %p2160_p1 = scmp.lt.s32.totalorder %s431_s21, %s431_s21 }
  0x32   : > { %p2153_p7 = scmp.ne.s32.totalorder %s431_s21, %s2152_s12  ;;  %p2161_p4 = scmp.lt.s32.totalorder %s2152_s12, %s2152_s12 }
  0x34   : > { %p2155_p9 = pnand %p2153_p7, %p2141_p12  ;;  %p2162_p8 = por %p2161_p4, %p2160_p1 }
  0x36   : > { %p2156_p6 = pneg %p2155_p9 }
  0x38   : > { %p2163_p2 = pnand %p2162_p8, %p2156_p6 }
  0x3a   : > { %2166 = shalt.err (!%p2163_p2)
}
  0x3b   : > { %2012 = dma.hbm_to_vmem [thread:$0]  (!%p2501_p10), %s2928_s1, 128, %s431_s21, [#allocation7]  }
  0x3c   : > { %s2929_s10 = sld [smem:[#allocation21_spill]] }
  0x42   : > { %s2167_s19 = scalar_lea.hbm %s2929_s10, 512 }
  0x43   : > { %p2168_p11 = scmp.ne.s32.totalorder %s2929_s10, %s2167_s19  ;;  %p2174_p2 = scmp.lt.u32.totalorder %s2167_s19, %s2929_s10 }
  0x45   : > { %p2170_p1 = pnand %p2168_p11, %p2141_p12 }
  0x47   : > { %p2171_p4 = pneg %p2170_p1 }
  0x49   : > { %p2176_p6 = pnand %p2174_p2, %p2171_p4 }
  0x4b   : > { %2179 = shalt.err (!%p2176_p6)
}
  0x4c   : > { %s2180_s21 = scalar_lea.vmem %s2505_s16, 512  ;;  %p2188_p3 = scmp.lt.s32.totalorder %s2505_s16, %s2505_s16 }
  0x4d   : > { %p2181_p8 = scmp.ne.s32.totalorder %s2505_s16, %s2180_s21  ;;  %p2189_p5 = scmp.lt.s32.totalorder %s2180_s21, %s2180_s21 }
  0x4f   : > { %p2183_p13 = pnand %p2181_p8, %p2141_p12  ;;  %p2190_p7 = por %p2189_p5, %p2188_p3 }
  0x51   : > { %p2184_p0 = pneg %p2183_p13 }
  0x53   : > { %p2191_p9 = pnand %p2190_p7, %p2184_p0 }
  0x55   : > { %2194 = shalt.err (!%p2191_p9)
}
  0x56   : > { %s2331_s9 = smov 64   ;;  %s2332_s13 = smov 4  }
  0x57   : > { %2015 = dma.hbm_to_vmem [thread:$0]  (!%p2501_p10), %s2929_s10, 512, %s2505_s16, [#allocation7], %s2331_s9, %s2331_s9, %s2332_s13  }
  0x58   : > { %s42_s14 = sadd.s32 1, %s2319_s26  ;;  %s45_s19 = sadd.s32 1, %s2323_s27 }
  0x59   : > { %p43_p12 = scmp.ge.s32.totalorder %s42_s14, 2  ;;  %s52_s29 = sadd.s32 1, %s2307_s23 }
  0x5a   : > { %p59_p11 = scmp.ne.s32.totalorder %s2307_s23, %s2303_s22  ;;  %p60_p1 = scmp.eq.s32.totalorder %s2327_s28, 0 }
  0x5b   : > { %s2962_s14 = smov (%p43_p12, %s42_s14), 0  ;;  %s2964_s19 = smov (!%p43_p12, %s45_s19), %s2323_s27 }
  0x5c   : > { %2930 = sst [smem:[#allocation16_spill]] %s2962_s14  ;;  %p2563_p4 = por %p60_p1, %p59_p11 }
  0x5d   : > { %p2932_p2 = scmp.ne.s32.totalorder %s2922_s17, 0  ;;  %p47_p10 = scmp.ge.s32.totalorder %s2964_s19, 2 }
  0x5e   : > { %p2026_p8 = scmp.lt.s32.totalorder %s2327_s28, 4  ;;  %s493_s16 = sand.u32 1, %s2307_s23  }
  0x5f   : > { %p2569_p6 = por %p2932_p2, %p59_p11  ;;  %s1779_s12 = sshll.u32 %s2323_s27, 7 }
  0x60   : > { %s2966_s19 = smov (%p47_p10, %s2964_s19), 0  ;;  %s1778_s21 = sshll.u32 %s493_s16, 3 }
  0x61   : > { %2934 = sst [smem:[#allocation17_spill]] %s2966_s19  ;;  %s49_s9 = ssub.s32 %s2323_s27, %s2966_s19 }
  0x62   : > { %p50_p13 = scmp.eq.s32.totalorder %s49_s9, 0  ;;  %s2935_s11 = sld [smem:[#allocation18_spill]] }
  0x63   : > { %s497_s17 = scalar_lea.vmem [#allocation3], %s1778_s21  ;;  %p2587_p0 = pnand %p2026_p8, %p2563_p4 }
  0x64   : > { %s504_s10 = sshll.u32 %s497_s17, 4  ;;  %s494_s9 = scalar_lea.sflag [#allocation4], %s493_s16  ;;  %s2594_s10 = int_to_ptr.vmem [resolvable:$true] %s504_s10 }
  0x65   : > { %s2592_s19 = scalar_select %p50_p13, %s2307_s23, %s52_s29  }
  0x66   : > { %p2197_p5 = pneg %p2587_p0 }
  0x68   : > { %s2583_s1 = scalar_lea.hbm %s2935_s11, %s1779_s12  ;;  %s2200_s13 = scalar_lea.hbm %s2935_s11, 256 }
  0x69   : > { %s2195_s12 = scalar_lea.hbm %s2583_s1, 128  ;;  %p2201_p12 = scmp.lt.u32.totalorder %s2583_s1, %s2935_s11 }
  0x6a   : > { %p2196_p3 = scmp.ne.s32.totalorder %s2583_s1, %s2195_s12  ;;  %p2202_p11 = scmp.lt.u32.totalorder %s2200_s13, %s2195_s12 }
  0x6b   : > { %p2204_p4 = scmp.lt.u32.totalorder %s2195_s12, %s2583_s1 }
  0x6c   : > { %p2198_p7 = pnand %p2197_p5, %p2196_p3  ;;  %p2203_p1 = por %p2202_p11, %p2201_p12 }
  0x6e   : > { %p2199_p9 = pneg %p2198_p7  ;;  %p2205_p2 = por %p2204_p4, %p2203_p1 }
  0x70   : > { %p2206_p10 = pnand %p2205_p2, %p2199_p9 }
  0x72   : > { %2209 = shalt.err (!%p2206_p10)
}
  0x73   : > { %s2210_s29 = scalar_lea.vmem %s2594_s10, 128  ;;  %s2333_s16 = smov [#allocation3]  }
  0x74   : > { %p2211_p8 = scmp.ne.s32.totalorder %s2594_s10, %s2210_s29  ;;  %s2215_s30 = sshll.u32 %s2333_s16, 4  ;;  %s2216_s30 = int_to_ptr.vmem [resolvable:$false] %s2215_s30 }
  0x75   : > { %s2217_s21 = scalar_lea.vmem %s2216_s30, 256  ;;  %p2218_p7 = scmp.lt.s32.totalorder %s2594_s10, %s2216_s30 }
  0x76   : > { %p2213_p13 = pnand %p2211_p8, %p2197_p5  ;;  %p2219_p12 = scmp.lt.s32.totalorder %s2217_s21, %s2210_s29 }
  0x78   : > { %p2214_p3 = pneg %p2213_p13  ;;  %p2220_p11 = por %p2219_p12, %p2218_p7 }
  0x7a   : > { %p2221_p1 = pnand %p2220_p11, %p2214_p3 }
  0x7c   : > { %2224 = shalt.err (!%p2221_p1)
}
  0x7d   : > { %2019 = dma.hbm_to_vmem [thread:$0]  (!%p2587_p0), %s2583_s1, 128, %s2594_s10, %s494_s9  }
  0x7e   : > { %p2937_p9 = scmp.ne.s32.totalorder %s2926_s20, 0 }
  0x7f   : > { %s2624_s12 = sand.u32 (!%p2937_p9), 1, %s2303_s22   ;;  %p2938_p5 = scmp.ne.s32.totalorder (!%p2937_p9), %s2923_s18, 0 }
  0x80   : > { %513 = sbr.rel (%p2937_p9) target bundleno = 3873 (0xf21), region = 84  ;;  %s1781_s13 = sshll.u32 (!%p2937_p9), %s2624_s12, 3 }
  0x81   : > { %s516_s15 = scalar_lea.sflag (!%p2937_p9), [#allocation4], %s2624_s12  ;;  %s519_s17 = scalar_lea.vmem (!%p2937_p9), [#allocation3], %s1781_s13 }
  0x87   : > { %2286 = dma.done.wait (%p2938_p5), %s516_s15, 128  }
  0x88   : > { %2288 = vsyncadd (%p2938_p5), %s516_s15, 4294967168  ;;  %p2939_p4 = scmp.ne.s32.totalorder %s2921_s0, 0 }
  0x8a   : > { %2290 = dma.done.wait (%p2939_p4), [#allocation7], 640  }
  0x8b   : > { %2292 = vsyncadd (%p2939_p4), [#allocation7], 4294966656  ;;  %s2636_s1 = scalar_lea.vmem [#allocation9], %s1781_s13  ;;  %p1785_p0 = scmp.ne.s32.totalorder %s2311_s24, 0 }
  0x8c   : > { %v581_v0 = vld [vmem:[%s519_s17] sm:$0xff] (!%p1785_p0)  ;;  %vm582_vm0 = vcmask (!%p1785_p0), 261120  }
  0x8d   : > { %580 = sbr.rel (%p1785_p0) target bundleno = 148 (0x94), region = 100  ;;  %583 = vst.msk [vmem:[#allocation2] sm:$0xff] (!%p1785_p0), %vm582_vm0, %v581_v0 }
  0x94 PF: > { %s2640_s10 = sshll.u32 %s2311_s24, 4  ;;  %v2642_v1 = vld [vmem:[#allocation2] sm:$0xff]  ;;  %v585_v2 = vld [vmem:[#allocation6] sm:$0xff]  ;;  %v2334_v3 = vmov 0.0   ;;  %vm2335_vm1 = vmmov 0   ;;  %vm615_vm2 = vcmask 261120   ;;  %s595_s29 = scalar_lea.vmem %s2886_s3, %s2311_s24 }
  0x95   : > { %1889 = vmatprep.subr.bf16.mxu0 %v2334_v3  ;;  %s590_s20 = scalar_lea.vmem %s2885_s2, %s2640_s10  ;;  %1893 = vmatprep.mubr.msk.bf16.mxu0 %vm2335_vm1, %v2334_v3  ;;  %v586_v5 = vadd.f32 %v585_v2, %v2642_v1  ;;  %v1788_v8 = vld [vmem:[%s595_s29] ss:$0 sm:$0xff]  ;;  %s2336_s16 = smov 120   ;;  %v659_v17 = vpack.c.bf16 %v2642_v1, %v2642_v1  ;;  %vm734_vm3 = vcmask 64512   ;;  %vm796_vm4 = vcmask 1043456  }
  0x96   : > { %v2107_v4 = vld [vmem:[%s590_s20] sm:$0xff]   ;;  %1897 = vmatprep.subr.bf16.mxu1 %v2334_v3  ;;  %1901 = vmatprep.mubr.msk.bf16.mxu1 %vm2335_vm1, %v2334_v3  ;;  %v2108_v6 = vld [vmem:[%s590_s20 + $0x8] sm:$0xff]   ;;  %s2337_s30 = smov 96   ;;  %s661_s15 = scalar_lea.vmem %s2887_s4, %s2640_s10  ;;  %vm1541_vm5 = vcmask 523264  }
  0x97   : > { %1890 = vmatpush3.bf16.msra.mxu0 %v2107_v4  ;;  %v587_v7 = vpack.c.bf16 %v586_v5, %v586_v5  ;;  %s2338_s17 = smov 88   ;;  %v2109_v15 = vld [vmem:[%s661_s15] sm:$0xff]   ;;  %v2110_v16 = vld [vmem:[%s661_s15 + $0x8] sm:$0xff]   ;;  %s666_s20 = scalar_lea.vmem %s2888_s5, %s2311_s24 }
  0x98   : > { %1891 = vmatprep.subr.bf16.mxu0 %v2334_v3  ;;  %1898 = vmatpush3.bf16.msra.mxu1 %v2109_v15  ;;  %v1793_v34 = vld [vmem:[%s666_s20] ss:$0 sm:$0xff]  ;;  %s2339_s14 = smov 80   ;;  %s2340_s9 = smov 112  }
  0x99   : > { %1899 = vmatprep.subr.bf16.mxu1 %v2334_v3  ;;  %s2341_s21 = smov 104   ;;  %s2342_s13 = smov 72  }
  0x9a   : > { %s1376_s0 = scalar_lea.vmem %s2890_s7, %s2311_s24  ;;  %s1420_s18 = scalar_lea.vmem [#allocation8], %s2640_s10 }
  0x9b   : > { %1892 = vmatpush3.bf16.msra.mxu0 %v2108_v6  ;;  %s2944_s15 = sld [smem:[#allocation25_spill]]  ;;  %s2945_s20 = sld [smem:[#allocation26_spill]] }
  0x9c   : > { %1905 = vmatprep.subr.bf16.mxu0 %v2334_v3  ;;  %1900 = vmatpush3.bf16.msra.mxu1 %v2110_v16  ;;  %p1837_p2 = scmp.ge.s32.totalorder %s2311_s24, 1 }
  0x9d   : > { %1911 = vmatprep.subr.bf16.mxu1 %v2334_v3 }
  0x9e   : > { %1894 = vmatmul.mubr.msk.bf16.vlgmr.msra.gmra.mrb[0].mxu0 %vm615_vm2, %v587_v7 }
  0x9f   : > { %1907 = vmatprep.mubr.msk.bf16.mxu0 %vm2335_vm1, %v2334_v3  ;;  %1902 = vmatmul.mubr.msk.bf16.vlgmr.msra.gmra.mrb[0].mxu1 %vm615_vm2, %v659_v17 }
  0xa0   : > { %1913 = vmatprep.mubr.msk.bf16.mxu1 %vm2335_vm1, %v2334_v3 }
 0x171   : > { %v653_v9 = vpop.f32.mrb[0].mxu0 }
 0x172   : > { %v654_v10 = vadd.f32 %v1788_v8, %v653_v9  ;;  %v1895_v11 = vpop.f32.mrb[1].mxu0  ;;  %v723_v33 = vpop.f32.mrb[0].mxu1 }
 0x173   : > { %v656_v12 = vpop.f32.mrb[2].mxu0  ;;  %v1903_v35 = vpop.f32.mrb[1].mxu1  ;;  %v724_v36 = vadd.f32 %v1793_v34, %v723_v33 }
 0x174   : > { %v2664_v13 = vpack.c.bf16 %v654_v10, %v654_v10  ;;  %v1896_v14 = vpop.f32.mrb[3].mxu0  ;;  %v726_v37 = vpop.f32.mrb[2].mxu1 }
 0x175   : > { %v1904_v38 = vpop.f32.mrb[3].mxu1  ;;  %v2698_v39 = vpack.c.bf16 %v724_v36, %v724_v36 }
 0x176   : > { %844 = vrot.lane.b32.xlu1 %v2664_v13, %s2336_s16  ;;  %732 = vrot.lane.b32.xlu0 %v2664_v13, %s2337_s30  ;;  %s2722_s30 = scalar_lea.vmem %s2889_s6, %s2640_s10  ;;  %s1850_s10 = sshll.u32 %s2311_s24, 5 }
 0x177   : > { %v798_v40 = vsel %vm796_vm4, %v2698_v39, 0  ;;  %v843_v61 = vld [vmem:[%s2722_s30] sm:$0xf]  ;;  %v1804_v63 = vld [vmem:[%s2722_s30 + $0x4] sm:$0xf] }
 0x178   : > { %1912 = vmatpush3.bf16.msra.mxu1 %v798_v40  ;;  %v1010_v62 = vsel %vm796_vm4, %v843_v61, 0  ;;  %v964_v0 = vsel %vm796_vm4, %v1804_v63, 0 }
 0x179   : > { %1923 = vmatprep.subr.bf16.mxu1 %v2334_v3 }
 0x17a   : > { %846 = vrot.lane.b32.xlu0 %v2664_v13, %s2338_s17  ;;  %s2941_s17 = sld [smem:[#allocation23_spill]] }
 0x1e8   : > { %v733_v18 = vpop.permute.xlu0 %732  ;;  %v845_v22 = vpop.permute.xlu1 %844 }
 0x1e9   : > { %v739_v19 = vsel %vm734_vm3, %v733_v18, 0 }
 0x1ea   : > { %1906 = vmatpush3.bf16.xpose.msra.mxu0 %v739_v19 }
 0x1eb   : > { %1917 = vmatprep.subr.bf16.mxu0 %v2334_v3 }
 0x1ec   : > { %v847_v20 = vpop.permute.xlu0 %846 }
 0x1ed   : > { %v852_v21 = vsel %vm734_vm3, %v847_v20, 0 }
 0x1f1   : > { %1908 = vmatmul.mubr.msk.bf16.vlgmr.msra.gmra.mrb[4].mxu0 %vm734_vm3, %v2664_v13 }
 0x1f2   : > { %1918 = vmatpush3.bf16.xpose.msra.mxu0 %v852_v21  ;;  %1919 = vmatprep.mubr.msk.bf16.mxu0 %vm2335_vm1, %v2334_v3 }
 0x1f3   : > { %1929 = vmatprep.subr.bf16.mxu0 %v2334_v3 }
 0x1f9   : > { %1920 = vmatmul.mubr.msk.bf16.vlgmr.msra.gmra.mrb[8].mxu0 %vm734_vm3, %v845_v22 }
 0x1fa   : > { %1931 = vmatprep.mubr.msk.bf16.mxu0 %vm2335_vm1, %v2334_v3  ;;  %1930 = vmatpush3.bf16.msra.mxu0 %v964_v0 }
 0x1fb   : > { %1941 = vmatprep.subr.bf16.mxu0 %v2334_v3 }
 0x2c4   : > { %v775_v23 = vpop.f32.mrb[4].mxu0 }
 0x2c5   : > { %v1909_v24 = vpop.f32.mrb[5].mxu0  ;;  %v781_v25 = vsel %vm734_vm3, %v775_v23, -inf }
 0x2c6   : > { %782 = vmax.xlane.f32.xlu1 %v781_v25  ;;  %v778_v26 = vpop.f32.mrb[6].mxu0 }
 0x2c7   : > { %v1910_v27 = vpop.f32.mrb[7].mxu0 }
 0x2cc   : > { %v888_v28 = vpop.f32.mrb[8].mxu0 }
 0x2cd   : > { %v1921_v29 = vpop.f32.mrb[9].mxu0  ;;  %v894_v30 = vsel %vm734_vm3, %v888_v28, -inf }
 0x2ce   : > { %895 = vmax.xlane.f32.xlu0 %v894_v30  ;;  %v891_v31 = vpop.f32.mrb[10].mxu0 }
 0x2cf   : > { %v1922_v32 = vpop.f32.mrb[11].mxu0 }
 0x353   : > { %v783_v41 = vpop.xlane.xlu1 %782 }
 0x354   : > { %v784_v42 = vsub.f32 %v775_v23, %v783_v41 }
 0x356   : > { %v785_v43 = vmul.f32 1.442695, %v784_v42 }
 0x358   : > { %2117 = vpow2.f32 %v785_v43 }
 0x35b   : > { %v896_v44 = vpop.xlane.xlu0 %895 }
 0x35c   : > { %v897_v45 = vsub.f32 %v888_v28, %v896_v44 }
 0x35e   : > { %v898_v46 = vmul.f32 1.442695, %v897_v45 }
 0x360   : > { %2119 = vpow2.f32 %v898_v46 }
 0x362   : > { %v2118_v47 = vpop.eup %2117 }
 0x363   : > { %v787_v48 = vsel %vm734_vm3, %v2118_v47, 0.0 }
 0x364   : > { %788 = vadd.xlane.f32.xlu0 %v787_v48 }
 0x36a   : > { %v2120_v49 = vpop.eup %2119 }
 0x36b   : > { %v900_v50 = vsel %vm734_vm3, %v2120_v49, 0.0 }
 0x36c   : > { %901 = vadd.xlane.f32.xlu1 %v900_v50 }
 0x37a   : > { %907 = vrot.lane.b32.xlu0 %v2698_v39, %s2336_s16 }
 0x37d   : > { %1054 = vrot.lane.b32.xlu1 %v2664_v13, %s2339_s14  ;;  %s2942_s14 = sld [smem:[#allocation22_spill]] }
 0x381   : > { %1052 = vrot.lane.b32.xlu1 %v2664_v13, %s2340_s9 }
 0x3f1   : > { %v789_v51 = vpop.xlane.xlu0 %788 }
 0x3f2   : > { %2121 = vrcp.f32 %v789_v51 }
 0x3f5   : > { %v908_v54 = vpop.permute.xlu0 %907 }
 0x3f6   : > { %v913_v56 = vsel %vm796_vm4, %v908_v54, 0 }
 0x3f9   : > { %v902_v52 = vpop.xlane.xlu1 %901 }
 0x3fa   : > { %2123 = vrcp.f32 %v902_v52 }
 0x3fc   : > { %v2122_v53 = vpop.eup %2121 }
 0x3fd   : > { %v791_v55 = vmul.f32 %v2122_v53, %v2118_v47  ;;  %v1055_v8 = vpop.permute.xlu1 %1054 }
 0x3fe   : > { %v1060_v14 = vsel %vm734_vm3, %v1055_v8, 0 }
 0x3ff   : > { %v792_v57 = vpack.c.bf16 %v791_v55, %v791_v55 }
 0x401   : > { %1914 = vmatmul.mubr.msk.bf16.vlgmr.msra.gmra.mrb[4].mxu1 %vm734_vm3, %v792_v57  ;;  %v1053_v16 = vpop.permute.xlu1 %1052 }
 0x402   : > { %1924 = vmatpush3.bf16.msra.mxu1 %v913_v56  ;;  %1925 = vmatprep.mubr.msk.bf16.mxu1 %vm2335_vm1, %v2334_v3 }
 0x403   : > { %1935 = vmatprep.subr.bf16.mxu1 %v2334_v3 }
 0x404   : > { %v2124_v58 = vpop.eup %2123 }
 0x405   : > { %v904_v59 = vmul.f32 %v2124_v58, %v2120_v49 }
 0x407   : > { %v905_v60 = vpack.c.bf16 %v904_v59, %v904_v59 }
 0x409   : > { %1926 = vmatmul.mubr.msk.bf16.vlgmr.msra.gmra.mrb[8].mxu1 %vm734_vm3, %v905_v60 }
 0x40a   : > { %1937 = vmatprep.mubr.msk.bf16.mxu1 %vm2335_vm1, %v2334_v3  ;;  %1936 = vmatpush3.bf16.msra.mxu1 %v1010_v62  ;;  %v1817_v62 = vld [vmem:[%s2722_s30 + $0xc] sm:$0xf] }
 0x40b   : > { %1947 = vmatprep.subr.bf16.mxu1 %v2334_v3  ;;  %v1333_v63 = vsel %vm796_vm4, %v1817_v62, 0 }
 0x4d4   : > { %v834_v2 = vpop.f32.mrb[4].mxu1 }
 0x4d5   : > { %v840_v4 = vpack.c.bf16 %v834_v2, %v834_v2  ;;  %v1915_v5 = vpop.f32.mrb[5].mxu1 }
 0x4d6   : > { %v837_v6 = vpop.f32.mrb[6].mxu1 }
 0x4d7   : > { %v1916_v7 = vpop.f32.mrb[7].mxu1  ;;  %1938 = vmatmul.mubr.msk.bf16.vlgmr.msra.gmra.mrb[12].mxu1 %vm734_vm3, %v840_v4 }
 0x4d8   : > { %1949 = vmatprep.mubr.msk.bf16.mxu1 %vm2335_vm1, %v2334_v3 }
 0x4dc   : > { %v949_v9 = vpop.f32.mrb[8].mxu1 }
 0x4dd   : > { %v955_v10 = vpack.c.bf16 %v949_v9, %v949_v9  ;;  %v1927_v11 = vpop.f32.mrb[9].mxu1 }
 0x4de   : > { %v952_v12 = vpop.f32.mrb[10].mxu1 }
 0x4df   : > { %v1928_v15 = vpop.f32.mrb[11].mxu1  ;;  %1932 = vmatmul.mubr.msk.bf16.vlgmr.msra.gmra.mrb[12].mxu0 %vm734_vm3, %v955_v10 }
 0x4e0   : > { %1942 = vmatpush3.bf16.xpose.msra.mxu0 %v1060_v14  ;;  %1943 = vmatprep.mubr.msk.bf16.mxu0 %vm2335_vm1, %v2334_v3 }
 0x4e1   : > { %1953 = vmatprep.subr.bf16.mxu0 %v2334_v3 }
 0x4e7   : > { %1944 = vmatmul.mubr.msk.bf16.vlgmr.msra.gmra.mrb[16].mxu0 %vm734_vm3, %v1053_v16 }
 0x4e8   : > { %1955 = vmatprep.mubr.msk.bf16.mxu0 %vm2335_vm1, %v2334_v3 }
 0x5aa   : > { %v1046_v17 = vpop.f32.mrb[12].mxu1 }
 0x5ab   : > { %v1939_v18 = vpop.f32.mrb[13].mxu1 }
 0x5ac   : > { %v1049_v19 = vpop.f32.mrb[14].mxu1 }
 0x5ad   : > { %v1940_v20 = vpop.f32.mrb[15].mxu1  ;;  %v1819_v19 = vld [vmem:[%s1376_s0] ss:$0 sm:$0xff]  ;;  %s1500_s0 = scalar_lea.vmem %s2941_s17, %s1850_s10  ;;  %s1599_s17 = scalar_lea.vmem %s2944_s15, %s2311_s24 }
 0x5b2   : > { %v1000_v21 = vpop.f32.mrb[12].mxu0 }
 0x5b3   : > { %v2741_v22 = vadd.f32 %v1046_v17, %v1000_v21  ;;  %v1933_v23 = vpop.f32.mrb[13].mxu0 }
 0x5b4   : > { %v1003_v24 = vpop.f32.mrb[14].mxu0 }
 0x5b5   : > { %v1934_v25 = vpop.f32.mrb[15].mxu0 }
 0x5ba   : > { %v1096_v26 = vpop.f32.mrb[16].mxu0 }
 0x5bb   : > { %v1945_v27 = vpop.f32.mrb[17].mxu0  ;;  %v1102_v28 = vsel %vm734_vm3, %v1096_v26, -inf }
 0x5bc   : > { %1103 = vmax.xlane.f32.xlu0 %v1102_v28  ;;  %v1099_v29 = vpop.f32.mrb[18].mxu0 }
 0x5bd   : > { %v1946_v30 = vpop.f32.mrb[19].mxu0 }
 0x5d2   : > { %1114 = vrot.lane.b32.xlu0 %v2698_v39, %s2340_s9  ;;  %s1400_s9 = scalar_lea.vmem %s2891_s8, %s2311_s24 }
 0x5d6   : > { %1214 = vrot.lane.b32.xlu0 %v2664_v13, %s2341_s21 }
 0x649   : > { %v1104_v31 = vpop.xlane.xlu0 %1103 }
 0x64a   : > { %v1105_v32 = vsub.f32 %v1096_v26, %v1104_v31 }
 0x64c   : > { %v1106_v33 = vmul.f32 1.442695, %v1105_v32  ;;  %v2111_v32 = vld [vmem:[%s1420_s18] sm:$0xff]  }
 0x64d   : > { %v1115_v34 = vpop.permute.xlu0 %1114 }
 0x64e   : > { %2125 = vpow2.f32 %v1106_v33  ;;  %v1120_v35 = vsel %vm796_vm4, %v1115_v34, 0  ;;  %v2112_v33 = vld [vmem:[%s1420_s18 + $0x8] sm:$0xff]  }
 0x64f   : > { %1948 = vmatpush3.bf16.msra.mxu1 %v1120_v35 }
 0x650   : > { %1959 = vmatprep.subr.bf16.mxu1 %v2334_v3 }
 0x651   : > { %v1215_v45 = vpop.permute.xlu0 %1214 }
 0x658   : > { %v2126_v36 = vpop.eup %2125 }
 0x659   : > { %v1108_v37 = vsel %vm734_vm3, %v2126_v36, 0.0 }
 0x65a   : > { %1109 = vadd.xlane.f32.xlu1 %v1108_v37  ;;  %v1820_v37 = vld [vmem:[%s1400_s9] ss:$0 sm:$0xff]  ;;  %s1425_s9 = scalar_lea.vmem %s2942_s14, %s2311_s24  ;;  %s1608_s14 = scalar_lea.vmem %s2945_s20, %s2311_s24 }
 0x66b   : > { %1216 = vrot.lane.b32.xlu1 %v2664_v13, %s2342_s13  ;;  %v1811_v13 = vld [vmem:[%s2722_s30 + $0x8] sm:$0xf]  ;;  %s2940_s30 = sld [smem:[#allocation20_spill]] }
 0x66c   : > { %v1171_v46 = vsel %vm796_vm4, %v1811_v13, 0  ;;  %v2115_v13 = vld [vmem:[%s1500_s0 + $0x10] sm:$0xff]  }
 0x66d   : > { %1954 = vmatpush3.bf16.msra.mxu0 %v1171_v46  ;;  %v2116_v46 = vld [vmem:[%s1500_s0 + $0x18] sm:$0xff]  }
 0x66e   : > { %1965 = vmatprep.subr.bf16.mxu0 %v2334_v3 }
 0x6e7   : > { %v1110_v38 = vpop.xlane.xlu1 %1109 }
 0x6e8   : > { %2127 = vrcp.f32 %v1110_v38 }
 0x6eb   : > { %v1217_v42 = vpop.permute.xlu1 %1216 }
 0x6ec   : > { %v1222_v44 = vsel %vm734_vm3, %v1217_v42, 0 }
 0x6f2   : > { %v2128_v40 = vpop.eup %2127 }
 0x6f3   : > { %v1112_v41 = vmul.f32 %v2128_v40, %v2126_v36 }
 0x6f5   : > { %v1113_v43 = vpack.c.bf16 %v1112_v41, %v1112_v41 }
 0x6f7   : > { %1950 = vmatmul.mubr.msk.bf16.vlgmr.msra.gmra.mrb[16].mxu1 %vm734_vm3, %v1113_v43 }
 0x6f8   : > { %1960 = vmatpush3.bf16.xpose.msra.mxu1 %v1222_v44  ;;  %1961 = vmatprep.mubr.msk.bf16.mxu1 %vm2335_vm1, %v2334_v3  ;;  %v2113_v44 = vld [vmem:[%s1500_s0] sm:$0xff]  }
 0x6f9   : > { %1971 = vmatprep.subr.bf16.mxu1 %v2334_v3 }
 0x6ff   : > { %1962 = vmatmul.mubr.msk.bf16.vlgmr.msra.gmra.mrb[20].mxu1 %vm734_vm3, %v1215_v45  ;;  %v2114_v45 = vld [vmem:[%s1500_s0 + $0x8] sm:$0xff]  }
 0x700   : > { %1973 = vmatprep.mubr.msk.bf16.mxu1 %vm2335_vm1, %v2334_v3  ;;  %1972 = vmatpush3.bf16.msra.mxu1 %v1333_v63 }
 0x701   : > { %1985 = vmatprep.subr.bf16.mxu1 %v2334_v3 }
 0x7ca   : > { %v1156_v47 = vpop.f32.mrb[16].mxu1 }
 0x7cb   : > { %v1162_v48 = vpack.c.bf16 %v1156_v47, %v1156_v47  ;;  %v1951_v49 = vpop.f32.mrb[17].mxu1  ;;  %v1823_v47 = vld [vmem:[%s1425_s9] ss:$0 sm:$0xff] }
 0x7cc   : > { %v1159_v50 = vpop.f32.mrb[18].mxu1 }
 0x7cd   : > { %v1952_v51 = vpop.f32.mrb[19].mxu1  ;;  %1956 = vmatmul.mubr.msk.bf16.vlgmr.msra.gmra.mrb[20].mxu0 %vm734_vm3, %v1162_v48 }
 0x7ce   : > { %1967 = vmatprep.mubr.msk.bf16.mxu0 %vm2335_vm1, %v2334_v3 }
 0x7d2   : > { %v1258_v52 = vpop.f32.mrb[20].mxu1 }
 0x7d3   : > { %v1963_v53 = vpop.f32.mrb[21].mxu1  ;;  %v1264_v54 = vsel %vm734_vm3, %v1258_v52, -inf }
 0x7d4   : > { %1265 = vmax.xlane.f32.xlu1 %v1264_v54  ;;  %v1261_v55 = vpop.f32.mrb[22].mxu1 }
 0x7d5   : > { %v1964_v56 = vpop.f32.mrb[23].mxu1 }
 0x861   : > { %v1266_v57 = vpop.xlane.xlu1 %1265 }
 0x862   : > { %v1267_v58 = vsub.f32 %v1258_v52, %v1266_v57 }
 0x864   : > { %v1268_v59 = vmul.f32 1.442695, %v1267_v58 }
 0x866   : > { %2129 = vpow2.f32 %v1268_v59 }
 0x870   : > { %v2130_v60 = vpop.eup %2129 }
 0x871   : > { %v1270_v61 = vsel %vm734_vm3, %v2130_v60, 0.0 }
 0x872   : > { %1271 = vadd.xlane.f32.xlu0 %v1270_v61 }
 0x888   : > { %1276 = vrot.lane.b32.xlu0 %v2698_v39, %s2341_s21  ;;  %s1409_s21 = scalar_lea.vmem %s2940_s30, %s2311_s24  ;;  %s2943_s30 = sld [smem:[#allocation24_spill]] }
 0x889   : > { %v1821_v40 = vld [vmem:[%s1409_s21] ss:$0 sm:$0xff] }
 0x88e   : > { %s1509_s21 = scalar_lea.vmem %s2943_s30, %s2311_s24 }
 0x88f   : > { %v1829_v62 = vld [vmem:[%s1509_s21] ss:$0 sm:$0xff] }
 0x8a0   : > { %v1207_v0 = vpop.f32.mrb[20].mxu0 }
 0x8a1   : > { %v1213_v2 = vadd.f32 %v1207_v0, %v2741_v22  ;;  %v1957_v4 = vpop.f32.mrb[21].mxu0 }
 0x8a2   : > { %v1210_v5 = vpop.f32.mrb[22].mxu0 }
 0x8a3   : > { %v1958_v6 = vpop.f32.mrb[23].mxu0 }
 0x8ff   : > { %v1272_v7 = vpop.xlane.xlu0 %1271 }
 0x900   : > { %2131 = vrcp.f32 %v1272_v7 }
 0x903   : > { %v1277_v8 = vpop.permute.xlu0 %1276 }
 0x904   : > { %v1282_v9 = vsel %vm796_vm4, %v1277_v8, 0 }
 0x905   : > { %1966 = vmatpush3.bf16.msra.mxu0 %v1282_v9 }
 0x906   : > { %1977 = vmatprep.subr.bf16.mxu0 %v2334_v3 }
 0x90a   : > { %v2132_v39 = vpop.eup %2131 }
 0x90b   : > { %v1274_v10 = vmul.f32 %v2132_v39, %v2130_v60 }
 0x90d   : > { %v1275_v11 = vpack.c.bf16 %v1274_v10, %v1274_v10 }
 0x90f   : > { %1968 = vmatmul.mubr.msk.bf16.vlgmr.msra.gmra.mrb[24].mxu0 %vm734_vm3, %v1275_v11 }
 0x910   : > { %1981 = vmatprep.mubr.msk.bf16.mxu0 %vm2335_vm1, %v2334_v3  ;;  %1978 = vmatpush3.bf16.msra.mxu0 %v2111_v32 }
 0x911   : > { %1979 = vmatprep.subr.bf16.mxu0 %v2334_v3 }
 0x914   : > { %1980 = vmatpush3.bf16.msra.mxu0 %v2112_v33 }
 0x9e2   : > { %v1318_v12 = vpop.f32.mrb[24].mxu0 }
 0x9e3   : > { %v1324_v14 = vpack.c.bf16 %v1318_v12, %v1318_v12  ;;  %v1969_v15 = vpop.f32.mrb[25].mxu0 }
 0x9e4   : > { %v1321_v16 = vpop.f32.mrb[26].mxu0 }
 0x9e5   : > { %v1970_v17 = vpop.f32.mrb[27].mxu0  ;;  %1974 = vmatmul.mubr.msk.bf16.vlgmr.msra.gmra.mrb[24].mxu1 %vm734_vm3, %v1324_v14 }
 0x9e6   : > { %1993 = vmatprep.mubr.msk.bf16.mxu1 %vm2335_vm1, %v2334_v3  ;;  %1986 = vmatpush3.bf16.msra.mxu1 %v2113_v44  ;;  %v1835_v17 = vld [vmem:[%s1599_s17] ss:$0 sm:$0xff] }
 0x9e7   : > { %1987 = vmatprep.subr.bf16.mxu1 %v2334_v3 }
 0x9ea   : > { %1988 = vmatpush3.bf16.msra.mxu1 %v2114_v45 }
 0x9eb   : > { %1989 = vmatprep.subr.bf16.mxu1 %v2334_v3 }
 0x9ee   : > { %1990 = vmatpush3.bf16.msra.mxu1 %v2115_v13 }
 0x9ef   : > { %1991 = vmatprep.subr.bf16.mxu1 %v2334_v3 }
 0x9f2   : > { %1992 = vmatpush3.bf16.msra.mxu1 %v2116_v46 }
 0xab8   : > { %v1369_v18 = vpop.f32.mrb[24].mxu1 }
 0xab9   : > { %v1375_v20 = vadd.f32 %v1369_v18, %v1213_v2  ;;  %v1975_v21 = vpop.f32.mrb[25].mxu1 }
 0xaba   : > { %v1372_v22 = vpop.f32.mrb[26].mxu1 }
 0xabb   : > { %v1384_v23 = vadd.f32 %v1819_v19, %v1375_v20  ;;  %v1976_v24 = vpop.f32.mrb[27].mxu1  ;;  %v1836_v19 = vld [vmem:[%s1608_s14] ss:$0 sm:$0xff] }
 0xabd   : > { %v1385_v25 = vadd.f32 %v1384_v23, %v2642_v1 }
 0xabf   : > { %v1386_v26 = vsel %vm615_vm2, %v1385_v25, 0.0 }
 0xac0   : > { %1387 = vadd.xlane.f32.xlu1 %v1386_v26 }
 0xb4d   : > { %v1388_v27 = vpop.xlane.xlu1 %1387 }
 0xb4e   : > { %v1390_v28 = vmul.f32 0.03125, %v1388_v27 }
 0xb50   : > { %v1391_v29 = vsub.f32 %v1385_v25, %v1390_v28 }
 0xb52   : > { %v1392_v30 = vmul.f32 %v1391_v29, %v1391_v29 }
 0xb54   : > { %v1393_v31 = vsel %vm615_vm2, %v1392_v30, 0.0 }
 0xb55   : > { %1394 = vadd.xlane.f32.xlu1 %v1393_v31 }
 0xbe2   : > { %v1395_v1 = vpop.xlane.xlu1 %1394 }
 0xbe3   : > { %v1396_v34 = vmul.f32 0.03125, %v1395_v1 }
 0xbe5   : > { %v1397_v35 = vadd.f32 1e-05, %v1396_v34 }
 0xbe7   : > { %2133 = vrsqrt.f32 %v1397_v35 }
 0xbf1   : > { %v2134_v36 = vpop.eup %2133 }
 0xbf2   : > { %v1399_v38 = vmul.f32 %v2134_v36, %v1391_v29 }
 0xbf4   : > { %v1408_v41 = vmul.f32 %v1820_v37, %v1399_v38 }
 0xbf6   : > { %v1417_v42 = vadd.f32 %v1821_v40, %v1408_v41 }
 0xbf8   : > { %v1418_v43 = vpack.c.bf16 %v1417_v42, %v1417_v42 }
 0xbfa   : > { %1982 = vmatmul.mubr.msk.bf16.vlgmr.msra.gmra.mrb[28].mxu0 %vm615_vm2, %v1418_v43 }
 0xccd   : > { %v1482_v48 = vpop.f32.mrb[28].mxu0 }
 0xcce   : > { %v1483_v49 = vadd.f32 %v1823_v47, %v1482_v48  ;;  %v1983_v50 = vpop.f32.mrb[29].mxu0 }
 0xccf   : > { %v1485_v51 = vpop.f32.mrb[30].mxu0 }
 0xcd0   : > { %v1488_v52 = vmul.f32 %v1483_v49, %v1483_v49  ;;  %v1984_v53 = vpop.f32.mrb[31].mxu0 }
 0xcd2   : > { %v1489_v54 = vmul.f32 %v1488_v52, %v1483_v49 }
 0xcd4   : > { %v1490_v55 = vmul.f32 0.044715, %v1489_v54 }
 0xcd6   : > { %v1491_v56 = vadd.f32 %v1490_v55, %v1483_v49 }
 0xcd8   : > { %v1492_v57 = vmul.f32 0.7978846, %v1491_v56 }
 0xcda   : > { %2135 = vtanh.f32 %v1492_v57 }
 0xce4   : > { %v2136_v3 = vpop.eup %2135 }
 0xce5   : > { %v1494_v58 = vadd.f32 1.0, %v2136_v3 }
 0xce7   : > { %v1495_v59 = vmul.f32 0.5, %v1494_v58 }
 0xce9   : > { %v1496_v60 = vmul.f32 %v1495_v59, %v1483_v49 }
 0xceb   : > { %v1497_v61 = vpack.c.bf16 %v1496_v60, %v1496_v60 }
 0xced   : > { %1994 = vmatmul.mubr.msk.bf16.vlgmr.msra.gmra.mrb[28].mxu1 %vm1541_vm5, %v1497_v61 }
 0xdc0   : > { %v1579_v63 = vpop.f32.mrb[28].mxu1 }
 0xdc1   : > { %v1580_v0 = vadd.f32 %v1829_v62, %v1579_v63  ;;  %v1995_v2 = vpop.f32.mrb[29].mxu1 }
 0xdc2   : > { %v1582_v4 = vpop.f32.mrb[30].mxu1 }
 0xdc3   : > { %v1996_v5 = vpop.f32.mrb[31].mxu1  ;;  %v1585_v6 = vadd.f32 %v1580_v0, %v1417_v42 }
 0xdc5   : > { %v1586_v7 = vsel %vm615_vm2, %v1585_v6, 0.0 }
 0xdc6   : > { %1587 = vadd.xlane.f32.xlu1 %v1586_v7 }
 0xe53   : > { %v1588_v8 = vpop.xlane.xlu1 %1587 }
 0xe54   : > { %v1589_v9 = vmul.f32 0.03125, %v1588_v8 }
 0xe56   : > { %v1590_v39 = vsub.f32 %v1585_v6, %v1589_v9 }
 0xe58   : > { %v1591_v10 = vmul.f32 %v1590_v39, %v1590_v39 }
 0xe5a   : > { %v1592_v11 = vsel %vm615_vm2, %v1591_v10, 0.0 }
 0xe5b   : > { %1593 = vadd.xlane.f32.xlu1 %v1592_v11 }
 0xee8   : > { %v1594_v12 = vpop.xlane.xlu1 %1593 }
 0xee9   : > { %v1595_v14 = vmul.f32 0.03125, %v1594_v12 }
 0xeeb   : > { %v1596_v15 = vadd.f32 1e-05, %v1595_v14 }
 0xeed   : > { %2137 = vrsqrt.f32 %v1596_v15 }
 0xef6   : > { %1620 = sbr.rel (%p1837_p2) target bundleno = 3839 (0xeff), region = 104 }
 0xef7   : > { %v2138_v16 = vpop.eup %2137 }
 0xef8   : > { %v1598_v18 = vmul.f32 %v2138_v16, %v1590_v39 }
 0xefa   : > { %v1607_v20 = vmul.f32 %v1835_v17, %v1598_v18 }
 0xefc   : > { %v1616_v21 = vadd.f32 %v1836_v19, %v1607_v20 }
 0xefe   : > { %1621 = vst.msk [vmem:[#allocation2] sm:$0xff] %vm615_vm2, %v1616_v21 }
 0xeff PF: > { %p1838_p10 = scmp.ne.s32.totalorder %s2311_s24, 1 }
 0xf00   : > { %1626 = vst.msk [vmem:[%s2636_s1] sm:$0xff] (!%p1838_p10), %vm615_vm2, %v1616_v21 }
 0xf01   : > { %1625 = sbr.rel (%p1838_p10) target bundleno = 3848 (0xf08), region = 108 }
 0xf08 PF: > { %s2946_s9 = sld [smem:[#allocation14_spill]]  ;;  %s2947_s21 = sld [smem:[#allocation27_spill]] }
 0xf09   : > { %s1641_s15 = sshll.u32 %s2636_s1, 4  ;;  %s1628_s17 = scalar_lea.sflag [#allocation5], %s2624_s12  ;;  %s1642_s15 = int_to_ptr.vmem [resolvable:$true] %s1641_s15 }
 0xf0a   : > { %s2225_s0 = scalar_lea.vmem %s1642_s15, 128  ;;  %s2343_s24 = smov [#allocation9]  }
 0xf0b   : > { %p2226_p8 = scmp.ne.s32.totalorder %s1642_s15, %s2225_s0  ;;  %s2229_s18 = sshll.u32 %s2343_s24, 4  ;;  %s2230_s18 = int_to_ptr.vmem [resolvable:$false] %s2229_s18 }
 0xf0c   : > { %s2231_s20 = scalar_lea.vmem %s2230_s18, 256  ;;  %p2232_p7 = scmp.lt.s32.totalorder %s1642_s15, %s2230_s18 }
 0xf0d   : > { %p2227_p13 = pnand %p2226_p8, %p2569_p6  ;;  %p2233_p12 = scmp.lt.s32.totalorder %s2231_s20, %s2225_s0 }
 0xf0e   : > { %s1840_s29 = sshll.u32 %s2946_s9, 7  ;;  %s2948_s10 = smov %s2947_s21 }
 0xf0f   : > { %s2834_s13 = scalar_lea.hbm %s2947_s21, %s1840_s29  ;;  %p2228_p3 = pneg %p2227_p13 }
 0xf10   : > { %p2234_p11 = por %p2233_p12, %p2232_p7 }
 0xf12   : > { %p2235_p1 = pnand %p2234_p11, %p2228_p3 }
 0xf14   : > { %2238 = shalt.err (!%p2235_p1)
}
 0xf15   : > { %s2239_s12 = scalar_lea.hbm %s2834_s13, 128  ;;  %s2243_s9 = scalar_lea.hbm %s2948_s10, 256 }
 0xf16   : > { %p2240_p9 = scmp.ne.s32.totalorder %s2834_s13, %s2239_s12  ;;  %p2244_p0 = scmp.lt.u32.totalorder %s2834_s13, %s2948_s10 }
 0xf17   : > { %p2245_p2 = scmp.lt.u32.totalorder %s2243_s9, %s2239_s12  ;;  %p2247_p8 = scmp.lt.u32.totalorder %s2239_s12, %s2834_s13 }
 0xf18   : > { %p2241_p5 = pnand %p2240_p9, %p2569_p6 }
 0xf19   : > { %p2246_p10 = por %p2245_p2, %p2244_p0 }
 0xf1a   : > { %p2242_p4 = pneg %p2241_p5 }
 0xf1b   : > { %p2248_p13 = por %p2247_p8, %p2246_p10 }
 0xf1d   : > { %p2249_p3 = pnand %p2248_p13, %p2242_p4 }
 0xf1f   : > { %2252 = shalt.err (!%p2249_p3)
}
 0xf20   : > { %2007 = dma.vmem_to_hbm [thread:$0]  (%p2569_p6), %s1642_s15, 128, %s2834_s13, %s1628_s17  }
 0xf21 PF: > { %s2949_s30 = sld [smem:[#allocation13_spill]]  ;;  %s2950_s21 = sld [smem:[#allocation15_spill]] }
 0xf22   : > { %p2029_p7 = scmp.ge.s32.totalorder %s2327_s28, 2 }
 0xf27   : > { %s1653_s0 = sand.u32 1, %s2949_s30   ;;  %p2951_p12 = scmp.ne.s32.totalorder %s2950_s21, 0 }
 0xf28   : > { %s1654_s24 = scalar_lea.sflag [#allocation5], %s1653_s0 }
 0xf29   : > { %p2021_p11 = pnand %p2029_p7, %p2951_p12 }
 0xf2b   : > { %2294 = dma.done.wait (!%p2021_p11), %s1654_s24, 128  }
 0xf2c   : > { %2296 = vsyncadd (!%p2021_p11), %s1654_s24, 4294967168  ;;  %s33_s28 = sadd.s32 1, %s2327_s28   ;;  %s2952_s13 = sld [smem:[#allocation16_spill]] }
 0xf2d   : > { %p30_p1 = scmp.ge.s32.totalorder %s33_s28, 6   ;;  %s2953_s15 = sld [smem:[#allocation17_spill]] }
 0xf2e   : > { %s2954_s21 = smov %s2303_s22  ;;  %s2955_s22 = smov %s2307_s23 }
 0xf2f   : > { %s2956_s23 = smov %s2592_s19  ;;  %s2957_s24 = smov %s2319_s26 }
 0xf30   : > { %s2958_s25 = smov %s2323_s27  ;;  %32 = sbr.rel (!%p30_p1) target bundleno = 19 (0x13), region = 166 }
 0xf32   : > { %s2959_s26 = smov %s2952_s13 }
 0xf33   : > { %s2960_s27 = smov %s2953_s15 }
 0xf37   :  { %1659 = vsyncpa [#allocation4], 1 }
 0xf38   :  { %1661 = vsyncpa [#allocation4 + $0x1], 1 }
 0xf39   :  { %1662 = vsyncpa [#allocation7], 1 }
 0xf3a   :  { %1663 = vsyncpa [#allocation5], 1 }
 0xf3b   :  { %1665 = vsyncpa [#allocation5 + $0x1], 1 }

</bundles_post_ra>
